<compile_context>
chip_gen: v7x
topology: tpu7x:2x2x1
jax: 0.10.0
libtpu: 0.0.40
codegen_flags: <defaults>
</compile_context>

<pallas_src>
import functools

import jax
import jax.numpy as jnp
from jax.experimental import pallas as pl
from jax.experimental.pallas import tpu as pltpu

_BN_EPS = 1e-5
_INV_SQRT2 = 0.7071067811865476


def _round_up(n, m=128):
    return ((n + m - 1) // m) * m


def _zeros_map(ndim):
    return lambda i, _n=ndim: (0,) * _n


# ----------------------------------------------------------------------------
# In-kernel math helpers
# ----------------------------------------------------------------------------
def _erf(x):
    # Abramowitz & Stegun 7.1.26, |error| <= 1.5e-7: exact-GELU parity to f32 noise.
    a1, a2, a3, a4, a5 = (0.254829592, -0.284496736, 1.421413741,
                          -1.453152027, 1.061405429)
    p = 0.3275911
    ax = jnp.abs(x)
    t = 1.0 / (1.0 + p * ax)
    poly = ((((a5 * t + a4) * t + a3) * t + a2) * t + a1) * t
    y = 1.0 - poly * jnp.exp(-ax * ax)
    return jnp.where(x >= 0.0, y, -y)


# ----------------------------------------------------------------------------
# Pallas kernels
# ----------------------------------------------------------------------------
def _make_stage_kernel(small, t_len):
    """Fused EncoderBlock + EncoderResidualBlock (+ residual add) kernel."""

    def kernel(*refs):
        if small:
            x_ref, ew1, rw1, v_ref, o_ref = refs
        else:
            x_ref, ew1, ew3, rw1, rw3, v_ref, o_ref = refs

        bt = x_ref.shape[0]
        inv_n = 1.0 / float(bt)
        v = v_ref[...]                      # (8, Cp) f32: [g1,b1,g3,b3] x {enc,res}

        if not small:
            # Per-row time index (b-major rows -> t = row % T); boundary masks for
            # the k=3 conv's zero padding at t==0 / t==T-1.
            t_idx = jax.lax.broadcasted_iota(jnp.int32, (bt, 1), 0) % t_len
            mask_lo = (t_idx != 0).astype(jnp.float32)           # kill wrapped t-1 row
            mask_hi = (t_idx != t_len - 1).astype(jnp.float32)   # kill wrapped t+1 row

        def bn_gelu(h, g, b):
            # Train-mode BatchNorm1d (biased batch stats over rows) folded into one
            # scale/shift, then exact GELU.
            s = jnp.sum(h, axis=0, keepdims=True)
            ss = jnp.sum(h * h, axis=0, keepdims=True)
            mean = s * inv_n
            var = jnp.maximum(ss * inv_n - mean * mean, 0.0)
            scale = g * jax.lax.rsqrt(var + _BN_EPS)
            shift = b - mean * scale
            hn = h * scale + shift
            return 0.5 * hn * (1.0 + _erf(hn * _INV_SQRT2))

        def conv1(xb, w_ref, g, b):         # conv1d k=1 -> BN -> GELU (bias cancels in BN)
            h = jnp.dot(xb, w_ref[...], preferred_element_type=jnp.float32)
            return bn_gelu(h, g, b)

        def conv3(hf, w_ref, g, b):         # conv1d k=3, pad=1 -> BN -> GELU
            # Time-shifted copies via sublane roll + boundary mask; the three taps
            # are stacked along K into a single (bt, 3*Cp) @ (3*Cp, Cp) matmul.
            hm = pltpu.roll(hf, 1, 0) * mask_lo          # h[t-1] (zero at t==0)
            hp = pltpu.roll(hf, bt - 1, 0) * mask_hi     # h[t+1] (zero at t==T-1)
            h3 = jnp.concatenate([hm, hf, hp], axis=-1).astype(jnp.bfloat16)
            acc = jnp.dot(h3, w_ref[...], preferred_element_type=jnp.float32)
            return bn_gelu(acc, g, b)

        # EncoderBlock: ConvBlock(Cin -> Cout)
        h = conv1(x_ref[...], ew1, v[0:1, :], v[1:2, :])
        if not small:
            h = conv3(h, ew3, v[2:3, :], v[3:4, :])

        # TODO(synk): EncoderResidualBlock was not provided in the spec;
        #             assumed x + ConvBlock(C, C, small)(x).
        hb = h.astype(jnp.bfloat16)
        r = conv1(hb, rw1, v[4:5, :], v[5:6, :])
        if not small:
            r = conv3(r, rw3, v[6:7, :], v[7:8, :])

        o_ref[...] = (h + r).astype(o_ref.dtype)

    return kernel


def _head_kernel(x_ref, w_ref, b_ref, o_ref):
    o_ref[...] = jnp.dot(x_ref[...], w_ref[...],
                         preferred_element_type=jnp.float32) + b_ref[...]


# ----------------------------------------------------------------------------
# pallas_call wrappers
# ----------------------------------------------------------------------------
def fused_stage(rows, stage_p, small, t_len):
    """One encoder stage (EncoderBlock + residual block) in a single pallas_call."""
    bt, cin_p = rows.shape
    cout_p = stage_p["enc"]["w1"].shape[1]
    enc, res = stage_p["enc"], stage_p["res"]

    if small:
        args = [rows, enc["w1"], res["w1"], stage_p["bn"]]
    else:
        args = [rows, enc["w1"], enc["w3"], res["w1"], res["w3"], stage_p["bn"]]

    in_specs = [pl.BlockSpec(a.shape, _zeros_map(a.ndim)) for a in args]
    out_shape = jax.ShapeDtypeStruct((bt, cout_p), jnp.bfloat16)

    flops = 2 * bt * cin_p * cout_p + 2 * bt * cout_p * cout_p          # two k=1 convs
    n_gelu = 2
    if not small:
        flops += 2 * (2 * bt * (3 * cout_p) * cout_p)                   # two stacked k=3 convs
        n_gelu = 4
    transc = n_gelu * (bt * cout_p)
    bytes_acc = sum(int(a.size) * a.dtype.itemsize for a in args) + 2 * bt * cout_p

    return pl.pallas_call(
        _make_stage_kernel(small, t_len),
        out_shape=out_shape,
        grid=(1,),
        in_specs=in_specs,
        out_specs=pl.BlockSpec((bt, cout_p), lambda i: (0, 0)),
        compiler_params=pltpu.CompilerParams(dimension_semantics=("arbitrary",)),
        cost_estimate=pl.CostEstimate(flops=int(flops), transcendentals=int(transc),
                                      bytes_accessed=int(bytes_acc)),
    )(*args)


def head(flat, w, b, fout):
    """Linear head with lane-padded (128-wide) output; real columns sliced outside."""
    bsz, k = flat.shape
    fp = w.shape[1]
    args = (flat, w, b)
    in_specs = [pl.BlockSpec(a.shape, _zeros_map(a.ndim)) for a in args]
    bytes_acc = sum(int(a.size) * a.dtype.itemsize for a in args) + 4 * bsz * fp
    out = pl.pallas_call(
        _head_kernel,
        out_shape=jax.ShapeDtypeStruct((bsz, fp), jnp.float32),
        grid=(1,),
        in_specs=in_specs,
        out_specs=pl.BlockSpec((bsz, fp), lambda i: (0, 0)),
        compiler_params=pltpu.CompilerParams(dimension_semantics=("arbitrary",)),
        cost_estimate=pl.CostEstimate(flops=int(2 * bsz * k * fp), transcendentals=0,
                                      bytes_accessed=int(bytes_acc)),
    )(*args)
    return out[:, :fout]


# ----------------------------------------------------------------------------
# Forward pass
# ----------------------------------------------------------------------------
def encoder_forward(x_nct, params, z_dim, small):
    # x_nct: (B, num_node, num_time) — PyTorch NCL layout.
    bsz, c0, t_len = x_nct.shape
    cin_p = params["cin_p"]
    x = jnp.transpose(x_nct, (0, 2, 1)).astype(jnp.bfloat16)         # (B, T, C0)
    if cin_p > c0:
        x = jnp.pad(x, ((0, 0), (0, 0), (0, cin_p - c0)))            # lane pad
    rows = x.reshape(bsz * t_len, cin_p)

    xs = []
    n_stages = len(params["stages"])
    flat = None
    for i, st in enumerate(params["stages"]):
        rows = fused_stage(rows, st, small, t_len)                   # (B*T, Cp) bf16
        flat = rows.reshape(bsz, t_len * rows.shape[1])              # free reshape
        if i + 1 < n_stages:        # last xs entry is dropped by the reference
            xs.append(head(flat, st["xs_w"], st["xs_b"], params["h_dim"]))

    out = head(flat, params["last_w"], params["last_b"], 2 * z_dim)
    mu = out[:, :z_dim]
    log_var = out[:, z_dim:2 * z_dim]
    return mu, log_var, xs[::-1]    # == xs[:-1][::-1] of the reference


# ----------------------------------------------------------------------------
# Deterministic parameter construction (torch layouts -> padded TPU layouts)
# ----------------------------------------------------------------------------
def _keygen(key):
    while True:
        key, sub = jax.random.split(key)
        yield sub


def _init_conv_block(kg, cin, cin_p, cout, cout_p, small):
    # Conv1d k=1 weight (Cout, Cin, 1) -> padded (Cin_p, Cout_p) bf16.
    # Conv biases are NOT materialized: a per-channel constant added before a
    # train-mode (batch-stat) BatchNorm cancels exactly.
    w1_t = 0.1 * jax.random.normal(next(kg), (cout, cin), jnp.float32)
    w1 = jnp.zeros((cin_p, cout_p), jnp.float32).at[:cin, :cout].set(w1_t.T)
    weights = {"w1": w1.astype(jnp.bfloat16)}
    gb = [(1.0 + 0.1 * jax.random.normal(next(kg), (cout,), jnp.float32),
           0.1 * jax.random.normal(next(kg), (cout,), jnp.float32))]
    if not small:
        # Conv1d k=3 weight (Cout, Cout, 3); tap k multiplies x[t-1+k].
        # Stored stacked along K as (3*Cout_p, Cout_p) so the kernel does a
        # single matmul against [h(t-1) | h(t) | h(t+1)].
        w3_t = 0.1 * jax.random.normal(next(kg), (cout, cout, 3), jnp.float32)
        w3 = jnp.zeros((3 * cout_p, cout_p), jnp.float32)
        for k in range(3):
            w3 = w3.at[k * cout_p:k * cout_p + cout, :cout].set(w3_t[:, :, k].T)
        weights["w3"] = w3.astype(jnp.bfloat16)
        gb.append((1.0 + 0.1 * jax.random.normal(next(kg), (cout,), jnp.float32),
                   0.1 * jax.random.normal(next(kg), (cout,), jnp.float32)))
    return weights, gb


def _init_linear(kg, c, c_p, t_len, fout):
    # nn.Linear weight (fout, C*T) with torch feature index = ch*T + t.
    # Permute + zero-pad rows so the kernel consumes the natural (B, T*Cp)
    # row-major flatten of (B, T, Cp); pad the output width to 128 lanes so the
    # head store is lane-dense.
    fout_p = _round_up(fout)
    w_t = 0.1 * jax.random.normal(next(kg), (fout, c * t_len), jnp.float32)
    b = 0.1 * jax.random.normal(next(kg), (fout,), jnp.float32)
    w3d = jnp.transpose(w_t.reshape(fout, c, t_len), (2, 1, 0))      # (T, C, F)
    w = jnp.zeros((t_len, c_p, fout_p), jnp.float32).at[:, :c, :fout].set(w3d)
    bp = jnp.zeros((1, fout_p), jnp.float32).at[0, :fout].set(b)
    return w.reshape(t_len * c_p, fout_p).astype(jnp.bfloat16), bp


def init_encoder_params(key, z_dim, hierarchical_dim, num_filter_enc, num_node,
                        num_time, small):
    kg = _keygen(key)
    cin, cin_p = num_node, _round_up(num_node)
    stages = []
    for cout in num_filter_enc:
        cout_p = _round_up(cout)
        enc_w, enc_gb = _init_conv_block(kg, cin, cin_p, cout, cout_p, small)
        res_w, res_gb = _init_conv_block(kg, cout, cout_p, cout, cout_p, small)
        # Merged per-stage BN parameters: rows [g1,b1,g3,b3] for enc then res.
        bn = jnp.zeros((8, cout_p), jnp.float32)
        for base, gb in ((0, enc_gb), (4, res_gb)):
            for j, (g, b) in enumerate(gb):
                bn = bn.at[base + 2 * j, :g.shape[0]].set(g)
                bn = bn.at[base + 2 * j + 1, :b.shape[0]].set(b)
        xs_w, xs_b = _init_linear(kg, cout, cout_p, num_time, int(hierarchical_dim))
        stages.append({"enc": enc_w, "res": res_w, "bn": bn,
                       "xs_w": xs_w, "xs_b": xs_b})
        cin, cin_p = cout, cout_p
    last_w, last_b = _init_linear(kg, num_filter_enc[-1],
                                  _round_up(num_filter_enc[-1]), num_time, 2 * z_dim)
    return {"stages": stages, "last_w": last_w, "last_b": last_b,
            "cin_p": _round_up(num_node), "h_dim": int(hierarchical_dim)}


# ----------------------------------------------------------------------------
if __name__ == "__main__":
    B = 2
    num_node = 4
    num_time = 16
    num_filter_enc = [8, 16]
    z_dim = 6
    hierarchical_dim = 12
    small = False

    key = jax.random.PRNGKey(0)
    k_param, k_x = jax.random.split(key)
    params = init_encoder_params(k_param, z_dim, hierarchical_dim,
                                 num_filter_enc, num_node, num_time, small)
    x = jax.random.normal(k_x, (B, num_node, num_time), jnp.float32)

    fwd = jax.jit(functools.partial(encoder_forward, params=params,
                                    z_dim=z_dim, small=small))
    mu, log_var, xs = fwd(x)
    jax.block_until_ready((mu, log_var, xs))

    assert mu.shape == (B, z_dim)
    assert log_var.shape == (B, z_dim)
    assert len(xs) == len(num_filter_enc) - 1
    assert all(h.shape == (B, hierarchical_dim) for h in xs)
    assert all(bool(jnp.all(jnp.isfinite(a))) for a in (mu, log_var, *xs))
    print("KERNEL_OK")
</pallas_src>

<mosaic_0001>
module attributes {stable_mosaic.version = 11 : i64} {
  func.func @kernel(%arg0: i32, %arg1: memref<32x128xbf16, #tpu.memory_space<vmem>>, %arg2: memref<128x128xbf16, #tpu.memory_space<vmem>>, %arg3: memref<384x128xbf16, #tpu.memory_space<vmem>>, %arg4: memref<128x128xbf16, #tpu.memory_space<vmem>>, %arg5: memref<384x128xbf16, #tpu.memory_space<vmem>>, %arg6: memref<8x128xf32, #tpu.memory_space<vmem>>, %arg7: memref<32x128xbf16, #tpu.memory_space<vmem>>) attributes {dimension_semantics = [#tpu.dimension_semantics<arbitrary>], iteration_bounds = array<i64: 1>, scalar_prefetch = 0 : i64, scratch_operands = 0 : i64, tpu.core_type = #tpu.core_type<tc>, window_params = [{pipeline_mode = #tpu.pipeline_mode<synchronous>, transform_indices = @transform_0, window_bounds = array<i64: 32, 128>}, {pipeline_mode = #tpu.pipeline_mode<synchronous>, transform_indices = @transform_1, window_bounds = array<i64: 128, 128>}, {pipeline_mode = #tpu.pipeline_mode<synchronous>, transform_indices = @transform_2, window_bounds = array<i64: 384, 128>}, {pipeline_mode = #tpu.pipeline_mode<synchronous>, transform_indices = @transform_3, window_bounds = array<i64: 128, 128>}, {pipeline_mode = #tpu.pipeline_mode<synchronous>, transform_indices = @transform_4, window_bounds = array<i64: 384, 128>}, {pipeline_mode = #tpu.pipeline_mode<synchronous>, transform_indices = @transform_5, window_bounds = array<i64: 8, 128>}, {pipeline_mode = #tpu.pipeline_mode<synchronous>, transform_indices = @transform_6, window_bounds = array<i64: 32, 128>}]} {
    %c0 = arith.constant 0 : index
    %c0_0 = arith.constant 0 : index
    %0 = vector.load %arg6[%c0, %c0_0] : memref<8x128xf32, #tpu.memory_space<vmem>>, vector<8x128xf32>
    %1 = tpu.iota {dimensions = array<i32: 0>} : vector<32x1xi32>
    %c16_i32 = arith.constant 16 : i32
    %c0_i32 = arith.constant 0 : i32
    %2 = arith.cmpi eq, %c16_i32, %c0_i32 : i32
    %c1_i32 = arith.constant 1 : i32
    %3 = arith.select %2, %c1_i32, %c16_i32 : i32
    %4 = vector.broadcast %3 : i32 to vector<32x1xi32>
    %5 = arith.remsi %1, %4 : vector<32x1xi32>
    %c0_i32_1 = arith.constant 0 : i32
    %6 = vector.broadcast %c0_i32_1 : i32 to vector<32x1xi32>
    %7 = arith.cmpi ne, %5, %6 : vector<32x1xi32>
    %c0_i32_2 = arith.constant 0 : i32
    %8 = vector.broadcast %c0_i32_2 : i32 to vector<32x1xi32>
    %9 = arith.cmpi slt, %5, %8 : vector<32x1xi32>
    %c0_i32_3 = arith.constant 0 : i32
    %10 = arith.cmpi slt, %3, %c0_i32_3 : i32
    %11 = vector.broadcast %10 : i1 to vector<32x1xi1>
    %12 = vector.broadcast %11 : vector<32x1xi1> to vector<32x1xi1>
    %13 = arith.xori %9, %12 : vector<32x1xi1>
    %14 = arith.andi %13, %7 : vector<32x1xi1>
    %15 = vector.broadcast %3 : i32 to vector<32x1xi32>
    %16 = arith.addi %5, %15 : vector<32x1xi32>
    %17 = arith.select %14, %16, %5 : vector<32x1xi1>, vector<32x1xi32>
    %c0_i32_4 = arith.constant 0 : i32
    %18 = vector.broadcast %c0_i32_4 : i32 to vector<32x1xi32>
    %19 = arith.cmpi ne, %17, %18 : vector<32x1xi32>
    %20 = arith.extui %19 : vector<32x1xi1> to vector<32x1xi32>
    %21 = arith.sitofp %20 : vector<32x1xi32> to vector<32x1xf32>
    %c15_i32 = arith.constant 15 : i32
    %22 = vector.broadcast %c15_i32 : i32 to vector<32x1xi32>
    %23 = arith.cmpi ne, %17, %22 : vector<32x1xi32>
    %24 = arith.extui %23 : vector<32x1xi1> to vector<32x1xi32>
    %25 = arith.sitofp %24 : vector<32x1xi32> to vector<32x1xf32>
    %c0_5 = arith.constant 0 : index
    %c0_6 = arith.constant 0 : index
    %26 = vector.load %arg1[%c0_5, %c0_6] : memref<32x128xbf16, #tpu.memory_space<vmem>>, vector<32x128xbf16>
    %27 = vector.extract_strided_slice %0 {offsets = [0, 0], sizes = [1, 128], strides = [1, 1]} : vector<8x128xf32> to vector<1x128xf32>
    %28 = vector.extract_strided_slice %0 {offsets = [1, 0], sizes = [1, 128], strides = [1, 1]} : vector<8x128xf32> to vector<1x128xf32>
    %c0_7 = arith.constant 0 : index
    %c0_8 = arith.constant 0 : index
    %29 = vector.load %arg2[%c0_7, %c0_8] : memref<128x128xbf16, #tpu.memory_space<vmem>>, vector<128x128xbf16>
    %cst = arith.constant dense<0.000000e+00> : vector<32x128xf32>
    %30 = tpu.matmul %26, %29, %cst {dimension_numbers = #tpu.dot_dimension_numbers<[1], [0], [0], [1], [0, 0, 1, 1], [], []>} : vector<32x128xbf16>, vector<128x128xbf16>, vector<32x128xf32> -> vector<32x128xf32>
    %cst_9 = arith.constant dense<0.000000e+00> : vector<128xf32>
    %31 = vector.multi_reduction <add>, %30, %cst_9 [0] : vector<32x128xf32> to vector<128xf32>
    %32 = vector.shape_cast %31 : vector<128xf32> to vector<1x128xf32>
    %33 = arith.mulf %30, %30 : vector<32x128xf32>
    %cst_10 = arith.constant dense<0.000000e+00> : vector<128xf32>
    %34 = vector.multi_reduction <add>, %33, %cst_10 [0] : vector<32x128xf32> to vector<128xf32>
    %35 = vector.shape_cast %34 : vector<128xf32> to vector<1x128xf32>
    %cst_11 = arith.constant 3.125000e-02 : f32
    %36 = vector.broadcast %cst_11 : f32 to vector<1x128xf32>
    %37 = arith.mulf %32, %36 : vector<1x128xf32>
    %cst_12 = arith.constant 3.125000e-02 : f32
    %38 = vector.broadcast %cst_12 : f32 to vector<1x128xf32>
    %39 = arith.mulf %35, %38 : vector<1x128xf32>
    %40 = arith.mulf %37, %37 : vector<1x128xf32>
    %41 = arith.subf %39, %40 : vector<1x128xf32>
    %cst_13 = arith.constant 0.000000e+00 : f32
    %42 = vector.broadcast %cst_13 : f32 to vector<1x128xf32>
    %43 = arith.maximumf %41, %42 : vector<1x128xf32>
    %cst_14 = arith.constant 9.99999974E-6 : f32
    %44 = vector.broadcast %cst_14 : f32 to vector<1x128xf32>
    %45 = arith.addf %43, %44 : vector<1x128xf32>
    %46 = math.rsqrt %45 : vector<1x128xf32>
    %47 = arith.mulf %27, %46 : vector<1x128xf32>
    %48 = arith.mulf %37, %47 : vector<1x128xf32>
    %49 = arith.subf %28, %48 : vector<1x128xf32>
    %50 = vector.broadcast %47 : vector<1x128xf32> to vector<32x128xf32>
    %51 = arith.mulf %30, %50 : vector<32x128xf32>
    %52 = vector.broadcast %49 : vector<1x128xf32> to vector<32x128xf32>
    %53 = arith.addf %51, %52 : vector<32x128xf32>
    %cst_15 = arith.constant 5.000000e-01 : f32
    %54 = vector.broadcast %cst_15 : f32 to vector<32x128xf32>
    %55 = arith.mulf %54, %53 : vector<32x128xf32>
    %cst_16 = arith.constant 0.707106769 : f32
    %56 = vector.broadcast %cst_16 : f32 to vector<32x128xf32>
    %57 = arith.mulf %53, %56 : vector<32x128xf32>
    %58 = math.absf %57 : vector<32x128xf32>
    %cst_17 = arith.constant 0.327591091 : f32
    %59 = vector.broadcast %cst_17 : f32 to vector<32x128xf32>
    %60 = arith.mulf %59, %58 : vector<32x128xf32>
    %cst_18 = arith.constant 1.000000e+00 : f32
    %61 = vector.broadcast %cst_18 : f32 to vector<32x128xf32>
    %62 = arith.addf %61, %60 : vector<32x128xf32>
    %cst_19 = arith.constant 1.000000e+00 : f32
    %63 = vector.broadcast %cst_19 : f32 to vector<32x128xf32>
    %64 = arith.divf %63, %62 : vector<32x128xf32>
    %cst_20 = arith.constant 1.06140542 : f32
    %65 = vector.broadcast %cst_20 : f32 to vector<32x128xf32>
    %66 = arith.mulf %65, %64 : vector<32x128xf32>
    %cst_21 = arith.constant -1.45315206 : f32
    %67 = vector.broadcast %cst_21 : f32 to vector<32x128xf32>
    %68 = arith.addf %66, %67 : vector<32x128xf32>
    %69 = arith.mulf %68, %64 : vector<32x128xf32>
    %cst_22 = arith.constant 1.42141378 : f32
    %70 = vector.broadcast %cst_22 : f32 to vector<32x128xf32>
    %71 = arith.addf %69, %70 : vector<32x128xf32>
    %72 = arith.mulf %71, %64 : vector<32x128xf32>
    %cst_23 = arith.constant -0.284496725 : f32
    %73 = vector.broadcast %cst_23 : f32 to vector<32x128xf32>
    %74 = arith.addf %72, %73 : vector<32x128xf32>
    %75 = arith.mulf %74, %64 : vector<32x128xf32>
    %cst_24 = arith.constant 0.254829586 : f32
    %76 = vector.broadcast %cst_24 : f32 to vector<32x128xf32>
    %77 = arith.addf %75, %76 : vector<32x128xf32>
    %78 = arith.mulf %77, %64 : vector<32x128xf32>
    %cst_25 = arith.constant 0.000000e+00 : f32
    %79 = vector.broadcast %cst_25 : f32 to vector<32x128xf32>
    %80 = arith.subf %79, %58 : vector<32x128xf32>
    %81 = arith.mulf %80, %58 : vector<32x128xf32>
    %82 = math.exp %81 : vector<32x128xf32>
    %83 = arith.mulf %78, %82 : vector<32x128xf32>
    %cst_26 = arith.constant 1.000000e+00 : f32
    %84 = vector.broadcast %cst_26 : f32 to vector<32x128xf32>
    %85 = arith.subf %84, %83 : vector<32x128xf32>
    %cst_27 = arith.constant 0.000000e+00 : f32
    %86 = vector.broadcast %cst_27 : f32 to vector<32x128xf32>
    %87 = arith.cmpf oge, %57, %86 : vector<32x128xf32>
    %cst_28 = arith.constant 0.000000e+00 : f32
    %88 = vector.broadcast %cst_28 : f32 to vector<32x128xf32>
    %89 = arith.subf %88, %85 : vector<32x128xf32>
    %90 = arith.select %87, %85, %89 : vector<32x128xi1>, vector<32x128xf32>
    %cst_29 = arith.constant 1.000000e+00 : f32
    %91 = vector.broadcast %cst_29 : f32 to vector<32x128xf32>
    %92 = arith.addf %91, %90 : vector<32x128xf32>
    %93 = arith.mulf %55, %92 : vector<32x128xf32>
    %94 = vector.extract_strided_slice %0 {offsets = [2, 0], sizes = [1, 128], strides = [1, 1]} : vector<8x128xf32> to vector<1x128xf32>
    %95 = vector.extract_strided_slice %0 {offsets = [3, 0], sizes = [1, 128], strides = [1, 1]} : vector<8x128xf32> to vector<1x128xf32>
    %c1_i32_30 = arith.constant 1 : i32
    %96 = tpu.dynamic_rotate %93 by %c1_i32_30 dim 0 : vector<32x128xf32>, i32 -> vector<32x128xf32>
    %97 = vector.broadcast %21 : vector<32x1xf32> to vector<32x128xf32>
    %98 = arith.mulf %96, %97 : vector<32x128xf32>
    %c31_i32 = arith.constant 31 : i32
    %99 = tpu.dynamic_rotate %93 by %c31_i32 dim 0 : vector<32x128xf32>, i32 -> vector<32x128xf32>
    %100 = vector.broadcast %25 : vector<32x1xf32> to vector<32x128xf32>
    %101 = arith.mulf %99, %100 : vector<32x128xf32>
    %102 = tpu.concatenate %98, %93, %101 in 1 : vector<32x128xf32>, vector<32x128xf32>, vector<32x128xf32> -> vector<32x384xf32>
    %103 = arith.truncf %102 : vector<32x384xf32> to vector<32x384xbf16>
    %c0_31 = arith.constant 0 : index
    %c0_32 = arith.constant 0 : index
    %104 = vector.load %arg3[%c0_31, %c0_32] : memref<384x128xbf16, #tpu.memory_space<vmem>>, vector<384x128xbf16>
    %cst_33 = arith.constant dense<0.000000e+00> : vector<32x128xf32>
    %105 = tpu.matmul %103, %104, %cst_33 {dimension_numbers = #tpu.dot_dimension_numbers<[1], [0], [0], [1], [0, 0, 1, 1], [], []>} : vector<32x384xbf16>, vector<384x128xbf16>, vector<32x128xf32> -> vector<32x128xf32>
    %cst_34 = arith.constant dense<0.000000e+00> : vector<128xf32>
    %106 = vector.multi_reduction <add>, %105, %cst_34 [0] : vector<32x128xf32> to vector<128xf32>
    %107 = vector.shape_cast %106 : vector<128xf32> to vector<1x128xf32>
    %108 = arith.mulf %105, %105 : vector<32x128xf32>
    %cst_35 = arith.constant dense<0.000000e+00> : vector<128xf32>
    %109 = vector.multi_reduction <add>, %108, %cst_35 [0] : vector<32x128xf32> to vector<128xf32>
    %110 = vector.shape_cast %109 : vector<128xf32> to vector<1x128xf32>
    %cst_36 = arith.constant 3.125000e-02 : f32
    %111 = vector.broadcast %cst_36 : f32 to vector<1x128xf32>
    %112 = arith.mulf %107, %111 : vector<1x128xf32>
    %cst_37 = arith.constant 3.125000e-02 : f32
    %113 = vector.broadcast %cst_37 : f32 to vector<1x128xf32>
    %114 = arith.mulf %110, %113 : vector<1x128xf32>
    %115 = arith.mulf %112, %112 : vector<1x128xf32>
    %116 = arith.subf %114, %115 : vector<1x128xf32>
    %cst_38 = arith.constant 0.000000e+00 : f32
    %117 = vector.broadcast %cst_38 : f32 to vector<1x128xf32>
    %118 = arith.maximumf %116, %117 : vector<1x128xf32>
    %cst_39 = arith.constant 9.99999974E-6 : f32
    %119 = vector.broadcast %cst_39 : f32 to vector<1x128xf32>
    %120 = arith.addf %118, %119 : vector<1x128xf32>
    %121 = math.rsqrt %120 : vector<1x128xf32>
    %122 = arith.mulf %94, %121 : vector<1x128xf32>
    %123 = arith.mulf %112, %122 : vector<1x128xf32>
    %124 = arith.subf %95, %123 : vector<1x128xf32>
    %125 = vector.broadcast %122 : vector<1x128xf32> to vector<32x128xf32>
    %126 = arith.mulf %105, %125 : vector<32x128xf32>
    %127 = vector.broadcast %124 : vector<1x128xf32> to vector<32x128xf32>
    %128 = arith.addf %126, %127 : vector<32x128xf32>
    %cst_40 = arith.constant 5.000000e-01 : f32
    %129 = vector.broadcast %cst_40 : f32 to vector<32x128xf32>
    %130 = arith.mulf %129, %128 : vector<32x128xf32>
    %cst_41 = arith.constant 0.707106769 : f32
    %131 = vector.broadcast %cst_41 : f32 to vector<32x128xf32>
    %132 = arith.mulf %128, %131 : vector<32x128xf32>
    %133 = math.absf %132 : vector<32x128xf32>
    %cst_42 = arith.constant 0.327591091 : f32
    %134 = vector.broadcast %cst_42 : f32 to vector<32x128xf32>
    %135 = arith.mulf %134, %133 : vector<32x128xf32>
    %cst_43 = arith.constant 1.000000e+00 : f32
    %136 = vector.broadcast %cst_43 : f32 to vector<32x128xf32>
    %137 = arith.addf %136, %135 : vector<32x128xf32>
    %cst_44 = arith.constant 1.000000e+00 : f32
    %138 = vector.broadcast %cst_44 : f32 to vector<32x128xf32>
    %139 = arith.divf %138, %137 : vector<32x128xf32>
    %cst_45 = arith.constant 1.06140542 : f32
    %140 = vector.broadcast %cst_45 : f32 to vector<32x128xf32>
    %141 = arith.mulf %140, %139 : vector<32x128xf32>
    %cst_46 = arith.constant -1.45315206 : f32
    %142 = vector.broadcast %cst_46 : f32 to vector<32x128xf32>
    %143 = arith.addf %141, %142 : vector<32x128xf32>
    %144 = arith.mulf %143, %139 : vector<32x128xf32>
    %cst_47 = arith.constant 1.42141378 : f32
    %145 = vector.broadcast %cst_47 : f32 to vector<32x128xf32>
    %146 = arith.addf %144, %145 : vector<32x128xf32>
    %147 = arith.mulf %146, %139 : vector<32x128xf32>
    %cst_48 = arith.constant -0.284496725 : f32
    %148 = vector.broadcast %cst_48 : f32 to vector<32x128xf32>
    %149 = arith.addf %147, %148 : vector<32x128xf32>
    %150 = arith.mulf %149, %139 : vector<32x128xf32>
    %cst_49 = arith.constant 0.254829586 : f32
    %151 = vector.broadcast %cst_49 : f32 to vector<32x128xf32>
    %152 = arith.addf %150, %151 : vector<32x128xf32>
    %153 = arith.mulf %152, %139 : vector<32x128xf32>
    %cst_50 = arith.constant 0.000000e+00 : f32
    %154 = vector.broadcast %cst_50 : f32 to vector<32x128xf32>
    %155 = arith.subf %154, %133 : vector<32x128xf32>
    %156 = arith.mulf %155, %133 : vector<32x128xf32>
    %157 = math.exp %156 : vector<32x128xf32>
    %158 = arith.mulf %153, %157 : vector<32x128xf32>
    %cst_51 = arith.constant 1.000000e+00 : f32
    %159 = vector.broadcast %cst_51 : f32 to vector<32x128xf32>
    %160 = arith.subf %159, %158 : vector<32x128xf32>
    %cst_52 = arith.constant 0.000000e+00 : f32
    %161 = vector.broadcast %cst_52 : f32 to vector<32x128xf32>
    %162 = arith.cmpf oge, %132, %161 : vector<32x128xf32>
    %cst_53 = arith.constant 0.000000e+00 : f32
    %163 = vector.broadcast %cst_53 : f32 to vector<32x128xf32>
    %164 = arith.subf %163, %160 : vector<32x128xf32>
    %165 = arith.select %162, %160, %164 : vector<32x128xi1>, vector<32x128xf32>
    %cst_54 = arith.constant 1.000000e+00 : f32
    %166 = vector.broadcast %cst_54 : f32 to vector<32x128xf32>
    %167 = arith.addf %166, %165 : vector<32x128xf32>
    %168 = arith.mulf %130, %167 : vector<32x128xf32>
    %169 = arith.truncf %168 : vector<32x128xf32> to vector<32x128xbf16>
    %170 = vector.extract_strided_slice %0 {offsets = [4, 0], sizes = [1, 128], strides = [1, 1]} : vector<8x128xf32> to vector<1x128xf32>
    %171 = vector.extract_strided_slice %0 {offsets = [5, 0], sizes = [1, 128], strides = [1, 1]} : vector<8x128xf32> to vector<1x128xf32>
    %c0_55 = arith.constant 0 : index
    %c0_56 = arith.constant 0 : index
    %172 = vector.load %arg4[%c0_55, %c0_56] : memref<128x128xbf16, #tpu.memory_space<vmem>>, vector<128x128xbf16>
    %cst_57 = arith.constant dense<0.000000e+00> : vector<32x128xf32>
    %173 = tpu.matmul %169, %172, %cst_57 {dimension_numbers = #tpu.dot_dimension_numbers<[1], [0], [0], [1], [0, 0, 1, 1], [], []>} : vector<32x128xbf16>, vector<128x128xbf16>, vector<32x128xf32> -> vector<32x128xf32>
    %cst_58 = arith.constant dense<0.000000e+00> : vector<128xf32>
    %174 = vector.multi_reduction <add>, %173, %cst_58 [0] : vector<32x128xf32> to vector<128xf32>
    %175 = vector.shape_cast %174 : vector<128xf32> to vector<1x128xf32>
    %176 = arith.mulf %173, %173 : vector<32x128xf32>
    %cst_59 = arith.constant dense<0.000000e+00> : vector<128xf32>
    %177 = vector.multi_reduction <add>, %176, %cst_59 [0] : vector<32x128xf32> to vector<128xf32>
    %178 = vector.shape_cast %177 : vector<128xf32> to vector<1x128xf32>
    %cst_60 = arith.constant 3.125000e-02 : f32
    %179 = vector.broadcast %cst_60 : f32 to vector<1x128xf32>
    %180 = arith.mulf %175, %179 : vector<1x128xf32>
    %cst_61 = arith.constant 3.125000e-02 : f32
    %181 = vector.broadcast %cst_61 : f32 to vector<1x128xf32>
    %182 = arith.mulf %178, %181 : vector<1x128xf32>
    %183 = arith.mulf %180, %180 : vector<1x128xf32>
    %184 = arith.subf %182, %183 : vector<1x128xf32>
    %cst_62 = arith.constant 0.000000e+00 : f32
    %185 = vector.broadcast %cst_62 : f32 to vector<1x128xf32>
    %186 = arith.maximumf %184, %185 : vector<1x128xf32>
    %cst_63 = arith.constant 9.99999974E-6 : f32
    %187 = vector.broadcast %cst_63 : f32 to vector<1x128xf32>
    %188 = arith.addf %186, %187 : vector<1x128xf32>
    %189 = math.rsqrt %188 : vector<1x128xf32>
    %190 = arith.mulf %170, %189 : vector<1x128xf32>
    %191 = arith.mulf %180, %190 : vector<1x128xf32>
    %192 = arith.subf %171, %191 : vector<1x128xf32>
    %193 = vector.broadcast %190 : vector<1x128xf32> to vector<32x128xf32>
    %194 = arith.mulf %173, %193 : vector<32x128xf32>
    %195 = vector.broadcast %192 : vector<1x128xf32> to vector<32x128xf32>
    %196 = arith.addf %194, %195 : vector<32x128xf32>
    %cst_64 = arith.constant 5.000000e-01 : f32
    %197 = vector.broadcast %cst_64 : f32 to vector<32x128xf32>
    %198 = arith.mulf %197, %196 : vector<32x128xf32>
    %cst_65 = arith.constant 0.707106769 : f32
    %199 = vector.broadcast %cst_65 : f32 to vector<32x128xf32>
    %200 = arith.mulf %196, %199 : vector<32x128xf32>
    %201 = math.absf %200 : vector<32x128xf32>
    %cst_66 = arith.constant 0.327591091 : f32
    %202 = vector.broadcast %cst_66 : f32 to vector<32x128xf32>
    %203 = arith.mulf %202, %201 : vector<32x128xf32>
    %cst_67 = arith.constant 1.000000e+00 : f32
    %204 = vector.broadcast %cst_67 : f32 to vector<32x128xf32>
    %205 = arith.addf %204, %203 : vector<32x128xf32>
    %cst_68 = arith.constant 1.000000e+00 : f32
    %206 = vector.broadcast %cst_68 : f32 to vector<32x128xf32>
    %207 = arith.divf %206, %205 : vector<32x128xf32>
    %cst_69 = arith.constant 1.06140542 : f32
    %208 = vector.broadcast %cst_69 : f32 to vector<32x128xf32>
    %209 = arith.mulf %208, %207 : vector<32x128xf32>
    %cst_70 = arith.constant -1.45315206 : f32
    %210 = vector.broadcast %cst_70 : f32 to vector<32x128xf32>
    %211 = arith.addf %209, %210 : vector<32x128xf32>
    %212 = arith.mulf %211, %207 : vector<32x128xf32>
    %cst_71 = arith.constant 1.42141378 : f32
    %213 = vector.broadcast %cst_71 : f32 to vector<32x128xf32>
    %214 = arith.addf %212, %213 : vector<32x128xf32>
    %215 = arith.mulf %214, %207 : vector<32x128xf32>
    %cst_72 = arith.constant -0.284496725 : f32
    %216 = vector.broadcast %cst_72 : f32 to vector<32x128xf32>
    %217 = arith.addf %215, %216 : vector<32x128xf32>
    %218 = arith.mulf %217, %207 : vector<32x128xf32>
    %cst_73 = arith.constant 0.254829586 : f32
    %219 = vector.broadcast %cst_73 : f32 to vector<32x128xf32>
    %220 = arith.addf %218, %219 : vector<32x128xf32>
    %221 = arith.mulf %220, %207 : vector<32x128xf32>
    %cst_74 = arith.constant 0.000000e+00 : f32
    %222 = vector.broadcast %cst_74 : f32 to vector<32x128xf32>
    %223 = arith.subf %222, %201 : vector<32x128xf32>
    %224 = arith.mulf %223, %201 : vector<32x128xf32>
    %225 = math.exp %224 : vector<32x128xf32>
    %226 = arith.mulf %221, %225 : vector<32x128xf32>
    %cst_75 = arith.constant 1.000000e+00 : f32
    %227 = vector.broadcast %cst_75 : f32 to vector<32x128xf32>
    %228 = arith.subf %227, %226 : vector<32x128xf32>
    %cst_76 = arith.constant 0.000000e+00 : f32
    %229 = vector.broadcast %cst_76 : f32 to vector<32x128xf32>
    %230 = arith.cmpf oge, %200, %229 : vector<32x128xf32>
    %cst_77 = arith.constant 0.000000e+00 : f32
    %231 = vector.broadcast %cst_77 : f32 to vector<32x128xf32>
    %232 = arith.subf %231, %228 : vector<32x128xf32>
    %233 = arith.select %230, %228, %232 : vector<32x128xi1>, vector<32x128xf32>
    %cst_78 = arith.constant 1.000000e+00 : f32
    %234 = vector.broadcast %cst_78 : f32 to vector<32x128xf32>
    %235 = arith.addf %234, %233 : vector<32x128xf32>
    %236 = arith.mulf %198, %235 : vector<32x128xf32>
    %237 = vector.extract_strided_slice %0 {offsets = [6, 0], sizes = [1, 128], strides = [1, 1]} : vector<8x128xf32> to vector<1x128xf32>
    %238 = vector.extract_strided_slice %0 {offsets = [7, 0], sizes = [1, 128], strides = [1, 1]} : vector<8x128xf32> to vector<1x128xf32>
    %c1_i32_79 = arith.constant 1 : i32
    %239 = tpu.dynamic_rotate %236 by %c1_i32_79 dim 0 : vector<32x128xf32>, i32 -> vector<32x128xf32>
    %240 = vector.broadcast %21 : vector<32x1xf32> to vector<32x128xf32>
    %241 = arith.mulf %239, %240 : vector<32x128xf32>
    %c31_i32_80 = arith.constant 31 : i32
    %242 = tpu.dynamic_rotate %236 by %c31_i32_80 dim 0 : vector<32x128xf32>, i32 -> vector<32x128xf32>
    %243 = vector.broadcast %25 : vector<32x1xf32> to vector<32x128xf32>
    %244 = arith.mulf %242, %243 : vector<32x128xf32>
    %245 = tpu.concatenate %241, %236, %244 in 1 : vector<32x128xf32>, vector<32x128xf32>, vector<32x128xf32> -> vector<32x384xf32>
    %246 = arith.truncf %245 : vector<32x384xf32> to vector<32x384xbf16>
    %c0_81 = arith.constant 0 : index
    %c0_82 = arith.constant 0 : index
    %247 = vector.load %arg5[%c0_81, %c0_82] : memref<384x128xbf16, #tpu.memory_space<vmem>>, vector<384x128xbf16>
    %cst_83 = arith.constant dense<0.000000e+00> : vector<32x128xf32>
    %248 = tpu.matmul %246, %247, %cst_83 {dimension_numbers = #tpu.dot_dimension_numbers<[1], [0], [0], [1], [0, 0, 1, 1], [], []>} : vector<32x384xbf16>, vector<384x128xbf16>, vector<32x128xf32> -> vector<32x128xf32>
    %cst_84 = arith.constant dense<0.000000e+00> : vector<128xf32>
    %249 = vector.multi_reduction <add>, %248, %cst_84 [0] : vector<32x128xf32> to vector<128xf32>
    %250 = vector.shape_cast %249 : vector<128xf32> to vector<1x128xf32>
    %251 = arith.mulf %248, %248 : vector<32x128xf32>
    %cst_85 = arith.constant dense<0.000000e+00> : vector<128xf32>
    %252 = vector.multi_reduction <add>, %251, %cst_85 [0] : vector<32x128xf32> to vector<128xf32>
    %253 = vector.shape_cast %252 : vector<128xf32> to vector<1x128xf32>
    %cst_86 = arith.constant 3.125000e-02 : f32
    %254 = vector.broadcast %cst_86 : f32 to vector<1x128xf32>
    %255 = arith.mulf %250, %254 : vector<1x128xf32>
    %cst_87 = arith.constant 3.125000e-02 : f32
    %256 = vector.broadcast %cst_87 : f32 to vector<1x128xf32>
    %257 = arith.mulf %253, %256 : vector<1x128xf32>
    %258 = arith.mulf %255, %255 : vector<1x128xf32>
    %259 = arith.subf %257, %258 : vector<1x128xf32>
    %cst_88 = arith.constant 0.000000e+00 : f32
    %260 = vector.broadcast %cst_88 : f32 to vector<1x128xf32>
    %261 = arith.maximumf %259, %260 : vector<1x128xf32>
    %cst_89 = arith.constant 9.99999974E-6 : f32
    %262 = vector.broadcast %cst_89 : f32 to vector<1x128xf32>
    %263 = arith.addf %261, %262 : vector<1x128xf32>
    %264 = math.rsqrt %263 : vector<1x128xf32>
    %265 = arith.mulf %237, %264 : vector<1x128xf32>
    %266 = arith.mulf %255, %265 : vector<1x128xf32>
    %267 = arith.subf %238, %266 : vector<1x128xf32>
    %268 = vector.broadcast %265 : vector<1x128xf32> to vector<32x128xf32>
    %269 = arith.mulf %248, %268 : vector<32x128xf32>
    %270 = vector.broadcast %267 : vector<1x128xf32> to vector<32x128xf32>
    %271 = arith.addf %269, %270 : vector<32x128xf32>
    %cst_90 = arith.constant 5.000000e-01 : f32
    %272 = vector.broadcast %cst_90 : f32 to vector<32x128xf32>
    %273 = arith.mulf %272, %271 : vector<32x128xf32>
    %cst_91 = arith.constant 0.707106769 : f32
    %274 = vector.broadcast %cst_91 : f32 to vector<32x128xf32>
    %275 = arith.mulf %271, %274 : vector<32x128xf32>
    %276 = math.absf %275 : vector<32x128xf32>
    %cst_92 = arith.constant 0.327591091 : f32
    %277 = vector.broadcast %cst_92 : f32 to vector<32x128xf32>
    %278 = arith.mulf %277, %276 : vector<32x128xf32>
    %cst_93 = arith.constant 1.000000e+00 : f32
    %279 = vector.broadcast %cst_93 : f32 to vector<32x128xf32>
    %280 = arith.addf %279, %278 : vector<32x128xf32>
    %cst_94 = arith.constant 1.000000e+00 : f32
    %281 = vector.broadcast %cst_94 : f32 to vector<32x128xf32>
    %282 = arith.divf %281, %280 : vector<32x128xf32>
    %cst_95 = arith.constant 1.06140542 : f32
    %283 = vector.broadcast %cst_95 : f32 to vector<32x128xf32>
    %284 = arith.mulf %283, %282 : vector<32x128xf32>
    %cst_96 = arith.constant -1.45315206 : f32
    %285 = vector.broadcast %cst_96 : f32 to vector<32x128xf32>
    %286 = arith.addf %284, %285 : vector<32x128xf32>
    %287 = arith.mulf %286, %282 : vector<32x128xf32>
    %cst_97 = arith.constant 1.42141378 : f32
    %288 = vector.broadcast %cst_97 : f32 to vector<32x128xf32>
    %289 = arith.addf %287, %288 : vector<32x128xf32>
    %290 = arith.mulf %289, %282 : vector<32x128xf32>
    %cst_98 = arith.constant -0.284496725 : f32
    %291 = vector.broadcast %cst_98 : f32 to vector<32x128xf32>
    %292 = arith.addf %290, %291 : vector<32x128xf32>
    %293 = arith.mulf %292, %282 : vector<32x128xf32>
    %cst_99 = arith.constant 0.254829586 : f32
    %294 = vector.broadcast %cst_99 : f32 to vector<32x128xf32>
    %295 = arith.addf %293, %294 : vector<32x128xf32>
    %296 = arith.mulf %295, %282 : vector<32x128xf32>
    %cst_100 = arith.constant 0.000000e+00 : f32
    %297 = vector.broadcast %cst_100 : f32 to vector<32x128xf32>
    %298 = arith.subf %297, %276 : vector<32x128xf32>
    %299 = arith.mulf %298, %276 : vector<32x128xf32>
    %300 = math.exp %299 : vector<32x128xf32>
    %301 = arith.mulf %296, %300 : vector<32x128xf32>
    %cst_101 = arith.constant 1.000000e+00 : f32
    %302 = vector.broadcast %cst_101 : f32 to vector<32x128xf32>
    %303 = arith.subf %302, %301 : vector<32x128xf32>
    %cst_102 = arith.constant 0.000000e+00 : f32
    %304 = vector.broadcast %cst_102 : f32 to vector<32x128xf32>
    %305 = arith.cmpf oge, %275, %304 : vector<32x128xf32>
    %cst_103 = arith.constant 0.000000e+00 : f32
    %306 = vector.broadcast %cst_103 : f32 to vector<32x128xf32>
    %307 = arith.subf %306, %303 : vector<32x128xf32>
    %308 = arith.select %305, %303, %307 : vector<32x128xi1>, vector<32x128xf32>
    %cst_104 = arith.constant 1.000000e+00 : f32
    %309 = vector.broadcast %cst_104 : f32 to vector<32x128xf32>
    %310 = arith.addf %309, %308 : vector<32x128xf32>
    %311 = arith.mulf %273, %310 : vector<32x128xf32>
    %312 = arith.addf %168, %311 : vector<32x128xf32>
    %313 = arith.truncf %312 : vector<32x128xf32> to vector<32x128xbf16>
    %c0_105 = arith.constant 0 : index
    %c0_106 = arith.constant 0 : index
    %314 = vector.load %arg7[%c0_105, %c0_106] : memref<32x128xbf16, #tpu.memory_space<vmem>>, vector<32x128xbf16>
    tpu.vector_store %arg7[%c0_105, %c0_106], %313 {strides = array<i32>} : memref<32x128xbf16, #tpu.memory_space<vmem>>, vector<32x128xbf16>,
    return
  }
  func.func @transform_0(%arg0: i32) -> (i32, i32) {
    %c0_i32 = arith.constant 0 : i32
    %c0_i32_0 = arith.constant 0 : i32
    %c0_i32_1 = arith.constant 0 : i32
    return %c0_i32, %c0_i32_0 : i32, i32
  }
  func.func @transform_1(%arg0: i32) -> (i32, i32) {
    %c0_i32 = arith.constant 0 : i32
    %c0_i32_0 = arith.constant 0 : i32
    %c0_i32_1 = arith.constant 0 : i32
    return %c0_i32, %c0_i32_0 : i32, i32
  }
  func.func @transform_2(%arg0: i32) -> (i32, i32) {
    %c0_i32 = arith.constant 0 : i32
    %c0_i32_0 = arith.constant 0 : i32
    %c0_i32_1 = arith.constant 0 : i32
    return %c0_i32, %c0_i32_0 : i32, i32
  }
  func.func @transform_3(%arg0: i32) -> (i32, i32) {
    %c0_i32 = arith.constant 0 : i32
    %c0_i32_0 = arith.constant 0 : i32
    %c0_i32_1 = arith.constant 0 : i32
    return %c0_i32, %c0_i32_0 : i32, i32
  }
  func.func @transform_4(%arg0: i32) -> (i32, i32) {
    %c0_i32 = arith.constant 0 : i32
    %c0_i32_0 = arith.constant 0 : i32
    %c0_i32_1 = arith.constant 0 : i32
    return %c0_i32, %c0_i32_0 : i32, i32
  }
  func.func @transform_5(%arg0: i32) -> (i32, i32) {
    %c0_i32 = arith.constant 0 : i32
    %c0_i32_0 = arith.constant 0 : i32
    %c0_i32_1 = arith.constant 0 : i32
    return %c0_i32, %c0_i32_0 : i32, i32
  }
  func.func @transform_6(%arg0: i32) -> (i32, i32) {
    %c0_i32 = arith.constant 0 : i32
    %c0_i32_0 = arith.constant 0 : i32
    %c0_i32_1 = arith.constant 0 : i32
    return %c0_i32, %c0_i32_0 : i32, i32
  }
}

module attributes {stable_mosaic.version = 11 : i64} {
  func.func @_head_kernel(%arg0: i32, %arg1: memref<2x2048xbf16, #tpu.memory_space<vmem>>, %arg2: memref<2048x128xbf16, #tpu.memory_space<vmem>>, %arg3: memref<1x128xf32, #tpu.memory_space<vmem>>, %arg4: memref<2x128xf32, #tpu.memory_space<vmem>>) attributes {dimension_semantics = [#tpu.dimension_semantics<arbitrary>], iteration_bounds = array<i64: 1>, scalar_prefetch = 0 : i64, scratch_operands = 0 : i64, tpu.core_type = #tpu.core_type<tc>, window_params = [{pipeline_mode = #tpu.pipeline_mode<synchronous>, transform_indices = @transform_0, window_bounds = array<i64: 2, 2048>}, {pipeline_mode = #tpu.pipeline_mode<synchronous>, transform_indices = @transform_1, window_bounds = array<i64: 2048, 128>}, {pipeline_mode = #tpu.pipeline_mode<synchronous>, transform_indices = @transform_2, window_bounds = array<i64: 1, 128>}, {pipeline_mode = #tpu.pipeline_mode<synchronous>, transform_indices = @transform_3, window_bounds = array<i64: 2, 128>}]} {
    %c0 = arith.constant 0 : index
    %c0_0 = arith.constant 0 : index
    %0 = vector.load %arg1[%c0, %c0_0] : memref<2x2048xbf16, #tpu.memory_space<vmem>>, vector<2x2048xbf16>
    %c0_1 = arith.constant 0 : index
    %c0_2 = arith.constant 0 : index
    %1 = vector.load %arg2[%c0_1, %c0_2] : memref<2048x128xbf16, #tpu.memory_space<vmem>>, vector<2048x128xbf16>
    %cst = arith.constant dense<0.000000e+00> : vector<2x128xf32>
    %2 = tpu.matmul %0, %1, %cst {dimension_numbers = #tpu.dot_dimension_numbers<[1], [0], [0], [1], [0, 0, 1, 1], [], []>} : vector<2x2048xbf16>, vector<2048x128xbf16>, vector<2x128xf32> -> vector<2x128xf32>
    %c0_3 = arith.constant 0 : index
    %c0_4 = arith.constant 0 : index
    %3 = vector.load %arg3[%c0_3, %c0_4] : memref<1x128xf32, #tpu.memory_space<vmem>>, vector<1x128xf32>
    %4 = vector.broadcast %3 : vector<1x128xf32> to vector<2x128xf32>
    %5 = arith.addf %2, %4 : vector<2x128xf32>
    %c0_5 = arith.constant 0 : index
    %c0_6 = arith.constant 0 : index
    %6 = vector.load %arg4[%c0_5, %c0_6] : memref<2x128xf32, #tpu.memory_space<vmem>>, vector<2x128xf32>
    tpu.vector_store %arg4[%c0_5, %c0_6], %5 {strides = array<i32>} : memref<2x128xf32, #tpu.memory_space<vmem>>, vector<2x128xf32>,
    return
  }
  func.func @transform_0(%arg0: i32) -> (i32, i32) {
    %c0_i32 = arith.constant 0 : i32
    %c0_i32_0 = arith.constant 0 : i32
    %c0_i32_1 = arith.constant 0 : i32
    return %c0_i32, %c0_i32_0 : i32, i32
  }
  func.func @transform_1(%arg0: i32) -> (i32, i32) {
    %c0_i32 = arith.constant 0 : i32
    %c0_i32_0 = arith.constant 0 : i32
    %c0_i32_1 = arith.constant 0 : i32
    return %c0_i32, %c0_i32_0 : i32, i32
  }
  func.func @transform_2(%arg0: i32) -> (i32, i32) {
    %c0_i32 = arith.constant 0 : i32
    %c0_i32_0 = arith.constant 0 : i32
    %c0_i32_1 = arith.constant 0 : i32
    return %c0_i32, %c0_i32_0 : i32, i32
  }
  func.func @transform_3(%arg0: i32) -> (i32, i32) {
    %c0_i32 = arith.constant 0 : i32
    %c0_i32_0 = arith.constant 0 : i32
    %c0_i32_1 = arith.constant 0 : i32
    return %c0_i32, %c0_i32_0 : i32, i32
  }
}

module attributes {stable_mosaic.version = 11 : i64} {
  func.func @kernel(%arg0: i32, %arg1: memref<32x128xbf16, #tpu.memory_space<vmem>>, %arg2: memref<128x128xbf16, #tpu.memory_space<vmem>>, %arg3: memref<384x128xbf16, #tpu.memory_space<vmem>>, %arg4: memref<128x128xbf16, #tpu.memory_space<vmem>>, %arg5: memref<384x128xbf16, #tpu.memory_space<vmem>>, %arg6: memref<8x128xf32, #tpu.memory_space<vmem>>, %arg7: memref<32x128xbf16, #tpu.memory_space<vmem>>) attributes {dimension_semantics = [#tpu.dimension_semantics<arbitrary>], iteration_bounds = array<i64: 1>, scalar_prefetch = 0 : i64, scratch_operands = 0 : i64, tpu.core_type = #tpu.core_type<tc>, window_params = [{pipeline_mode = #tpu.pipeline_mode<synchronous>, transform_indices = @transform_0, window_bounds = array<i64: 32, 128>}, {pipeline_mode = #tpu.pipeline_mode<synchronous>, transform_indices = @transform_1, window_bounds = array<i64: 128, 128>}, {pipeline_mode = #tpu.pipeline_mode<synchronous>, transform_indices = @transform_2, window_bounds = array<i64: 384, 128>}, {pipeline_mode = #tpu.pipeline_mode<synchronous>, transform_indices = @transform_3, window_bounds = array<i64: 128, 128>}, {pipeline_mode = #tpu.pipeline_mode<synchronous>, transform_indices = @transform_4, window_bounds = array<i64: 384, 128>}, {pipeline_mode = #tpu.pipeline_mode<synchronous>, transform_indices = @transform_5, window_bounds = array<i64: 8, 128>}, {pipeline_mode = #tpu.pipeline_mode<synchronous>, transform_indices = @transform_6, window_bounds = array<i64: 32, 128>}]} {
    %c0 = arith.constant 0 : index
    %c0_0 = arith.constant 0 : index
    %0 = vector.load %arg6[%c0, %c0_0] : memref<8x128xf32, #tpu.memory_space<vmem>>, vector<8x128xf32>
    %1 = tpu.iota {dimensions = array<i32: 0>} : vector<32x1xi32>
    %c16_i32 = arith.constant 16 : i32
    %c0_i32 = arith.constant 0 : i32
    %2 = arith.cmpi eq, %c16_i32, %c0_i32 : i32
    %c1_i32 = arith.constant 1 : i32
    %3 = arith.select %2, %c1_i32, %c16_i32 : i32
    %4 = vector.broadcast %3 : i32 to vector<32x1xi32>
    %5 = arith.remsi %1, %4 : vector<32x1xi32>
    %c0_i32_1 = arith.constant 0 : i32
    %6 = vector.broadcast %c0_i32_1 : i32 to vector<32x1xi32>
    %7 = arith.cmpi ne, %5, %6 : vector<32x1xi32>
    %c0_i32_2 = arith.constant 0 : i32
    %8 = vector.broadcast %c0_i32_2 : i32 to vector<32x1xi32>
    %9 = arith.cmpi slt, %5, %8 : vector<32x1xi32>
    %c0_i32_3 = arith.constant 0 : i32
    %10 = arith.cmpi slt, %3, %c0_i32_3 : i32
    %11 = vector.broadcast %10 : i1 to vector<32x1xi1>
    %12 = vector.broadcast %11 : vector<32x1xi1> to vector<32x1xi1>
    %13 = arith.xori %9, %12 : vector<32x1xi1>
    %14 = arith.andi %13, %7 : vector<32x1xi1>
    %15 = vector.broadcast %3 : i32 to vector<32x1xi32>
    %16 = arith.addi %5, %15 : vector<32x1xi32>
    %17 = arith.select %14, %16, %5 : vector<32x1xi1>, vector<32x1xi32>
    %c0_i32_4 = arith.constant 0 : i32
    %18 = vector.broadcast %c0_i32_4 : i32 to vector<32x1xi32>
    %19 = arith.cmpi ne, %17, %18 : vector<32x1xi32>
    %20 = arith.extui %19 : vector<32x1xi1> to vector<32x1xi32>
    %21 = arith.sitofp %20 : vector<32x1xi32> to vector<32x1xf32>
    %c15_i32 = arith.constant 15 : i32
    %22 = vector.broadcast %c15_i32 : i32 to vector<32x1xi32>
    %23 = arith.cmpi ne, %17, %22 : vector<32x1xi32>
    %24 = arith.extui %23 : vector<32x1xi1> to vector<32x1xi32>
    %25 = arith.sitofp %24 : vector<32x1xi32> to vector<32x1xf32>
    %c0_5 = arith.constant 0 : index
    %c0_6 = arith.constant 0 : index
    %26 = vector.load %arg1[%c0_5, %c0_6] : memref<32x128xbf16, #tpu.memory_space<vmem>>, vector<32x128xbf16>
    %27 = vector.extract_strided_slice %0 {offsets = [0, 0], sizes = [1, 128], strides = [1, 1]} : vector<8x128xf32> to vector<1x128xf32>
    %28 = vector.extract_strided_slice %0 {offsets = [1, 0], sizes = [1, 128], strides = [1, 1]} : vector<8x128xf32> to vector<1x128xf32>
    %c0_7 = arith.constant 0 : index
    %c0_8 = arith.constant 0 : index
    %29 = vector.load %arg2[%c0_7, %c0_8] : memref<128x128xbf16, #tpu.memory_space<vmem>>, vector<128x128xbf16>
    %cst = arith.constant dense<0.000000e+00> : vector<32x128xf32>
    %30 = tpu.matmul %26, %29, %cst {dimension_numbers = #tpu.dot_dimension_numbers<[1], [0], [0], [1], [0, 0, 1, 1], [], []>} : vector<32x128xbf16>, vector<128x128xbf16>, vector<32x128xf32> -> vector<32x128xf32>
    %cst_9 = arith.constant dense<0.000000e+00> : vector<128xf32>
    %31 = vector.multi_reduction <add>, %30, %cst_9 [0] : vector<32x128xf32> to vector<128xf32>
    %32 = vector.shape_cast %31 : vector<128xf32> to vector<1x128xf32>
    %33 = arith.mulf %30, %30 : vector<32x128xf32>
    %cst_10 = arith.constant dense<0.000000e+00> : vector<128xf32>
    %34 = vector.multi_reduction <add>, %33, %cst_10 [0] : vector<32x128xf32> to vector<128xf32>
    %35 = vector.shape_cast %34 : vector<128xf32> to vector<1x128xf32>
    %cst_11 = arith.constant 3.125000e-02 : f32
    %36 = vector.broadcast %cst_11 : f32 to vector<1x128xf32>
    %37 = arith.mulf %32, %36 : vector<1x128xf32>
    %cst_12 = arith.constant 3.125000e-02 : f32
    %38 = vector.broadcast %cst_12 : f32 to vector<1x128xf32>
    %39 = arith.mulf %35, %38 : vector<1x128xf32>
    %40 = arith.mulf %37, %37 : vector<1x128xf32>
    %41 = arith.subf %39, %40 : vector<1x128xf32>
    %cst_13 = arith.constant 0.000000e+00 : f32
    %42 = vector.broadcast %cst_13 : f32 to vector<1x128xf32>
    %43 = arith.maximumf %41, %42 : vector<1x128xf32>
    %cst_14 = arith.constant 9.99999974E-6 : f32
    %44 = vector.broadcast %cst_14 : f32 to vector<1x128xf32>
    %45 = arith.addf %43, %44 : vector<1x128xf32>
    %46 = math.rsqrt %45 : vector<1x128xf32>
    %47 = arith.mulf %27, %46 : vector<1x128xf32>
    %48 = arith.mulf %37, %47 : vector<1x128xf32>
    %49 = arith.subf %28, %48 : vector<1x128xf32>
    %50 = vector.broadcast %47 : vector<1x128xf32> to vector<32x128xf32>
    %51 = arith.mulf %30, %50 : vector<32x128xf32>
    %52 = vector.broadcast %49 : vector<1x128xf32> to vector<32x128xf32>
    %53 = arith.addf %51, %52 : vector<32x128xf32>
    %cst_15 = arith.constant 5.000000e-01 : f32
    %54 = vector.broadcast %cst_15 : f32 to vector<32x128xf32>
    %55 = arith.mulf %54, %53 : vector<32x128xf32>
    %cst_16 = arith.constant 0.707106769 : f32
    %56 = vector.broadcast %cst_16 : f32 to vector<32x128xf32>
    %57 = arith.mulf %53, %56 : vector<32x128xf32>
    %58 = math.absf %57 : vector<32x128xf32>
    %cst_17 = arith.constant 0.327591091 : f32
    %59 = vector.broadcast %cst_17 : f32 to vector<32x128xf32>
    %60 = arith.mulf %59, %58 : vector<32x128xf32>
    %cst_18 = arith.constant 1.000000e+00 : f32
    %61 = vector.broadcast %cst_18 : f32 to vector<32x128xf32>
    %62 = arith.addf %61, %60 : vector<32x128xf32>
    %cst_19 = arith.constant 1.000000e+00 : f32
    %63 = vector.broadcast %cst_19 : f32 to vector<32x128xf32>
    %64 = arith.divf %63, %62 : vector<32x128xf32>
    %cst_20 = arith.constant 1.06140542 : f32
    %65 = vector.broadcast %cst_20 : f32 to vector<32x128xf32>
    %66 = arith.mulf %65, %64 : vector<32x128xf32>
    %cst_21 = arith.constant -1.45315206 : f32
    %67 = vector.broadcast %cst_21 : f32 to vector<32x128xf32>
    %68 = arith.addf %66, %67 : vector<32x128xf32>
    %69 = arith.mulf %68, %64 : vector<32x128xf32>
    %cst_22 = arith.constant 1.42141378 : f32
    %70 = vector.broadcast %cst_22 : f32 to vector<32x128xf32>
    %71 = arith.addf %69, %70 : vector<32x128xf32>
    %72 = arith.mulf %71, %64 : vector<32x128xf32>
    %cst_23 = arith.constant -0.284496725 : f32
    %73 = vector.broadcast %cst_23 : f32 to vector<32x128xf32>
    %74 = arith.addf %72, %73 : vector<32x128xf32>
    %75 = arith.mulf %74, %64 : vector<32x128xf32>
    %cst_24 = arith.constant 0.254829586 : f32
    %76 = vector.broadcast %cst_24 : f32 to vector<32x128xf32>
    %77 = arith.addf %75, %76 : vector<32x128xf32>
    %78 = arith.mulf %77, %64 : vector<32x128xf32>
    %cst_25 = arith.constant 0.000000e+00 : f32
    %79 = vector.broadcast %cst_25 : f32 to vector<32x128xf32>
    %80 = arith.subf %79, %58 : vector<32x128xf32>
    %81 = arith.mulf %80, %58 : vector<32x128xf32>
    %82 = math.exp %81 : vector<32x128xf32>
    %83 = arith.mulf %78, %82 : vector<32x128xf32>
    %cst_26 = arith.constant 1.000000e+00 : f32
    %84 = vector.broadcast %cst_26 : f32 to vector<32x128xf32>
    %85 = arith.subf %84, %83 : vector<32x128xf32>
    %cst_27 = arith.constant 0.000000e+00 : f32
    %86 = vector.broadcast %cst_27 : f32 to vector<32x128xf32>
    %87 = arith.cmpf oge, %57, %86 : vector<32x128xf32>
    %cst_28 = arith.constant 0.000000e+00 : f32
    %88 = vector.broadcast %cst_28 : f32 to vector<32x128xf32>
    %89 = arith.subf %88, %85 : vector<32x128xf32>
    %90 = arith.select %87, %85, %89 : vector<32x128xi1>, vector<32x128xf32>
    %cst_29 = arith.constant 1.000000e+00 : f32
    %91 = vector.broadcast %cst_29 : f32 to vector<32x128xf32>
    %92 = arith.addf %91, %90 : vector<32x128xf32>
    %93 = arith.mulf %55, %92 : vector<32x128xf32>
    %94 = vector.extract_strided_slice %0 {offsets = [2, 0], sizes = [1, 128], strides = [1, 1]} : vector<8x128xf32> to vector<1x128xf32>
    %95 = vector.extract_strided_slice %0 {offsets = [3, 0], sizes = [1, 128], strides = [1, 1]} : vector<8x128xf32> to vector<1x128xf32>
    %c1_i32_30 = arith.constant 1 : i32
    %96 = tpu.dynamic_rotate %93 by %c1_i32_30 dim 0 : vector<32x128xf32>, i32 -> vector<32x128xf32>
    %97 = vector.broadcast %21 : vector<32x1xf32> to vector<32x128xf32>
    %98 = arith.mulf %96, %97 : vector<32x128xf32>
    %c31_i32 = arith.constant 31 : i32
    %99 = tpu.dynamic_rotate %93 by %c31_i32 dim 0 : vector<32x128xf32>, i32 -> vector<32x128xf32>
    %100 = vector.broadcast %25 : vector<32x1xf32> to vector<32x128xf32>
    %101 = arith.mulf %99, %100 : vector<32x128xf32>
    %102 = tpu.concatenate %98, %93, %101 in 1 : vector<32x128xf32>, vector<32x128xf32>, vector<32x128xf32> -> vector<32x384xf32>
    %103 = arith.truncf %102 : vector<32x384xf32> to vector<32x384xbf16>
    %c0_31 = arith.constant 0 : index
    %c0_32 = arith.constant 0 : index
    %104 = vector.load %arg3[%c0_31, %c0_32] : memref<384x128xbf16, #tpu.memory_space<vmem>>, vector<384x128xbf16>
    %cst_33 = arith.constant dense<0.000000e+00> : vector<32x128xf32>
    %105 = tpu.matmul %103, %104, %cst_33 {dimension_numbers = #tpu.dot_dimension_numbers<[1], [0], [0], [1], [0, 0, 1, 1], [], []>} : vector<32x384xbf16>, vector<384x128xbf16>, vector<32x128xf32> -> vector<32x128xf32>
    %cst_34 = arith.constant dense<0.000000e+00> : vector<128xf32>
    %106 = vector.multi_reduction <add>, %105, %cst_34 [0] : vector<32x128xf32> to vector<128xf32>
    %107 = vector.shape_cast %106 : vector<128xf32> to vector<1x128xf32>
    %108 = arith.mulf %105, %105 : vector<32x128xf32>
    %cst_35 = arith.constant dense<0.000000e+00> : vector<128xf32>
    %109 = vector.multi_reduction <add>, %108, %cst_35 [0] : vector<32x128xf32> to vector<128xf32>
    %110 = vector.shape_cast %109 : vector<128xf32> to vector<1x128xf32>
    %cst_36 = arith.constant 3.125000e-02 : f32
    %111 = vector.broadcast %cst_36 : f32 to vector<1x128xf32>
    %112 = arith.mulf %107, %111 : vector<1x128xf32>
    %cst_37 = arith.constant 3.125000e-02 : f32
    %113 = vector.broadcast %cst_37 : f32 to vector<1x128xf32>
    %114 = arith.mulf %110, %113 : vector<1x128xf32>
    %115 = arith.mulf %112, %112 : vector<1x128xf32>
    %116 = arith.subf %114, %115 : vector<1x128xf32>
    %cst_38 = arith.constant 0.000000e+00 : f32
    %117 = vector.broadcast %cst_38 : f32 to vector<1x128xf32>
    %118 = arith.maximumf %116, %117 : vector<1x128xf32>
    %cst_39 = arith.constant 9.99999974E-6 : f32
    %119 = vector.broadcast %cst_39 : f32 to vector<1x128xf32>
    %120 = arith.addf %118, %119 : vector<1x128xf32>
    %121 = math.rsqrt %120 : vector<1x128xf32>
    %122 = arith.mulf %94, %121 : vector<1x128xf32>
    %123 = arith.mulf %112, %122 : vector<1x128xf32>
    %124 = arith.subf %95, %123 : vector<1x128xf32>
    %125 = vector.broadcast %122 : vector<1x128xf32> to vector<32x128xf32>
    %126 = arith.mulf %105, %125 : vector<32x128xf32>
    %127 = vector.broadcast %124 : vector<1x128xf32> to vector<32x128xf32>
    %128 = arith.addf %126, %127 : vector<32x128xf32>
    %cst_40 = arith.constant 5.000000e-01 : f32
    %129 = vector.broadcast %cst_40 : f32 to vector<32x128xf32>
    %130 = arith.mulf %129, %128 : vector<32x128xf32>
    %cst_41 = arith.constant 0.707106769 : f32
    %131 = vector.broadcast %cst_41 : f32 to vector<32x128xf32>
    %132 = arith.mulf %128, %131 : vector<32x128xf32>
    %133 = math.absf %132 : vector<32x128xf32>
    %cst_42 = arith.constant 0.327591091 : f32
    %134 = vector.broadcast %cst_42 : f32 to vector<32x128xf32>
    %135 = arith.mulf %134, %133 : vector<32x128xf32>
    %cst_43 = arith.constant 1.000000e+00 : f32
    %136 = vector.broadcast %cst_43 : f32 to vector<32x128xf32>
    %137 = arith.addf %136, %135 : vector<32x128xf32>
    %cst_44 = arith.constant 1.000000e+00 : f32
    %138 = vector.broadcast %cst_44 : f32 to vector<32x128xf32>
    %139 = arith.divf %138, %137 : vector<32x128xf32>
    %cst_45 = arith.constant 1.06140542 : f32
    %140 = vector.broadcast %cst_45 : f32 to vector<32x128xf32>
    %141 = arith.mulf %140, %139 : vector<32x128xf32>
    %cst_46 = arith.constant -1.45315206 : f32
    %142 = vector.broadcast %cst_46 : f32 to vector<32x128xf32>
    %143 = arith.addf %141, %142 : vector<32x128xf32>
    %144 = arith.mulf %143, %139 : vector<32x128xf32>
    %cst_47 = arith.constant 1.42141378 : f32
    %145 = vector.broadcast %cst_47 : f32 to vector<32x128xf32>
    %146 = arith.addf %144, %145 : vector<32x128xf32>
    %147 = arith.mulf %146, %139 : vector<32x128xf32>
    %cst_48 = arith.constant -0.284496725 : f32
    %148 = vector.broadcast %cst_48 : f32 to vector<32x128xf32>
    %149 = arith.addf %147, %148 : vector<32x128xf32>
    %150 = arith.mulf %149, %139 : vector<32x128xf32>
    %cst_49 = arith.constant 0.254829586 : f32
    %151 = vector.broadcast %cst_49 : f32 to vector<32x128xf32>
    %152 = arith.addf %150, %151 : vector<32x128xf32>
    %153 = arith.mulf %152, %139 : vector<32x128xf32>
    %cst_50 = arith.constant 0.000000e+00 : f32
    %154 = vector.broadcast %cst_50 : f32 to vector<32x128xf32>
    %155 = arith.subf %154, %133 : vector<32x128xf32>
    %156 = arith.mulf %155, %133 : vector<32x128xf32>
    %157 = math.exp %156 : vector<32x128xf32>
    %158 = arith.mulf %153, %157 : vector<32x128xf32>
    %cst_51 = arith.constant 1.000000e+00 : f32
    %159 = vector.broadcast %cst_51 : f32 to vector<32x128xf32>
    %160 = arith.subf %159, %158 : vector<32x128xf32>
    %cst_52 = arith.constant 0.000000e+00 : f32
    %161 = vector.broadcast %cst_52 : f32 to vector<32x128xf32>
    %162 = arith.cmpf oge, %132, %161 : vector<32x128xf32>
    %cst_53 = arith.constant 0.000000e+00 : f32
    %163 = vector.broadcast %cst_53 : f32 to vector<32x128xf32>
    %164 = arith.subf %163, %160 : vector<32x128xf32>
    %165 = arith.select %162, %160, %164 : vector<32x128xi1>, vector<32x128xf32>
    %cst_54 = arith.constant 1.000000e+00 : f32
    %166 = vector.broadcast %cst_54 : f32 to vector<32x128xf32>
    %167 = arith.addf %166, %165 : vector<32x128xf32>
    %168 = arith.mulf %130, %167 : vector<32x128xf32>
    %169 = arith.truncf %168 : vector<32x128xf32> to vector<32x128xbf16>
    %170 = vector.extract_strided_slice %0 {offsets = [4, 0], sizes = [1, 128], strides = [1, 1]} : vector<8x128xf32> to vector<1x128xf32>
    %171 = vector.extract_strided_slice %0 {offsets = [5, 0], sizes = [1, 128], strides = [1, 1]} : vector<8x128xf32> to vector<1x128xf32>
    %c0_55 = arith.constant 0 : index
    %c0_56 = arith.constant 0 : index
    %172 = vector.load %arg4[%c0_55, %c0_56] : memref<128x128xbf16, #tpu.memory_space<vmem>>, vector<128x128xbf16>
    %cst_57 = arith.constant dense<0.000000e+00> : vector<32x128xf32>
    %173 = tpu.matmul %169, %172, %cst_57 {dimension_numbers = #tpu.dot_dimension_numbers<[1], [0], [0], [1], [0, 0, 1, 1], [], []>} : vector<32x128xbf16>, vector<128x128xbf16>, vector<32x128xf32> -> vector<32x128xf32>
    %cst_58 = arith.constant dense<0.000000e+00> : vector<128xf32>
    %174 = vector.multi_reduction <add>, %173, %cst_58 [0] : vector<32x128xf32> to vector<128xf32>
    %175 = vector.shape_cast %174 : vector<128xf32> to vector<1x128xf32>
    %176 = arith.mulf %173, %173 : vector<32x128xf32>
    %cst_59 = arith.constant dense<0.000000e+00> : vector<128xf32>
    %177 = vector.multi_reduction <add>, %176, %cst_59 [0] : vector<32x128xf32> to vector<128xf32>
    %178 = vector.shape_cast %177 : vector<128xf32> to vector<1x128xf32>
    %cst_60 = arith.constant 3.125000e-02 : f32
    %179 = vector.broadcast %cst_60 : f32 to vector<1x128xf32>
    %180 = arith.mulf %175, %179 : vector<1x128xf32>
    %cst_61 = arith.constant 3.125000e-02 : f32
    %181 = vector.broadcast %cst_61 : f32 to vector<1x128xf32>
    %182 = arith.mulf %178, %181 : vector<1x128xf32>
    %183 = arith.mulf %180, %180 : vector<1x128xf32>
    %184 = arith.subf %182, %183 : vector<1x128xf32>
    %cst_62 = arith.constant 0.000000e+00 : f32
    %185 = vector.broadcast %cst_62 : f32 to vector<1x128xf32>
    %186 = arith.maximumf %184, %185 : vector<1x128xf32>
    %cst_63 = arith.constant 9.99999974E-6 : f32
    %187 = vector.broadcast %cst_63 : f32 to vector<1x128xf32>
    %188 = arith.addf %186, %187 : vector<1x128xf32>
    %189 = math.rsqrt %188 : vector<1x128xf32>
    %190 = arith.mulf %170, %189 : vector<1x128xf32>
    %191 = arith.mulf %180, %190 : vector<1x128xf32>
    %192 = arith.subf %171, %191 : vector<1x128xf32>
    %193 = vector.broadcast %190 : vector<1x128xf32> to vector<32x128xf32>
    %194 = arith.mulf %173, %193 : vector<32x128xf32>
    %195 = vector.broadcast %192 : vector<1x128xf32> to vector<32x128xf32>
    %196 = arith.addf %194, %195 : vector<32x128xf32>
    %cst_64 = arith.constant 5.000000e-01 : f32
    %197 = vector.broadcast %cst_64 : f32 to vector<32x128xf32>
    %198 = arith.mulf %197, %196 : vector<32x128xf32>
    %cst_65 = arith.constant 0.707106769 : f32
    %199 = vector.broadcast %cst_65 : f32 to vector<32x128xf32>
    %200 = arith.mulf %196, %199 : vector<32x128xf32>
    %201 = math.absf %200 : vector<32x128xf32>
    %cst_66 = arith.constant 0.327591091 : f32
    %202 = vector.broadcast %cst_66 : f32 to vector<32x128xf32>
    %203 = arith.mulf %202, %201 : vector<32x128xf32>
    %cst_67 = arith.constant 1.000000e+00 : f32
    %204 = vector.broadcast %cst_67 : f32 to vector<32x128xf32>
    %205 = arith.addf %204, %203 : vector<32x128xf32>
    %cst_68 = arith.constant 1.000000e+00 : f32
    %206 = vector.broadcast %cst_68 : f32 to vector<32x128xf32>
    %207 = arith.divf %206, %205 : vector<32x128xf32>
    %cst_69 = arith.constant 1.06140542 : f32
    %208 = vector.broadcast %cst_69 : f32 to vector<32x128xf32>
    %209 = arith.mulf %208, %207 : vector<32x128xf32>
    %cst_70 = arith.constant -1.45315206 : f32
    %210 = vector.broadcast %cst_70 : f32 to vector<32x128xf32>
    %211 = arith.addf %209, %210 : vector<32x128xf32>
    %212 = arith.mulf %211, %207 : vector<32x128xf32>
    %cst_71 = arith.constant 1.42141378 : f32
    %213 = vector.broadcast %cst_71 : f32 to vector<32x128xf32>
    %214 = arith.addf %212, %213 : vector<32x128xf32>
    %215 = arith.mulf %214, %207 : vector<32x128xf32>
    %cst_72 = arith.constant -0.284496725 : f32
    %216 = vector.broadcast %cst_72 : f32 to vector<32x128xf32>
    %217 = arith.addf %215, %216 : vector<32x128xf32>
    %218 = arith.mulf %217, %207 : vector<32x128xf32>
    %cst_73 = arith.constant 0.254829586 : f32
    %219 = vector.broadcast %cst_73 : f32 to vector<32x128xf32>
    %220 = arith.addf %218, %219 : vector<32x128xf32>
    %221 = arith.mulf %220, %207 : vector<32x128xf32>
    %cst_74 = arith.constant 0.000000e+00 : f32
    %222 = vector.broadcast %cst_74 : f32 to vector<32x128xf32>
    %223 = arith.subf %222, %201 : vector<32x128xf32>
    %224 = arith.mulf %223, %201 : vector<32x128xf32>
    %225 = math.exp %224 : vector<32x128xf32>
    %226 = arith.mulf %221, %225 : vector<32x128xf32>
    %cst_75 = arith.constant 1.000000e+00 : f32
    %227 = vector.broadcast %cst_75 : f32 to vector<32x128xf32>
    %228 = arith.subf %227, %226 : vector<32x128xf32>
    %cst_76 = arith.constant 0.000000e+00 : f32
    %229 = vector.broadcast %cst_76 : f32 to vector<32x128xf32>
    %230 = arith.cmpf oge, %200, %229 : vector<32x128xf32>
    %cst_77 = arith.constant 0.000000e+00 : f32
    %231 = vector.broadcast %cst_77 : f32 to vector<32x128xf32>
    %232 = arith.subf %231, %228 : vector<32x128xf32>
    %233 = arith.select %230, %228, %232 : vector<32x128xi1>, vector<32x128xf32>
    %cst_78 = arith.constant 1.000000e+00 : f32
    %234 = vector.broadcast %cst_78 : f32 to vector<32x128xf32>
    %235 = arith.addf %234, %233 : vector<32x128xf32>
    %236 = arith.mulf %198, %235 : vector<32x128xf32>
    %237 = vector.extract_strided_slice %0 {offsets = [6, 0], sizes = [1, 128], strides = [1, 1]} : vector<8x128xf32> to vector<1x128xf32>
    %238 = vector.extract_strided_slice %0 {offsets = [7, 0], sizes = [1, 128], strides = [1, 1]} : vector<8x128xf32> to vector<1x128xf32>
    %c1_i32_79 = arith.constant 1 : i32
    %239 = tpu.dynamic_rotate %236 by %c1_i32_79 dim 0 : vector<32x128xf32>, i32 -> vector<32x128xf32>
    %240 = vector.broadcast %21 : vector<32x1xf32> to vector<32x128xf32>
    %241 = arith.mulf %239, %240 : vector<32x128xf32>
    %c31_i32_80 = arith.constant 31 : i32
    %242 = tpu.dynamic_rotate %236 by %c31_i32_80 dim 0 : vector<32x128xf32>, i32 -> vector<32x128xf32>
    %243 = vector.broadcast %25 : vector<32x1xf32> to vector<32x128xf32>
    %244 = arith.mulf %242, %243 : vector<32x128xf32>
    %245 = tpu.concatenate %241, %236, %244 in 1 : vector<32x128xf32>, vector<32x128xf32>, vector<32x128xf32> -> vector<32x384xf32>
    %246 = arith.truncf %245 : vector<32x384xf32> to vector<32x384xbf16>
    %c0_81 = arith.constant 0 : index
    %c0_82 = arith.constant 0 : index
    %247 = vector.load %arg5[%c0_81, %c0_82] : memref<384x128xbf16, #tpu.memory_space<vmem>>, vector<384x128xbf16>
    %cst_83 = arith.constant dense<0.000000e+00> : vector<32x128xf32>
    %248 = tpu.matmul %246, %247, %cst_83 {dimension_numbers = #tpu.dot_dimension_numbers<[1], [0], [0], [1], [0, 0, 1, 1], [], []>} : vector<32x384xbf16>, vector<384x128xbf16>, vector<32x128xf32> -> vector<32x128xf32>
    %cst_84 = arith.constant dense<0.000000e+00> : vector<128xf32>
    %249 = vector.multi_reduction <add>, %248, %cst_84 [0] : vector<32x128xf32> to vector<128xf32>
    %250 = vector.shape_cast %249 : vector<128xf32> to vector<1x128xf32>
    %251 = arith.mulf %248, %248 : vector<32x128xf32>
    %cst_85 = arith.constant dense<0.000000e+00> : vector<128xf32>
    %252 = vector.multi_reduction <add>, %251, %cst_85 [0] : vector<32x128xf32> to vector<128xf32>
    %253 = vector.shape_cast %252 : vector<128xf32> to vector<1x128xf32>
    %cst_86 = arith.constant 3.125000e-02 : f32
    %254 = vector.broadcast %cst_86 : f32 to vector<1x128xf32>
    %255 = arith.mulf %250, %254 : vector<1x128xf32>
    %cst_87 = arith.constant 3.125000e-02 : f32
    %256 = vector.broadcast %cst_87 : f32 to vector<1x128xf32>
    %257 = arith.mulf %253, %256 : vector<1x128xf32>
    %258 = arith.mulf %255, %255 : vector<1x128xf32>
    %259 = arith.subf %257, %258 : vector<1x128xf32>
    %cst_88 = arith.constant 0.000000e+00 : f32
    %260 = vector.broadcast %cst_88 : f32 to vector<1x128xf32>
    %261 = arith.maximumf %259, %260 : vector<1x128xf32>
    %cst_89 = arith.constant 9.99999974E-6 : f32
    %262 = vector.broadcast %cst_89 : f32 to vector<1x128xf32>
    %263 = arith.addf %261, %262 : vector<1x128xf32>
    %264 = math.rsqrt %263 : vector<1x128xf32>
    %265 = arith.mulf %237, %264 : vector<1x128xf32>
    %266 = arith.mulf %255, %265 : vector<1x128xf32>
    %267 = arith.subf %238, %266 : vector<1x128xf32>
    %268 = vector.broadcast %265 : vector<1x128xf32> to vector<32x128xf32>
    %269 = arith.mulf %248, %268 : vector<32x128xf32>
    %270 = vector.broadcast %267 : vector<1x128xf32> to vector<32x128xf32>
    %271 = arith.addf %269, %270 : vector<32x128xf32>
    %cst_90 = arith.constant 5.000000e-01 : f32
    %272 = vector.broadcast %cst_90 : f32 to vector<32x128xf32>
    %273 = arith.mulf %272, %271 : vector<32x128xf32>
    %cst_91 = arith.constant 0.707106769 : f32
    %274 = vector.broadcast %cst_91 : f32 to vector<32x128xf32>
    %275 = arith.mulf %271, %274 : vector<32x128xf32>
    %276 = math.absf %275 : vector<32x128xf32>
    %cst_92 = arith.constant 0.327591091 : f32
    %277 = vector.broadcast %cst_92 : f32 to vector<32x128xf32>
    %278 = arith.mulf %277, %276 : vector<32x128xf32>
    %cst_93 = arith.constant 1.000000e+00 : f32
    %279 = vector.broadcast %cst_93 : f32 to vector<32x128xf32>
    %280 = arith.addf %279, %278 : vector<32x128xf32>
    %cst_94 = arith.constant 1.000000e+00 : f32
    %281 = vector.broadcast %cst_94 : f32 to vector<32x128xf32>
    %282 = arith.divf %281, %280 : vector<32x128xf32>
    %cst_95 = arith.constant 1.06140542 : f32
    %283 = vector.broadcast %cst_95 : f32 to vector<32x128xf32>
    %284 = arith.mulf %283, %282 : vector<32x128xf32>
    %cst_96 = arith.constant -1.45315206 : f32
    %285 = vector.broadcast %cst_96 : f32 to vector<32x128xf32>
    %286 = arith.addf %284, %285 : vector<32x128xf32>
    %287 = arith.mulf %286, %282 : vector<32x128xf32>
    %cst_97 = arith.constant 1.42141378 : f32
    %288 = vector.broadcast %cst_97 : f32 to vector<32x128xf32>
    %289 = arith.addf %287, %288 : vector<32x128xf32>
    %290 = arith.mulf %289, %282 : vector<32x128xf32>
    %cst_98 = arith.constant -0.284496725 : f32
    %291 = vector.broadcast %cst_98 : f32 to vector<32x128xf32>
    %292 = arith.addf %290, %291 : vector<32x128xf32>
    %293 = arith.mulf %292, %282 : vector<32x128xf32>
    %cst_99 = arith.constant 0.254829586 : f32
    %294 = vector.broadcast %cst_99 : f32 to vector<32x128xf32>
    %295 = arith.addf %293, %294 : vector<32x128xf32>
    %296 = arith.mulf %295, %282 : vector<32x128xf32>
    %cst_100 = arith.constant 0.000000e+00 : f32
    %297 = vector.broadcast %cst_100 : f32 to vector<32x128xf32>
    %298 = arith.subf %297, %276 : vector<32x128xf32>
    %299 = arith.mulf %298, %276 : vector<32x128xf32>
    %300 = math.exp %299 : vector<32x128xf32>
    %301 = arith.mulf %296, %300 : vector<32x128xf32>
    %cst_101 = arith.constant 1.000000e+00 : f32
    %302 = vector.broadcast %cst_101 : f32 to vector<32x128xf32>
    %303 = arith.subf %302, %301 : vector<32x128xf32>
    %cst_102 = arith.constant 0.000000e+00 : f32
    %304 = vector.broadcast %cst_102 : f32 to vector<32x128xf32>
    %305 = arith.cmpf oge, %275, %304 : vector<32x128xf32>
    %cst_103 = arith.constant 0.000000e+00 : f32
    %306 = vector.broadcast %cst_103 : f32 to vector<32x128xf32>
    %307 = arith.subf %306, %303 : vector<32x128xf32>
    %308 = arith.select %305, %303, %307 : vector<32x128xi1>, vector<32x128xf32>
    %cst_104 = arith.constant 1.000000e+00 : f32
    %309 = vector.broadcast %cst_104 : f32 to vector<32x128xf32>
    %310 = arith.addf %309, %308 : vector<32x128xf32>
    %311 = arith.mulf %273, %310 : vector<32x128xf32>
    %312 = arith.addf %168, %311 : vector<32x128xf32>
    %313 = arith.truncf %312 : vector<32x128xf32> to vector<32x128xbf16>
    %c0_105 = arith.constant 0 : index
    %c0_106 = arith.constant 0 : index
    %314 = vector.load %arg7[%c0_105, %c0_106] : memref<32x128xbf16, #tpu.memory_space<vmem>>, vector<32x128xbf16>
    tpu.vector_store %arg7[%c0_105, %c0_106], %313 {strides = array<i32>} : memref<32x128xbf16, #tpu.memory_space<vmem>>, vector<32x128xbf16>,
    return
  }
  func.func @transform_0(%arg0: i32) -> (i32, i32) {
    %c0_i32 = arith.constant 0 : i32
    %c0_i32_0 = arith.constant 0 : i32
    %c0_i32_1 = arith.constant 0 : i32
    return %c0_i32, %c0_i32_0 : i32, i32
  }
  func.func @transform_1(%arg0: i32) -> (i32, i32) {
    %c0_i32 = arith.constant 0 : i32
    %c0_i32_0 = arith.constant 0 : i32
    %c0_i32_1 = arith.constant 0 : i32
    return %c0_i32, %c0_i32_0 : i32, i32
  }
  func.func @transform_2(%arg0: i32) -> (i32, i32) {
    %c0_i32 = arith.constant 0 : i32
    %c0_i32_0 = arith.constant 0 : i32
    %c0_i32_1 = arith.constant 0 : i32
    return %c0_i32, %c0_i32_0 : i32, i32
  }
  func.func @transform_3(%arg0: i32) -> (i32, i32) {
    %c0_i32 = arith.constant 0 : i32
    %c0_i32_0 = arith.constant 0 : i32
    %c0_i32_1 = arith.constant 0 : i32
    return %c0_i32, %c0_i32_0 : i32, i32
  }
  func.func @transform_4(%arg0: i32) -> (i32, i32) {
    %c0_i32 = arith.constant 0 : i32
    %c0_i32_0 = arith.constant 0 : i32
    %c0_i32_1 = arith.constant 0 : i32
    return %c0_i32, %c0_i32_0 : i32, i32
  }
  func.func @transform_5(%arg0: i32) -> (i32, i32) {
    %c0_i32 = arith.constant 0 : i32
    %c0_i32_0 = arith.constant 0 : i32
    %c0_i32_1 = arith.constant 0 : i32
    return %c0_i32, %c0_i32_0 : i32, i32
  }
  func.func @transform_6(%arg0: i32) -> (i32, i32) {
    %c0_i32 = arith.constant 0 : i32
    %c0_i32_0 = arith.constant 0 : i32
    %c0_i32_1 = arith.constant 0 : i32
    return %c0_i32, %c0_i32_0 : i32, i32
  }
}

module attributes {stable_mosaic.version = 11 : i64} {
  func.func @_head_kernel(%arg0: i32, %arg1: memref<2x2048xbf16, #tpu.memory_space<vmem>>, %arg2: memref<2048x128xbf16, #tpu.memory_space<vmem>>, %arg3: memref<1x128xf32, #tpu.memory_space<vmem>>, %arg4: memref<2x128xf32, #tpu.memory_space<vmem>>) attributes {dimension_semantics = [#tpu.dimension_semantics<arbitrary>], iteration_bounds = array<i64: 1>, scalar_prefetch = 0 : i64, scratch_operands = 0 : i64, tpu.core_type = #tpu.core_type<tc>, window_params = [{pipeline_mode = #tpu.pipeline_mode<synchronous>, transform_indices = @transform_0, window_bounds = array<i64: 2, 2048>}, {pipeline_mode = #tpu.pipeline_mode<synchronous>, transform_indices = @transform_1, window_bounds = array<i64: 2048, 128>}, {pipeline_mode = #tpu.pipeline_mode<synchronous>, transform_indices = @transform_2, window_bounds = array<i64: 1, 128>}, {pipeline_mode = #tpu.pipeline_mode<synchronous>, transform_indices = @transform_3, window_bounds = array<i64: 2, 128>}]} {
    %c0 = arith.constant 0 : index
    %c0_0 = arith.constant 0 : index
    %0 = vector.load %arg1[%c0, %c0_0] : memref<2x2048xbf16, #tpu.memory_space<vmem>>, vector<2x2048xbf16>
    %c0_1 = arith.constant 0 : index
    %c0_2 = arith.constant 0 : index
    %1 = vector.load %arg2[%c0_1, %c0_2] : memref<2048x128xbf16, #tpu.memory_space<vmem>>, vector<2048x128xbf16>
    %cst = arith.constant dense<0.000000e+00> : vector<2x128xf32>
    %2 = tpu.matmul %0, %1, %cst {dimension_numbers = #tpu.dot_dimension_numbers<[1], [0], [0], [1], [0, 0, 1, 1], [], []>} : vector<2x2048xbf16>, vector<2048x128xbf16>, vector<2x128xf32> -> vector<2x128xf32>
    %c0_3 = arith.constant 0 : index
    %c0_4 = arith.constant 0 : index
    %3 = vector.load %arg3[%c0_3, %c0_4] : memref<1x128xf32, #tpu.memory_space<vmem>>, vector<1x128xf32>
    %4 = vector.broadcast %3 : vector<1x128xf32> to vector<2x128xf32>
    %5 = arith.addf %2, %4 : vector<2x128xf32>
    %c0_5 = arith.constant 0 : index
    %c0_6 = arith.constant 0 : index
    %6 = vector.load %arg4[%c0_5, %c0_6] : memref<2x128xf32, #tpu.memory_space<vmem>>, vector<2x128xf32>
    tpu.vector_store %arg4[%c0_5, %c0_6], %5 {strides = array<i32>} : memref<2x128xf32, #tpu.memory_space<vmem>>, vector<2x128xf32>,
    return
  }
  func.func @transform_0(%arg0: i32) -> (i32, i32) {
    %c0_i32 = arith.constant 0 : i32
    %c0_i32_0 = arith.constant 0 : i32
    %c0_i32_1 = arith.constant 0 : i32
    return %c0_i32, %c0_i32_0 : i32, i32
  }
  func.func @transform_1(%arg0: i32) -> (i32, i32) {
    %c0_i32 = arith.constant 0 : i32
    %c0_i32_0 = arith.constant 0 : i32
    %c0_i32_1 = arith.constant 0 : i32
    return %c0_i32, %c0_i32_0 : i32, i32
  }
  func.func @transform_2(%arg0: i32) -> (i32, i32) {
    %c0_i32 = arith.constant 0 : i32
    %c0_i32_0 = arith.constant 0 : i32
    %c0_i32_1 = arith.constant 0 : i32
    return %c0_i32, %c0_i32_0 : i32, i32
  }
  func.func @transform_3(%arg0: i32) -> (i32, i32) {
    %c0_i32 = arith.constant 0 : i32
    %c0_i32_0 = arith.constant 0 : i32
    %c0_i32_1 = arith.constant 0 : i32
    return %c0_i32, %c0_i32_0 : i32, i32
  }
}

</mosaic_0001>

<bundles_post_ra>
// kernel: encoder_forward.4
= control target key start
LH: loop header
LB: loop body
LE: loop exit
PB: predicated region body
PF: predicated region fallthrough
CT: control target
= control target key end

     0   :  { %11 = vsyncpa [#allocation3], 0  ;;  %s2545_s0 = inlined_call_operand.vmem [shape: bf16[32,128], index: 0, kind: input, shape index: {}]   ;;  %s2546_s1 = inlined_call_operand.vmem [shape: bf16[128,128], index: 1, kind: input, shape index: {}]   ;;  %s2547_s2 = inlined_call_operand.hbm [shape: bf16[384,128], index: 2, kind: input, shape index: {}]   ;;  %s2548_s3 = inlined_call_operand.vmem [shape: bf16[128,128], index: 3, kind: input, shape index: {}]   ;;  %s2549_s4 = inlined_call_operand.hbm [shape: bf16[384,128], index: 4, kind: input, shape index: {}]   ;;  %s2550_s5 = inlined_call_operand.hbm [shape: f32[8,128], index: 5, kind: input, shape index: {}]   ;;  %s2551_s6 = inlined_call_operand.vmem [shape: bf16[32,128], index: 6, kind: output, shape index: {}]  }
   0x1   :  { %12 = vsyncpa [#allocation5], 0  ;;  %s2173_s21 = smov [#allocation4]   ;;  %s2174_s23 = smov [#allocation2]  }
   0x2   :  { %s36_s22 = sshll.u32 %s2173_s21, 4  ;;  %s22_s24 = sshll.u32 %s2174_s23, 4  ;;  %s37_s22 = int_to_ptr.vmem [resolvable:$true] %s36_s22  ;;  %s2214_s24 = int_to_ptr.vmem [resolvable:$true] %s22_s24 }
   0x3   :  { %s2103_s27 = scalar_lea.hbm %s2549_s4, 3072 }
   0x4   :  { %p2104_p0 = scmp.ne.s32.totalorder %s2549_s4, %s2103_s27  ;;  %p2107_p1 = scmp.lt.u32.totalorder %s2103_s27, %s2549_s4 }
   0x6   :  { %p2109_p2 = pnand %p2107_p1, %p2104_p0 }
   0x8   :  { %2112 = shalt.err (!%p2109_p2)
}
   0x9   :  { %s2113_s8 = scalar_lea.vmem %s37_s22, 3072  ;;  %p2118_p4 = scmp.lt.s32.totalorder %s37_s22, %s37_s22 }
   0xa   :  { %p2114_p3 = scmp.ne.s32.totalorder %s37_s22, %s2113_s8  ;;  %p2119_p5 = scmp.lt.s32.totalorder %s2113_s8, %s2113_s8 }
   0xc   :  { %p2120_p6 = por %p2119_p5, %p2118_p4 }
   0xe   :  { %p2121_p7 = pnand %p2120_p6, %p2114_p3 }
  0x10   :  { %2124 = shalt.err (!%p2121_p7)
}
  0x11   :  { %s2175_s9 = smov 64   ;;  %s2176_s10 = smov 4  }
  0x12   :  { %42 = dma.hbm_to_vmem [thread:$0]  %s2549_s4, 3072, %s37_s22, [#allocation5], %s2175_s9, %s2175_s9, %s2176_s10  }
  0x13   :  { %s2125_s15 = scalar_lea.hbm %s2547_s2, 3072 }
  0x14   :  { %p2126_p8 = scmp.ne.s32.totalorder %s2547_s2, %s2125_s15  ;;  %p2129_p9 = scmp.lt.u32.totalorder %s2125_s15, %s2547_s2 }
  0x16   :  { %p2131_p10 = pnand %p2129_p9, %p2126_p8 }
  0x18   :  { %2134 = shalt.err (!%p2131_p10)
}
  0x19   :  { %s2135_s20 = scalar_lea.vmem %s2214_s24, 3072  ;;  %p2140_p12 = scmp.lt.s32.totalorder %s2214_s24, %s2214_s24 }
  0x1a   :  { %p2136_p11 = scmp.ne.s32.totalorder %s2214_s24, %s2135_s20  ;;  %p2141_p13 = scmp.lt.s32.totalorder %s2135_s20, %s2135_s20 }
  0x1c   :  { %p2142_p0 = por %p2141_p13, %p2140_p12 }
  0x1e   :  { %p2143_p1 = pnand %p2142_p0, %p2136_p11 }
  0x20   :  { %2146 = shalt.err (!%p2143_p1)
}
  0x21   :  { %28 = dma.hbm_to_vmem [thread:$0]  %s2547_s2, 3072, %s2214_s24, [#allocation3], %s2175_s9, %s2175_s9, %s2176_s10  }
  0x22   :  { %s2177_s22 = smov [#allocation6]   ;;  %s2147_s27 = scalar_lea.hbm %s2550_s5, 128 }
  0x23   :  { %s49_s23 = sshll.u32 %s2177_s22, 4  ;;  %p2148_p2 = scmp.ne.s32.totalorder %s2550_s5, %s2147_s27  ;;  %s50_s23 = int_to_ptr.vmem [resolvable:$true] %s49_s23 }
  0x24   :  { %p2151_p3 = scmp.lt.u32.totalorder %s2147_s27, %s2550_s5 }
  0x26   :  { %p2153_p4 = pnand %p2151_p3, %p2148_p2 }
  0x28   :  { %2156 = shalt.err (!%p2153_p4)
}
  0x29   :  { %s2157_s8 = scalar_lea.vmem %s50_s23, 128  ;;  %p2162_p6 = scmp.lt.s32.totalorder %s50_s23, %s50_s23 }
  0x2a   :  { %p2158_p5 = scmp.ne.s32.totalorder %s50_s23, %s2157_s8  ;;  %p2163_p7 = scmp.lt.s32.totalorder %s2157_s8, %s2157_s8 }
  0x2c   :  { %p2164_p8 = por %p2163_p7, %p2162_p6 }
  0x2e   :  { %p2165_p9 = pnand %p2164_p8, %p2158_p5 }
  0x30   :  { %2168 = shalt.err (!%p2165_p9)
}
  0x31   :  { %52 = dma.hbm_to_vmem [thread:$0]  %s2550_s5, 128, %s50_s23, [#allocation5]  }
  0x32   :  { %2169 = dma.done.wait [#allocation3], 3072  }
  0x33   :  { %2170 = vsyncadd [#allocation3], 4294964224 }
  0x34   :  { %2171 = dma.done.wait [#allocation5], 3200  }
  0x35   :  { %2172 = vsyncadd [#allocation5], 4294964096  ;;  %v1964_v0 = vld [vmem:[%s2546_s1] sm:$0xff]   ;;  %v1965_v1 = vld [vmem:[%s2546_s1 + $0x8] sm:$0xff]  }
  0x36   :  { %1878 = vmatprep.subr.bf16.mxu0 %v1964_v0  ;;  %v1966_v2 = vld [vmem:[%s2546_s1 + $0x10] sm:$0xff]   ;;  %v1967_v3 = vld [vmem:[%s2546_s1 + $0x18] sm:$0xff]   ;;  %v1972_v4 = vld [vmem:[%s2545_s0] sm:$0xff]  }
  0x37   :  { %1879 = vmatpush3.bf16.msra.mxu0 %v1964_v0  ;;  %v1968_v5 = vld [vmem:[%s2546_s1 + $0x20] sm:$0xff]   ;;  %1894 = vmatprep.mubr.bf16.mxu0 %v1972_v4  ;;  %v1969_v6 = vld [vmem:[%s2546_s1 + $0x28] sm:$0xff]   ;;  %v1970_v7 = vld [vmem:[%s2546_s1 + $0x30] sm:$0xff]  }
  0x38   :  { %1880 = vmatprep.subr.bf16.mxu0 %v1965_v1  ;;  %v1971_v8 = vld [vmem:[%s2546_s1 + $0x38] sm:$0xff]   ;;  %v1973_v9 = vld [vmem:[%s2545_s0 + $0x8] sm:$0xff]   ;;  %v1974_v10 = vld [vmem:[#allocation2 + $0x40] sm:$0xff]  }
  0x39   :  { %v1975_v11 = vld [vmem:[#allocation2] sm:$0xff]   ;;  %v1977_v13 = vld [vmem:[#allocation2 + $0x48] sm:$0xff]   ;;  %1792 = vmatprep.subr.bf16.mxu1 %v1974_v10  ;;  %v1980_v16 = vld [vmem:[#allocation2 + $0x50] sm:$0xff]  }
  0x3a   :  { %v1976_v12 = vld [vmem:[#allocation2 + $0x80] sm:$0xff]   ;;  %v1979_v14 = vld [vmem:[#allocation2 + $0x88] sm:$0xff]   ;;  %1793 = vmatpush3.bf16.msra.mxu1 %v1975_v11  ;;  %v1982_v17 = vld [vmem:[#allocation2 + $0x90] sm:$0xff]  }
  0x3b   :  { %1881 = vmatpush3.bf16.msra.mxu0 %v1965_v1  ;;  %v1978_v15 = vld [vmem:[#allocation2 + $0x8] sm:$0xff]   ;;  %1794 = vmatprep.subr.bf16.mxu1 %v1977_v13  ;;  %v1981_v18 = vld [vmem:[#allocation2 + $0x10] sm:$0xff]   ;;  %v1983_v19 = vld [vmem:[#allocation2 + $0x58] sm:$0xff]  }
  0x3c   :  { %1882 = vmatprep.subr.bf16.mxu0 %v1966_v2  ;;  %v1985_v20 = vld [vmem:[#allocation2 + $0x98] sm:$0xff]   ;;  %v1986_v22 = vld [vmem:[#allocation2 + $0x60] sm:$0xff]   ;;  %v1989_v25 = vld [vmem:[#allocation2 + $0x68] sm:$0xff]  }
  0x3d   :  { %v1984_v21 = vld [vmem:[#allocation2 + $0x18] sm:$0xff]   ;;  %v1988_v23 = vld [vmem:[#allocation2 + $0xa0] sm:$0xff]   ;;  %v1991_v26 = vld [vmem:[#allocation2 + $0xa8] sm:$0xff]  }
  0x3e   :  { %1795 = vmatpush3.bf16.msra.mxu1 %v1978_v15  ;;  %v1987_v24 = vld [vmem:[#allocation2 + $0x20] sm:$0xff]   ;;  %v1990_v27 = vld [vmem:[#allocation2 + $0x28] sm:$0xff]   ;;  %v1992_v28 = vld [vmem:[#allocation2 + $0x70] sm:$0xff]  }
  0x3f   :  { %1883 = vmatpush3.bf16.msra.mxu0 %v1966_v2  ;;  %1796 = vmatprep.subr.bf16.mxu1 %v1980_v16  ;;  %v1994_v29 = vld [vmem:[#allocation2 + $0xb0] sm:$0xff]   ;;  %v1995_v31 = vld [vmem:[#allocation2 + $0x78] sm:$0xff]   ;;  %v64_v2 = vlaneseq  ;;  %v2289_v4 = vld [vmem:[#allocation6] sm:$0xff] }
  0x40   :  { %1884 = vmatprep.subr.bf16.mxu0 %v1967_v3  ;;  %v1993_v30 = vld [vmem:[#allocation2 + $0x30] sm:$0xff]   ;;  %v1996_v32 = vld [vmem:[#allocation2 + $0x38] sm:$0xff]  }
  0x41   :  { %v1997_v33 = vld [vmem:[#allocation2 + $0xb8] sm:$0xff]  }
  0x42   :  { %1797 = vmatpush3.bf16.msra.mxu1 %v1981_v18 }
  0x43   :  { %1885 = vmatpush3.bf16.msra.mxu0 %v1967_v3  ;;  %1798 = vmatprep.subr.bf16.mxu1 %v1983_v19  ;;  %v2287_v3 = vshrl.u32 %v64_v2, 7 }
  0x44   :  { %1886 = vmatprep.subr.bf16.mxu0 %v1968_v5 }
  0x45   :  { %v315_v10 = vsub.s32 1, %v2287_v3  ;;  %vm433_vm2 = vcmp.lt.s32.totalorder %v2287_v3, 1  ;;  %vm446_vm5 = vcmp.lt.s32.totalorder %v2287_v3, 7 }
  0x46   :  { %1799 = vmatpush3.bf16.msra.mxu1 %v1984_v21 }
  0x47   :  { %1887 = vmatpush3.bf16.msra.mxu0 %v1968_v5  ;;  %1800 = vmatprep.subr.bf16.mxu1 %v1986_v22  ;;  %v307_v5 = vsub.s32 0, %v2287_v3 }
  0x48   :  { %1888 = vmatprep.subr.bf16.mxu0 %v1969_v6 }
  0x4a   :  { %1801 = vmatpush3.bf16.msra.mxu1 %v1987_v24 }
  0x4b   :  { %1889 = vmatpush3.bf16.msra.mxu0 %v1969_v6  ;;  %1802 = vmatprep.subr.bf16.mxu1 %v1989_v25 }
  0x4c   :  { %1890 = vmatprep.subr.bf16.mxu0 %v1970_v7 }
  0x4e   :  { %1803 = vmatpush3.bf16.msra.mxu1 %v1990_v27 }
  0x4f   :  { %1891 = vmatpush3.bf16.msra.mxu0 %v1970_v7  ;;  %1804 = vmatprep.subr.bf16.mxu1 %v1992_v28 }
  0x50   :  { %1892 = vmatprep.subr.bf16.mxu0 %v1971_v8 }
  0x52   :  { %1805 = vmatpush3.bf16.msra.mxu1 %v1993_v30 }
  0x53   :  { %1893 = vmatpush3.bf16.msra.mxu0 %v1971_v8  ;;  %1806 = vmatprep.subr.bf16.mxu1 %v1995_v31 }
  0x54   :  { %1898 = vmatprep.subr.bf16.mxu0 %v1976_v12 }
  0x56   :  { %1895 = vmatmul.mubr.bf16.vlgmr.msra.gmra.mrb[0].mxu0 %v1973_v9  ;;  %1807 = vmatpush3.bf16.msra.mxu1 %v1996_v32 }
  0x57   :  { %1899 = vmatpush3.bf16.msra.mxu0 %v1976_v12 }
  0x58   :  { %1900 = vmatprep.subr.bf16.mxu0 %v1979_v14 }
  0x5b   :  { %1901 = vmatpush3.bf16.msra.mxu0 %v1979_v14 }
  0x5c   :  { %1902 = vmatprep.subr.bf16.mxu0 %v1982_v17 }
  0x5f   :  { %1903 = vmatpush3.bf16.msra.mxu0 %v1982_v17 }
  0x60   :  { %1904 = vmatprep.subr.bf16.mxu0 %v1985_v20 }
  0x63   :  { %1905 = vmatpush3.bf16.msra.mxu0 %v1985_v20 }
  0x64   :  { %1906 = vmatprep.subr.bf16.mxu0 %v1988_v23 }
  0x67   :  { %1907 = vmatpush3.bf16.msra.mxu0 %v1988_v23 }
  0x68   :  { %1908 = vmatprep.subr.bf16.mxu0 %v1991_v26 }
  0x6b   :  { %1909 = vmatpush3.bf16.msra.mxu0 %v1991_v26 }
  0x6c   :  { %1910 = vmatprep.subr.bf16.mxu0 %v1994_v29 }
  0x6f   :  { %1911 = vmatpush3.bf16.msra.mxu0 %v1994_v29 }
  0x70   :  { %1912 = vmatprep.subr.bf16.mxu0 %v1997_v33 }
  0x73   :  { %1913 = vmatpush3.bf16.msra.mxu0 %v1997_v33 }
 0x129   :  { %v1896_v34 = vpop.f32.mrb[0].mxu0 }
 0x12a   :  { %v255_v35 = vpop.f32.mrb[1].mxu0  ;;  %v281_v41 = vmul.f32 %v1896_v34, %v1896_v34 }
 0x12b   :  { %v1897_v36 = vpop.f32.mrb[2].mxu0  ;;  %v279_v38 = vmul.f32 %v255_v35, %v255_v35 }
 0x12c   :  { %v258_v37 = vpop.f32.mrb[3].mxu0  ;;  %v282_v44 = vmul.f32 %v1897_v36, %v1897_v36 }
 0x12d   :  { %v270_v39 = vadd.f32 %v258_v37, %v255_v35  ;;  %v280_v40 = vmul.f32 %v258_v37, %v258_v37 }
 0x12f   :  { %v271_v42 = vadd.f32 %v1896_v34, %v270_v39  ;;  %v283_v43 = vadd.f32 %v280_v40, %v279_v38 }
 0x131   :  { %v272_v45 = vadd.f32 %v1897_v36, %v271_v42  ;;  %v284_v46 = vadd.f32 %v283_v43, %v281_v41 }
 0x133   :  { %v273_v47 = vrot.slane %v272_v45, 4  ;;  %v285_v48 = vadd.f32 %v284_v46, %v282_v44 }
 0x135   :  { %v274_v49 = vadd.f32 %v273_v47, %v272_v45  ;;  %v286_v50 = vrot.slane %v285_v48, 4 }
 0x137   :  { %v275_v51 = vrot.slane %v274_v49, 2  ;;  %v287_v52 = vadd.f32 %v286_v50, %v285_v48 }
 0x139   :  { %v276_v53 = vadd.f32 %v275_v51, %v274_v49  ;;  %v288_v54 = vrot.slane %v287_v52, 2 }
 0x13b   :  { %v277_v55 = vrot.slane %v276_v53, 1  ;;  %v289_v56 = vadd.f32 %v288_v54, %v287_v52 }
 0x13d   :  { %v278_v57 = vadd.f32 %v277_v55, %v276_v53  ;;  %v290_v58 = vrot.slane %v289_v56, 1 }
 0x13f   :  { %v291_v59 = vadd.f32 %v290_v58, %v289_v56  ;;  %v292_v60 = vmul.f32 0.03125, %v278_v57 }
 0x141   :  { %v293_v61 = vmul.f32 0.03125, %v291_v59  ;;  %v294_v62 = vmul.f32 %v292_v60, %v292_v60 }
 0x143   :  { %v295_v63 = vsub.f32 %v293_v61, %v294_v62 }
 0x145   :  { %v296_v0 = vmax.f32 %v295_v63, 0.0 }
 0x147   :  { %v297_v1 = vadd.f32 1e-05, %v296_v0 }
 0x149   :  { %2030 = vrsqrt.f32 %v297_v1 }
 0x153   :  { %v2031_v6 = vpop.eup %2030 }
 0x154   :  { %v299_v7 = vmul.f32 %v2031_v6, %v2289_v4 }
 0x156   :  { %v300_v8 = vmul.f32 %v299_v7, %v292_v60  ;;  %v308_v9 = vrot.slane %v299_v7, %v307_v5 }
 0x158   :  { %v302_v11 = vrot.slane %v300_v8, 7  ;;  %v310_v12 = vmul.f32 %v308_v9, %v258_v37  ;;  %v311_v13 = vmul.f32 %v1896_v34, %v308_v9  ;;  %v312_v14 = vmul.f32 %v1897_v36, %v308_v9 }
 0x159   :  { %v309_v15 = vmul.f32 %v308_v9, %v255_v35 }
 0x15a   :  { %v304_v16 = vsub.f32 %v2289_v4, %v302_v11 }
 0x15c   :  { %v316_v17 = vrot.slane %v304_v16, %v315_v10 }
 0x15e   :  { %v2295_v18 = vadd.f32 %v316_v17, %v310_v12  ;;  %v2297_v19 = vadd.f32 %v316_v17, %v309_v15  ;;  %v2299_v20 = vadd.f32 %v316_v17, %v312_v14  ;;  %v2301_v21 = vadd.f32 %v316_v17, %v311_v13 }
 0x160   :  { %v2304_v22 = vmul.f32 0.70710677, %v2295_v18  ;;  %v2307_v23 = vmul.f32 0.70710677, %v2297_v19  ;;  %v2310_v24 = vmul.f32 0.70710677, %v2299_v20 }
 0x161   :  { %v2313_v25 = vmul.f32 0.70710677, %v2301_v21 }
 0x162   :  { %v330_v26 = vand.u32 2147483647, %v2304_v22  ;;  %v329_v27 = vand.u32 2147483647, %v2307_v23  ;;  %v332_v28 = vand.u32 2147483647, %v2310_v24 }
 0x163   :  { %v331_v29 = vand.u32 2147483647, %v2313_v25  ;;  %vm410_vm1 = vcmp.ge.f32.partialorder %v2304_v22, 0.0  ;;  %vm409_vm3 = vcmp.ge.f32.partialorder %v2307_v23, 0.0  ;;  %vm412_vm4 = vcmp.ge.f32.partialorder %v2310_v24, 0.0 }
 0x164   :  { %v334_v30 = vmul.f32 0.3275911, %v330_v26  ;;  %v333_v31 = vmul.f32 0.3275911, %v329_v27  ;;  %v336_v32 = vmul.f32 0.3275911, %v332_v28 }
 0x165   :  { %v335_v35 = vmul.f32 0.3275911, %v331_v29  ;;  %v386_v38 = vsub.f32 0.0, %v330_v26  ;;  %v385_v39 = vsub.f32 0.0, %v329_v27  ;;  %v388_v42 = vsub.f32 0.0, %v332_v28 }
 0x166   :  { %v338_v33 = vadd.f32 1.0, %v334_v30  ;;  %v337_v34 = vadd.f32 1.0, %v333_v31  ;;  %v340_v36 = vadd.f32 1.0, %v336_v32  ;;  %v387_v47 = vsub.f32 0.0, %v331_v29 }
 0x167   :  { %v339_v37 = vadd.f32 1.0, %v335_v35  ;;  %v390_v41 = vmul.f32 %v386_v38, %v330_v26  ;;  %v389_v45 = vmul.f32 %v385_v39, %v329_v27  ;;  %v392_v52 = vmul.f32 %v388_v42, %v332_v28 }
 0x168   :  { %2032 = vrcp.f32 %v338_v33  ;;  %v391_v58 = vmul.f32 %v387_v47, %v331_v29  ;;  %v73_v32 = vand.u32 15, %v2287_v3  ;;  %v68_v39 = vadd.s32 24, %v2287_v3 }
 0x169   :  { %2034 = vrcp.f32 %v337_v34  ;;  %v395_v50 = vmul.f32 1.442695, %v390_v41  ;;  %v393_v54 = vmul.f32 1.442695, %v389_v45  ;;  %v399_v63 = vmul.f32 1.442695, %v392_v52 }
 0x16a   :  { %2036 = vrcp.f32 %v340_v36  ;;  %v397_v6 = vmul.f32 1.442695, %v391_v58  ;;  %v66_v36 = vadd.s32 8, %v2287_v3  ;;  %vm2322_vm0 = vcmp.ne.s32.totalorder %v73_v32, 0 }
 0x16b   :  { %2038 = vrcp.f32 %v339_v37  ;;  %v322_v58 = vmul.f32 0.5, %v2295_v18  ;;  %v324_v18 = vmul.f32 0.5, %v2299_v20  ;;  %vm411_vm7 = vcmp.ge.f32.partialorder %v2313_v25, 0.0 }
 0x16c   :  { %2040 = vpow2.f32 %v395_v50  ;;  %v80_v50 = vand.u32 15, %v66_v36 }
 0x16d   :  { %2042 = vpow2.f32 %v393_v54 }
 0x16e   :  { %2044 = vpow2.f32 %v399_v63  ;;  %vm130_vm8 = vcmp.ne.s32.totalorder %v80_v50, 15  ;;  %v2001_v50 = vld [vmem:[%s2548_s3 + $0x18] sm:$0xff]  }
 0x16f   :  { %2046 = vpow2.f32 %v397_v6 }
 0x172   :  { %v2033_v40 = vpop.eup %2032 }
 0x173   :  { %v2035_v43 = vpop.eup %2034  ;;  %v350_v44 = vmul.f32 1.0614054, %v2033_v40 }
 0x174   :  { %v349_v46 = vmul.f32 1.0614054, %v2035_v43  ;;  %v2037_v49 = vpop.eup %2036 }
 0x175   :  { %v354_v48 = vadd.f32 -1.4531521, %v350_v44  ;;  %v352_v55 = vmul.f32 1.0614054, %v2037_v49  ;;  %v2039_v56 = vpop.eup %2038 }
 0x176   :  { %v353_v51 = vadd.f32 -1.4531521, %v349_v46  ;;  %v351_v61 = vmul.f32 1.0614054, %v2039_v56  ;;  %v2041_v30 = vpop.eup %2040 }
 0x177   :  { %v358_v53 = vmul.f32 %v2033_v40, %v354_v48  ;;  %v356_v60 = vadd.f32 -1.4531521, %v352_v55  ;;  %v2043_v33 = vpop.eup %2042 }
 0x178   :  { %v357_v57 = vmul.f32 %v2035_v43, %v353_v51  ;;  %v355_v2 = vadd.f32 -1.4531521, %v351_v61  ;;  %v2045_v45 = vpop.eup %2044 }
 0x179   :  { %v362_v59 = vadd.f32 1.4214138, %v358_v53  ;;  %v360_v1 = vmul.f32 %v2037_v49, %v356_v60  ;;  %v2047_v52 = vpop.eup %2046 }
 0x17a   :  { %v361_v62 = vadd.f32 1.4214138, %v357_v57  ;;  %v359_v9 = vmul.f32 %v2039_v56, %v355_v2 }
 0x17b   :  { %v366_v0 = vmul.f32 %v2033_v40, %v362_v59  ;;  %v364_v8 = vadd.f32 1.4214138, %v360_v1 }
 0x17c   :  { %v365_v5 = vmul.f32 %v2035_v43, %v361_v62  ;;  %v363_v13 = vadd.f32 1.4214138, %v359_v9  ;;  %v321_v62 = vmul.f32 0.5, %v2297_v19 }
 0x17d   :  { %v370_v7 = vadd.f32 -0.28449672, %v366_v0  ;;  %v368_v12 = vmul.f32 %v2037_v49, %v364_v8 }
 0x17e   :  { %v369_v10 = vadd.f32 -0.28449672, %v365_v5  ;;  %v367_v17 = vmul.f32 %v2039_v56, %v363_v13 }
 0x17f   :  { %v374_v11 = vmul.f32 %v2033_v40, %v370_v7  ;;  %v372_v16 = vadd.f32 -0.28449672, %v368_v12  ;;  %v323_v12 = vmul.f32 0.5, %v2301_v21 }
 0x180   :  { %v373_v14 = vmul.f32 %v2035_v43, %v369_v10  ;;  %v371_v29 = vadd.f32 -0.28449672, %v367_v17 }
 0x181   :  { %v378_v15 = vadd.f32 0.2548296, %v374_v11  ;;  %v376_v28 = vmul.f32 %v2037_v49, %v372_v16 }
 0x182   :  { %v377_v26 = vadd.f32 0.2548296, %v373_v14  ;;  %v375_v37 = vmul.f32 %v2039_v56, %v371_v29  ;;  %v2178_v14 = vmov 0.0  }
 0x183   :  { %v382_v27 = vmul.f32 %v2033_v40, %v378_v15  ;;  %v380_v35 = vadd.f32 0.2548296, %v376_v28  ;;  %v2343_v20 = vsel %vm2322_vm0, 1.0, %v2178_v14 }
 0x184   :  { %v381_v31 = vmul.f32 %v2035_v43, %v377_v26  ;;  %v379_v44 = vadd.f32 0.2548296, %v375_v37  ;;  %v67_v43 = vadd.s32 16, %v2287_v3 }
 0x185   :  { %v402_v34 = vmul.f32 %v2041_v30, %v382_v27  ;;  %v384_v42 = vmul.f32 %v2037_v49, %v380_v35  ;;  %v94_v49 = vand.u32 15, %v68_v39  ;;  %v2353_v27 = vsel %vm130_vm8, 1.0, %v2178_v14 }
 0x186   :  { %v401_v38 = vmul.f32 %v2043_v33, %v381_v31  ;;  %v383_v51 = vmul.f32 %v2039_v56, %v379_v44  ;;  %v87_v61 = vand.u32 15, %v67_v43  ;;  %v1998_v43 = vld [vmem:[%s2548_s3] sm:$0xff]  }
 0x187   :  { %v406_v41 = vsub.f32 1.0, %v402_v34  ;;  %v404_v48 = vmul.f32 %v2045_v45, %v384_v42  ;;  %vm2334_vm6 = vcmp.ne.s32.totalorder %v94_v49, 15  ;;  %1918 = vmatprep.subr.bf16.mxu1 %v1998_v43  ;;  %v2005_v49 = vld [vmem:[%s2548_s3 + $0x38] sm:$0xff]  }
 0x188   :  { %v405_v40 = vsub.f32 1.0, %v401_v38  ;;  %v403_v57 = vmul.f32 %v2047_v52, %v383_v51  ;;  %v2351_v26 = vsel %vm2334_vm6, 1.0, %v2178_v14  ;;  %vm119_vm9 = vcmp.ne.s32.totalorder %v87_v61, 0  ;;  %v2002_v51 = vld [vmem:[%s2548_s3 + $0x20] sm:$0xff]   ;;  %v2003_v52 = vld [vmem:[%s2548_s3 + $0x28] sm:$0xff]  }
 0x189   :  { %v414_v47 = vsub.f32 0.0, %v406_v41  ;;  %v408_v55 = vsub.f32 1.0, %v404_v48  ;;  %v2365_v37 = vsel %vm119_vm9, 1.0, %v2178_v14  ;;  %v2000_v48 = vld [vmem:[%s2548_s3 + $0x10] sm:$0xff]  }
 0x18a   :  { %v413_v53 = vsub.f32 0.0, %v405_v40  ;;  %v407_v0 = vsub.f32 1.0, %v403_v57 }
 0x18b   :  { %v418_v54 = vsel %vm410_vm1, %v406_v41, %v414_v47  ;;  %v416_v63 = vsub.f32 0.0, %v408_v55  ;;  %v1999_v47 = vld [vmem:[%s2548_s3 + $0x8] sm:$0xff]  }
 0x18c   :  { %v417_v59 = vsel %vm409_vm3, %v405_v40, %v413_v53  ;;  %v422_v60 = vadd.f32 1.0, %v418_v54  ;;  %v415_v5 = vsub.f32 0.0, %v407_v0  ;;  %v2004_v53 = vld [vmem:[%s2548_s3 + $0x30] sm:$0xff]  }
 0x18d   :  { %v421_v56 = vadd.f32 1.0, %v417_v59  ;;  %v420_v2 = vsel %vm412_vm4, %v408_v55, %v416_v63 }
 0x18e   :  { %v426_v22 = vmul.f32 %v422_v60, %v322_v58  ;;  %v424_v19 = vadd.f32 1.0, %v420_v2  ;;  %v419_v24 = vsel %vm411_vm7, %v407_v0, %v415_v5 }
 0x18f   :  { %v425_v1 = vmul.f32 %v421_v56, %v321_v62  ;;  %v423_v13 = vadd.f32 1.0, %v419_v24 }
 0x190   :  { %v430_v6 = vrot.slane %v426_v22, 7  ;;  %v443_v7 = vrot.slane %v426_v22, 1  ;;  %v428_v11 = vmul.f32 %v424_v19, %v324_v18 }
 0x191   :  { %v429_v8 = vrot.slane %v425_v1, 7  ;;  %v442_v9 = vrot.slane %v425_v1, 1  ;;  %v456_v10 = vpack.c.bf16 %v426_v22, %v425_v1  ;;  %v427_v17 = vmul.f32 %v423_v13, %v323_v12 }
 0x192   :  { %v432_v16 = vrot.slane %v428_v11, 7  ;;  %v445_v21 = vrot.slane %v428_v11, 1 }
 0x193   :  { %685 = vmatprep.mubr.bf16.mxu1 %v456_v10  ;;  %v436_v15 = vsel %vm433_vm2, %v429_v8, %v430_v6  ;;  %v449_v25 = vsel %vm446_vm5, %v442_v9, %v443_v7  ;;  %v444_v29 = vrot.slane %v427_v17, 1  ;;  %v459_v30 = vpack.c.bf16 %v428_v11, %v427_v17 }
 0x194   :  { %v437_v28 = vsel %vm433_vm2, %v432_v16, %v429_v8  ;;  %v450_v31 = vsel %vm446_vm5, %v445_v21, %v442_v9  ;;  %v431_v34 = vrot.slane %v427_v17, 7 }
 0x195   :  { %v438_v32 = vmul.f32 %v2343_v20, %v437_v28  ;;  %v454_v33 = vmul.f32 %v2351_v26, %v450_v31  ;;  %v448_v35 = vsel %vm446_vm5, %v443_v7, %v444_v29  ;;  %v447_v36 = vsel %vm446_vm5, %v444_v29, %v445_v21 }
 0x196   :  { %v452_v39 = vmul.f32 %v2353_v27, %v448_v35  ;;  %v434_v42 = vsel %vm433_vm2, %v431_v34, %v432_v16  ;;  %v435_v44 = vsel %vm433_vm2, %v430_v6, %v431_v34 }
 0x197   :  { %v455_v38 = vpack.c.bf16 %v436_v15, %v438_v32  ;;  %v460_v41 = vpack.c.bf16 %v454_v33, %v447_v36  ;;  %v440_v40 = vmul.f32 %v2365_v37, %v435_v44 }
 0x198   :  { %v457_v45 = vpack.c.bf16 %v452_v39, %v449_v25 }
 0x199   :  { %686 = vmatmul.mubr.bf16.vlgmr.msra.gmra.mrb[0].mxu1 %v455_v38  ;;  %v458_v46 = vpack.c.bf16 %v434_v42, %v440_v40  ;;  %v788_v40 = vsub.s32 2, %v2287_v3 }
 0x19a   :  { %693 = vmatprep.mubr.bf16.mxu1 %v459_v30  ;;  %1914 = vmatprep.mubr.bf16.mxu0 %v457_v45 }
 0x19b   :  { %1915 = vmatmul.mubr.bf16.vlgmr.msra.gmra.mrb[4].mxu0 %v460_v41  ;;  %1919 = vmatpush3.bf16.msra.mxu1 %v1998_v43 }
 0x19c   :  { %1920 = vmatprep.subr.bf16.mxu1 %v1999_v47 }
 0x19f   :  { %1921 = vmatpush3.bf16.msra.mxu1 %v1999_v47 }
 0x1a0   :  { %1922 = vmatprep.subr.bf16.mxu1 %v2000_v48 }
 0x1a1   :  { %694 = vmatmul.mubr.bf16.gmra.mrb[4].mxu1 %v458_v46 }
 0x1a3   :  { %1923 = vmatpush3.bf16.msra.mxu1 %v2000_v48 }
 0x1a4   :  { %1924 = vmatprep.subr.bf16.mxu1 %v2001_v50 }
 0x1a7   :  { %1925 = vmatpush3.bf16.msra.mxu1 %v2001_v50  ;;  %v796_v50 = vsub.s32 3, %v2287_v3 }
 0x1a8   :  { %1926 = vmatprep.subr.bf16.mxu1 %v2002_v51 }
 0x1ab   :  { %1927 = vmatpush3.bf16.msra.mxu1 %v2002_v51 }
 0x1ac   :  { %1928 = vmatprep.subr.bf16.mxu1 %v2003_v52 }
 0x1af   :  { %1929 = vmatpush3.bf16.msra.mxu1 %v2003_v52 }
 0x1b0   :  { %1930 = vmatprep.subr.bf16.mxu1 %v2004_v53 }
 0x1b3   :  { %1931 = vmatpush3.bf16.msra.mxu1 %v2004_v53 }
 0x1b4   :  { %1932 = vmatprep.subr.bf16.mxu1 %v2005_v49 }
 0x1b7   :  { %1933 = vmatpush3.bf16.msra.mxu1 %v2005_v49 }
 0x26c   :  { %v1808_v54 = vpop.f32.mrb[0].mxu1 }
 0x26d   :  { %v1809_v55 = vpop.f32.mrb[1].mxu1 }
 0x26e   :  { %v1810_v57 = vadd.f32 %v1809_v55, %v1808_v54  ;;  %v1811_v58 = vpop.f32.mrb[2].mxu1  ;;  %v1916_v59 = vpop.f32.mrb[4].mxu0 }
 0x26f   :  { %v1812_v60 = vpop.f32.mrb[3].mxu1  ;;  %v736_v61 = vpop.f32.mrb[5].mxu0 }
 0x270   :  { %v1813_v62 = vadd.f32 %v1812_v60, %v1811_v58  ;;  %v737_v56 = vadd.f32 %v1810_v57, %v736_v61  ;;  %v1917_v63 = vpop.f32.mrb[6].mxu0 }
 0x271   :  { %v739_v0 = vpop.f32.mrb[7].mxu0 }
 0x272   :  { %v740_v22 = vadd.f32 %v1813_v62, %v739_v0  ;;  %v760_v1 = vmul.f32 %v737_v56, %v737_v56 }
 0x274   :  { %v1814_v23 = vpop.f32.mrb[4].mxu1  ;;  %v751_v18 = vadd.f32 %v740_v22, %v737_v56  ;;  %v761_v2 = vmul.f32 %v740_v22, %v740_v22 }
 0x275   :  { %v1815_v5 = vpop.f32.mrb[5].mxu1 }
 0x276   :  { %v1816_v6 = vadd.f32 %v1815_v5, %v1814_v23  ;;  %v1817_v7 = vpop.f32.mrb[6].mxu1  ;;  %v764_v19 = vadd.f32 %v761_v2, %v760_v1 }
 0x277   :  { %v1818_v8 = vpop.f32.mrb[7].mxu1 }
 0x278   :  { %v745_v9 = vadd.f32 %v1916_v59, %v1816_v6  ;;  %v1819_v10 = vadd.f32 %v1818_v8, %v1817_v7 }
 0x27a   :  { %v752_v24 = vadd.f32 %v751_v18, %v745_v9  ;;  %v762_v11 = vmul.f32 %v745_v9, %v745_v9  ;;  %v748_v12 = vadd.f32 %v1917_v63, %v1819_v10 }
 0x27c   :  { %v765_v13 = vadd.f32 %v764_v19, %v762_v11  ;;  %v753_v14 = vadd.f32 %v752_v24, %v748_v12  ;;  %v763_v15 = vmul.f32 %v748_v12, %v748_v12 }
 0x27e   :  { %v754_v25 = vrot.slane %v753_v14, 4  ;;  %v766_v16 = vadd.f32 %v765_v13, %v763_v15 }
 0x280   :  { %v755_v17 = vadd.f32 %v754_v25, %v753_v14  ;;  %v767_v21 = vrot.slane %v766_v16, 4 }
 0x282   :  { %v756_v28 = vrot.slane %v755_v17, 2  ;;  %v768_v29 = vadd.f32 %v767_v21, %v766_v16 }
 0x284   :  { %v757_v30 = vadd.f32 %v756_v28, %v755_v17  ;;  %v769_v31 = vrot.slane %v768_v29, 2 }
 0x286   :  { %v758_v32 = vrot.slane %v757_v30, 1  ;;  %v770_v33 = vadd.f32 %v769_v31, %v768_v29 }
 0x288   :  { %v759_v34 = vadd.f32 %v758_v32, %v757_v30  ;;  %v771_v35 = vrot.slane %v770_v33, 1 }
 0x28a   :  { %v772_v36 = vadd.f32 %v771_v35, %v770_v33  ;;  %v773_v38 = vmul.f32 0.03125, %v759_v34 }
 0x28c   :  { %v774_v39 = vmul.f32 0.03125, %v772_v36  ;;  %v775_v41 = vmul.f32 %v773_v38, %v773_v38 }
 0x28e   :  { %v776_v42 = vsub.f32 %v774_v39, %v775_v41 }
 0x290   :  { %v777_v44 = vmax.f32 %v776_v42, 0.0 }
 0x292   :  { %v778_v45 = vadd.f32 1e-05, %v777_v44 }
 0x294   :  { %2048 = vrsqrt.f32 %v778_v45 }
 0x29e   :  { %v2049_v46 = vpop.eup %2048 }
 0x29f   :  { %v780_v43 = vmul.f32 %v2049_v46, %v2289_v4 }
 0x2a1   :  { %v781_v47 = vmul.f32 %v780_v43, %v773_v38  ;;  %v789_v48 = vrot.slane %v780_v43, %v788_v40 }
 0x2a3   :  { %v783_v51 = vrot.slane %v781_v47, 7  ;;  %v793_v52 = vmul.f32 %v789_v48, %v748_v12  ;;  %v790_v53 = vmul.f32 %v789_v48, %v737_v56  ;;  %v791_v49 = vmul.f32 %v789_v48, %v740_v22 }
 0x2a4   :  { %v792_v54 = vmul.f32 %v789_v48, %v745_v9 }
 0x2a5   :  { %v785_v55 = vsub.f32 %v2289_v4, %v783_v51 }
 0x2a7   :  { %v797_v57 = vrot.slane %v785_v55, %v796_v50 }
 0x2a9   :  { %v2401_v58 = vadd.f32 %v797_v57, %v793_v52  ;;  %v2403_v59 = vadd.f32 %v797_v57, %v790_v53  ;;  %v2405_v60 = vadd.f32 %v797_v57, %v791_v49  ;;  %v2407_v61 = vadd.f32 %v797_v57, %v792_v54 }
 0x2ab   :  { %v2410_v62 = vmul.f32 0.70710677, %v2401_v58  ;;  %v2413_v63 = vmul.f32 0.70710677, %v2403_v59  ;;  %v2416_v56 = vmul.f32 0.70710677, %v2405_v60 }
 0x2ac   :  { %v2420_v22 = vmul.f32 0.70710677, %v2407_v61 }
 0x2ad   :  { %v813_v0 = vand.u32 2147483647, %v2410_v62  ;;  %v810_v23 = vand.u32 2147483647, %v2413_v63  ;;  %v811_v1 = vand.u32 2147483647, %v2416_v56 }
 0x2ae   :  { %v812_v2 = vand.u32 2147483647, %v2420_v22  ;;  %vm893_vm10 = vcmp.ge.f32.partialorder %v2410_v62, 0.0  ;;  %vm890_vm11 = vcmp.ge.f32.partialorder %v2413_v63, 0.0  ;;  %vm891_vm12 = vcmp.ge.f32.partialorder %v2416_v56, 0.0 }
 0x2af   :  { %v817_v18 = vmul.f32 0.3275911, %v813_v0  ;;  %v814_v5 = vmul.f32 0.3275911, %v810_v23  ;;  %v815_v6 = vmul.f32 0.3275911, %v811_v1 }
 0x2b0   :  { %v816_v19 = vmul.f32 0.3275911, %v812_v2  ;;  %v869_v24 = vsub.f32 0.0, %v813_v0  ;;  %v866_v11 = vsub.f32 0.0, %v810_v23  ;;  %v867_v12 = vsub.f32 0.0, %v811_v1 }
 0x2b1   :  { %v821_v7 = vadd.f32 1.0, %v817_v18  ;;  %v818_v8 = vadd.f32 1.0, %v814_v5  ;;  %v819_v9 = vadd.f32 1.0, %v815_v6  ;;  %v868_v21 = vsub.f32 0.0, %v812_v2 }
 0x2b2   :  { %v820_v10 = vadd.f32 1.0, %v816_v19  ;;  %v873_v14 = vmul.f32 %v869_v24, %v813_v0  ;;  %v870_v16 = vmul.f32 %v866_v11, %v810_v23  ;;  %v871_v30 = vmul.f32 %v867_v12, %v811_v1 }
 0x2b3   :  { %2050 = vrcp.f32 %v821_v7  ;;  %v872_v41 = vmul.f32 %v868_v21, %v812_v2  ;;  %vm892_vm13 = vcmp.ge.f32.partialorder %v2420_v22, 0.0  ;;  %v804_v56 = vmul.f32 0.5, %v2407_v61  ;;  %v2007_v22 = vld [vmem:[#allocation4] sm:$0xff]   ;;  %v2010_v61 = vld [vmem:[#allocation4 + $0x8] sm:$0xff]  }
 0x2b4   :  { %2052 = vrcp.f32 %v818_v8  ;;  %v880_v31 = vmul.f32 1.442695, %v873_v14  ;;  %v874_v35 = vmul.f32 1.442695, %v870_v16  ;;  %v876_v44 = vmul.f32 1.442695, %v871_v30 }
 0x2b5   :  { %2054 = vrcp.f32 %v819_v9  ;;  %v878_v51 = vmul.f32 1.442695, %v872_v41 }
 0x2b6   :  { %2056 = vrcp.f32 %v820_v10 }
 0x2b7   :  { %2058 = vpow2.f32 %v880_v31 }
 0x2b8   :  { %2060 = vpow2.f32 %v874_v35 }
 0x2b9   :  { %2062 = vpow2.f32 %v876_v44 }
 0x2ba   :  { %2064 = vpow2.f32 %v878_v51  ;;  %v2008_v51 = vld [vmem:[#allocation4 + $0x80] sm:$0xff]  }
 0x2bb   :  { %1938 = vmatprep.subr.bf16.mxu1 %v2008_v51 }
 0x2bd   :  { %v2051_v13 = vpop.eup %2050 }
 0x2be   :  { %v2053_v15 = vpop.eup %2052  ;;  %v833_v25 = vmul.f32 1.0614054, %v2051_v13 }
 0x2bf   :  { %v830_v17 = vmul.f32 1.0614054, %v2053_v15  ;;  %v2055_v28 = vpop.eup %2054 }
 0x2c0   :  { %v837_v29 = vadd.f32 -1.4531521, %v833_v25  ;;  %v831_v32 = vmul.f32 1.0614054, %v2055_v28  ;;  %v2057_v36 = vpop.eup %2056 }
 0x2c1   :  { %v834_v33 = vadd.f32 -1.4531521, %v830_v17  ;;  %v832_v45 = vmul.f32 1.0614054, %v2057_v36  ;;  %v2059_v19 = vpop.eup %2058 }
 0x2c2   :  { %v841_v34 = vmul.f32 %v2051_v13, %v837_v29  ;;  %v835_v38 = vadd.f32 -1.4531521, %v831_v32  ;;  %v2061_v10 = vpop.eup %2060 }
 0x2c3   :  { %v838_v39 = vmul.f32 %v2053_v15, %v834_v33  ;;  %v836_v47 = vadd.f32 -1.4531521, %v832_v45  ;;  %v2063_v25 = vpop.eup %2062 }
 0x2c4   :  { %v845_v42 = vadd.f32 1.4214138, %v841_v34  ;;  %v839_v40 = vmul.f32 %v2055_v28, %v835_v38  ;;  %v2065_v32 = vpop.eup %2064 }
 0x2c5   :  { %v842_v46 = vadd.f32 1.4214138, %v838_v39  ;;  %v840_v53 = vmul.f32 %v2057_v36, %v836_v47 }
 0x2c6   :  { %v849_v43 = vmul.f32 %v2051_v13, %v845_v42  ;;  %v843_v48 = vadd.f32 1.4214138, %v839_v40 }
 0x2c7   :  { %v846_v50 = vmul.f32 %v2053_v15, %v842_v46  ;;  %v844_v57 = vadd.f32 1.4214138, %v840_v53  ;;  %v805_v46 = vmul.f32 0.5, %v2401_v58  ;;  %v2006_v58 = vld [vmem:[#allocation4 + $0x40] sm:$0xff]   ;;  %v2011_v53 = vld [vmem:[#allocation4 + $0x88] sm:$0xff]  }
 0x2c8   :  { %v853_v52 = vadd.f32 -0.28449672, %v849_v43  ;;  %v847_v49 = vmul.f32 %v2055_v28, %v843_v48  ;;  %1840 = vmatprep.subr.bf16.mxu0 %v2006_v58 }
 0x2c9   :  { %v850_v54 = vadd.f32 -0.28449672, %v846_v50  ;;  %v848_v18 = vmul.f32 %v2057_v36, %v844_v57  ;;  %1841 = vmatpush3.bf16.msra.mxu0 %v2007_v22  ;;  %v2015_v57 = vld [vmem:[#allocation4 + $0x58] sm:$0xff]  }
 0x2ca   :  { %v857_v55 = vmul.f32 %v2051_v13, %v853_v52  ;;  %v851_v0 = vadd.f32 -0.28449672, %v847_v49  ;;  %v2009_v52 = vld [vmem:[#allocation4 + $0x48] sm:$0xff]   ;;  %v2012_v49 = vld [vmem:[#allocation4 + $0x50] sm:$0xff]  }
 0x2cb   :  { %v854_v23 = vmul.f32 %v2053_v15, %v850_v54  ;;  %v852_v7 = vadd.f32 -0.28449672, %v848_v18  ;;  %1842 = vmatprep.subr.bf16.mxu0 %v2009_v52  ;;  %v2014_v54 = vld [vmem:[#allocation4 + $0x90] sm:$0xff]   ;;  %v2020_v18 = vld [vmem:[#allocation4 + $0xa0] sm:$0xff]  }
 0x2cc   :  { %v861_v1 = vadd.f32 0.2548296, %v857_v55  ;;  %v855_v2 = vmul.f32 %v2055_v28, %v851_v0  ;;  %v2013_v55 = vld [vmem:[#allocation4 + $0x10] sm:$0xff]   ;;  %v2017_v0 = vld [vmem:[#allocation4 + $0x98] sm:$0xff]  }
 0x2cd   :  { %v858_v5 = vadd.f32 0.2548296, %v854_v23  ;;  %v856_v11 = vmul.f32 %v2057_v36, %v852_v7  ;;  %1843 = vmatpush3.bf16.msra.mxu0 %v2010_v61  ;;  %v2016_v23 = vld [vmem:[#allocation4 + $0x18] sm:$0xff]   ;;  %v2022_v7 = vld [vmem:[#allocation4 + $0x28] sm:$0xff]  }
 0x2ce   :  { %v865_v6 = vmul.f32 %v2051_v13, %v861_v1  ;;  %v859_v8 = vadd.f32 0.2548296, %v855_v2  ;;  %1844 = vmatprep.subr.bf16.mxu0 %v2012_v49  ;;  %v2018_v1 = vld [vmem:[#allocation4 + $0x60] sm:$0xff]  }
 0x2cf   :  { %v862_v9 = vmul.f32 %v2053_v15, %v858_v5  ;;  %v860_v17 = vadd.f32 0.2548296, %v856_v11  ;;  %v2019_v2 = vld [vmem:[#allocation4 + $0x20] sm:$0xff]   ;;  %v2021_v5 = vld [vmem:[#allocation4 + $0x68] sm:$0xff]   ;;  %v2029_v11 = vld [vmem:[#allocation4 + $0xb8] sm:$0xff]  }
 0x2d0   :  { %v885_v24 = vmul.f32 %v2059_v19, %v865_v6  ;;  %v863_v12 = vmul.f32 %v2055_v28, %v859_v8  ;;  %v802_v28 = vmul.f32 0.5, %v2403_v59  ;;  %v2023_v6 = vld [vmem:[#allocation4 + $0xa8] sm:$0xff]   ;;  %v2024_v19 = vld [vmem:[#allocation4 + $0x70] sm:$0xff]  }
 0x2d1   :  { %v882_v14 = vmul.f32 %v2061_v10, %v862_v9  ;;  %v864_v31 = vmul.f32 %v2057_v36, %v860_v17  ;;  %v803_v36 = vmul.f32 0.5, %v2405_v60  ;;  %1845 = vmatpush3.bf16.msra.mxu0 %v2013_v55  ;;  %v2026_v8 = vld [vmem:[#allocation4 + $0xb0] sm:$0xff]   ;;  %v2027_v10 = vld [vmem:[#allocation4 + $0x78] sm:$0xff]  }
 0x2d2   :  { %v889_v16 = vsub.f32 1.0, %v885_v24  ;;  %v883_v21 = vmul.f32 %v2063_v25, %v863_v12  ;;  %1846 = vmatprep.subr.bf16.mxu0 %v2015_v57  ;;  %v2025_v9 = vld [vmem:[#allocation4 + $0x30] sm:$0xff]   ;;  %v2028_v24 = vld [vmem:[#allocation4 + $0x38] sm:$0xff]  }
 0x2d3   :  { %v886_v29 = vsub.f32 1.0, %v882_v14  ;;  %v884_v15 = vmul.f32 %v2065_v32, %v864_v31 }
 0x2d4   :  { %v897_v30 = vsub.f32 0.0, %v889_v16  ;;  %v887_v13 = vsub.f32 1.0, %v883_v21 }
 0x2d5   :  { %v894_v33 = vsub.f32 0.0, %v886_v29  ;;  %v888_v41 = vsub.f32 1.0, %v884_v15  ;;  %1847 = vmatpush3.bf16.msra.mxu0 %v2016_v23 }
 0x2d6   :  { %v901_v34 = vsel %vm893_vm10, %v889_v16, %v897_v30  ;;  %v895_v35 = vsub.f32 0.0, %v887_v13  ;;  %1848 = vmatprep.subr.bf16.mxu0 %v2018_v1 }
 0x2d7   :  { %v898_v38 = vsel %vm890_vm11, %v886_v29, %v894_v33  ;;  %v905_v42 = vadd.f32 1.0, %v901_v34  ;;  %v896_v40 = vsub.f32 0.0, %v888_v41 }
 0x2d8   :  { %v902_v39 = vadd.f32 1.0, %v898_v38  ;;  %v899_v44 = vsel %vm891_vm12, %v887_v13, %v895_v35 }
 0x2d9   :  { %v903_v45 = vadd.f32 1.0, %v899_v44  ;;  %v900_v43 = vsel %vm892_vm13, %v888_v41, %v896_v40  ;;  %v2436_v59 = vmul.f32 %v905_v42, %v805_v46  ;;  %1849 = vmatpush3.bf16.msra.mxu0 %v2019_v2 }
 0x2da   :  { %v2430_v62 = vmul.f32 %v902_v39, %v802_v28  ;;  %v904_v47 = vadd.f32 1.0, %v900_v43  ;;  %1850 = vmatprep.subr.bf16.mxu0 %v2021_v5 }
 0x2db   :  { %v2434_v63 = vmul.f32 %v903_v45, %v803_v36 }
 0x2dc   :  { %v2441_v60 = vmul.f32 %v904_v47, %v804_v56 }
 0x2dd   :  { %v910_v48 = vpack.c.bf16 %v2434_v63, %v2430_v62  ;;  %1851 = vmatpush3.bf16.msra.mxu0 %v2022_v7 }
 0x2de   :  { %v911_v50 = vpack.c.bf16 %v2436_v59, %v2441_v60  ;;  %1852 = vmatprep.subr.bf16.mxu0 %v2024_v19 }
 0x2df   :  { %1934 = vmatprep.mubr.bf16.mxu1 %v910_v48 }
 0x2e0   :  { %1935 = vmatmul.mubr.bf16.vlgmr.msra.gmra.mrb[8].mxu1 %v911_v50 }
 0x2e1   :  { %1939 = vmatpush3.bf16.msra.mxu1 %v2008_v51  ;;  %1853 = vmatpush3.bf16.msra.mxu0 %v2025_v9  ;;  %v1062_v51 = vsub.s32 4, %v2287_v3 }
 0x2e2   :  { %1940 = vmatprep.subr.bf16.mxu1 %v2011_v53  ;;  %1854 = vmatprep.subr.bf16.mxu0 %v2027_v10 }
 0x2e5   :  { %1941 = vmatpush3.bf16.msra.mxu1 %v2011_v53  ;;  %1855 = vmatpush3.bf16.msra.mxu0 %v2028_v24 }
 0x2e6   :  { %1942 = vmatprep.subr.bf16.mxu1 %v2014_v54 }
 0x2e9   :  { %1943 = vmatpush3.bf16.msra.mxu1 %v2014_v54  ;;  %v1070_v54 = vsub.s32 5, %v2287_v3 }
 0x2ea   :  { %1944 = vmatprep.subr.bf16.mxu1 %v2017_v0 }
 0x2ed   :  { %1945 = vmatpush3.bf16.msra.mxu1 %v2017_v0 }
 0x2ee   :  { %1946 = vmatprep.subr.bf16.mxu1 %v2020_v18 }
 0x2f1   :  { %1947 = vmatpush3.bf16.msra.mxu1 %v2020_v18 }
 0x2f2   :  { %1948 = vmatprep.subr.bf16.mxu1 %v2023_v6 }
 0x2f5   :  { %1949 = vmatpush3.bf16.msra.mxu1 %v2023_v6 }
 0x2f6   :  { %1950 = vmatprep.subr.bf16.mxu1 %v2026_v8 }
 0x2f9   :  { %1951 = vmatpush3.bf16.msra.mxu1 %v2026_v8 }
 0x2fa   :  { %1952 = vmatprep.subr.bf16.mxu1 %v2029_v11 }
 0x2fd   :  { %1953 = vmatpush3.bf16.msra.mxu1 %v2029_v11 }
 0x3b3   :  { %v1936_v12 = vpop.f32.mrb[8].mxu1 }
 0x3b4   :  { %v1010_v14 = vpop.f32.mrb[9].mxu1  ;;  %v1036_v30 = vmul.f32 %v1936_v12, %v1936_v12 }
 0x3b5   :  { %v1937_v25 = vpop.f32.mrb[10].mxu1  ;;  %v1034_v17 = vmul.f32 %v1010_v14, %v1010_v14 }
 0x3b6   :  { %v1013_v16 = vpop.f32.mrb[11].mxu1  ;;  %v1037_v13 = vmul.f32 %v1937_v25, %v1937_v25 }
 0x3b7   :  { %v1025_v21 = vadd.f32 %v1013_v16, %v1010_v14  ;;  %v1035_v29 = vmul.f32 %v1013_v16, %v1013_v16 }
 0x3b9   :  { %v1026_v31 = vadd.f32 %v1936_v12, %v1025_v21  ;;  %v1038_v32 = vadd.f32 %v1035_v29, %v1034_v17 }
 0x3bb   :  { %v1027_v33 = vadd.f32 %v1937_v25, %v1026_v31  ;;  %v1039_v34 = vadd.f32 %v1038_v32, %v1036_v30 }
 0x3bd   :  { %v1028_v15 = vrot.slane %v1027_v33, 4  ;;  %v1040_v35 = vadd.f32 %v1039_v34, %v1037_v13 }
 0x3bf   :  { %v1029_v38 = vadd.f32 %v1028_v15, %v1027_v33  ;;  %v1041_v28 = vrot.slane %v1040_v35, 4 }
 0x3c1   :  { %v1030_v39 = vrot.slane %v1029_v38, 2  ;;  %v1042_v41 = vadd.f32 %v1041_v28, %v1040_v35 }
 0x3c3   :  { %v1031_v42 = vadd.f32 %v1030_v39, %v1029_v38  ;;  %v1043_v44 = vrot.slane %v1042_v41, 2 }
 0x3c5   :  { %v1032_v36 = vrot.slane %v1031_v42, 1  ;;  %v1044_v45 = vadd.f32 %v1043_v44, %v1042_v41 }
 0x3c7   :  { %v1033_v40 = vadd.f32 %v1032_v36, %v1031_v42  ;;  %v1045_v46 = vrot.slane %v1044_v45, 1 }
 0x3c9   :  { %v1046_v43 = vadd.f32 %v1045_v46, %v1044_v45  ;;  %v1047_v56 = vmul.f32 0.03125, %v1033_v40 }
 0x3cb   :  { %v1048_v47 = vmul.f32 0.03125, %v1046_v43  ;;  %v1049_v48 = vmul.f32 %v1047_v56, %v1047_v56 }
 0x3cd   :  { %v1050_v50 = vsub.f32 %v1048_v47, %v1049_v48 }
 0x3cf   :  { %v1051_v58 = vmax.f32 %v1050_v50, 0.0 }
 0x3d1   :  { %v1052_v22 = vadd.f32 1e-05, %v1051_v58 }
 0x3d3   :  { %2066 = vrsqrt.f32 %v1052_v22 }
 0x3dd   :  { %v2067_v52 = vpop.eup %2066 }
 0x3de   :  { %v1054_v53 = vmul.f32 %v2067_v52, %v2289_v4 }
 0x3e0   :  { %v1055_v61 = vmul.f32 %v1054_v53, %v1047_v56  ;;  %v1063_v49 = vrot.slane %v1054_v53, %v1062_v51 }
 0x3e2   :  { %v1057_v55 = vrot.slane %v1055_v61, 7  ;;  %v1065_v57 = vmul.f32 %v1063_v49, %v1013_v16  ;;  %v1066_v0 = vmul.f32 %v1936_v12, %v1063_v49  ;;  %v1067_v23 = vmul.f32 %v1937_v25, %v1063_v49 }
 0x3e3   :  { %v1064_v1 = vmul.f32 %v1063_v49, %v1010_v14 }
 0x3e4   :  { %v1059_v18 = vsub.f32 %v2289_v4, %v1057_v55 }
 0x3e6   :  { %v1071_v2 = vrot.slane %v1059_v18, %v1070_v54 }
 0x3e8   :  { %v2449_v5 = vadd.f32 %v1071_v2, %v1065_v57  ;;  %v2451_v6 = vadd.f32 %v1071_v2, %v1067_v23  ;;  %v2453_v7 = vadd.f32 %v1071_v2, %v1064_v1  ;;  %v2455_v19 = vadd.f32 %v1071_v2, %v1066_v0 }
 0x3ea   :  { %v2458_v8 = vmul.f32 0.70710677, %v2449_v5  ;;  %v2461_v9 = vmul.f32 0.70710677, %v2451_v6  ;;  %v2464_v10 = vmul.f32 0.70710677, %v2453_v7 }
 0x3eb   :  { %v2467_v4 = vmul.f32 0.70710677, %v2455_v19 }
 0x3ec   :  { %v1085_v24 = vand.u32 2147483647, %v2458_v8  ;;  %v1087_v11 = vand.u32 2147483647, %v2461_v9  ;;  %v1084_v12 = vand.u32 2147483647, %v2464_v10 }
 0x3ed   :  { %v1086_v14 = vand.u32 2147483647, %v2467_v4  ;;  %vm1165_vm14 = vcmp.ge.f32.partialorder %v2458_v8, 0.0  ;;  %vm1167_vm15 = vcmp.ge.f32.partialorder %v2461_v9, 0.0  ;;  %vm1164_vm0 = vcmp.ge.f32.partialorder %v2464_v10, 0.0 }
 0x3ee   :  { %v1089_v25 = vmul.f32 0.3275911, %v1085_v24  ;;  %v1091_v16 = vmul.f32 0.3275911, %v1087_v11  ;;  %v1088_v17 = vmul.f32 0.3275911, %v1084_v12 }
 0x3ef   :  { %v1090_v30 = vmul.f32 0.3275911, %v1086_v14  ;;  %v1141_v13 = vsub.f32 0.0, %v1085_v24  ;;  %v1143_v33 = vsub.f32 0.0, %v1087_v11  ;;  %v1140_v35 = vsub.f32 0.0, %v1084_v12 }
 0x3f0   :  { %v1093_v21 = vadd.f32 1.0, %v1089_v25  ;;  %v1095_v29 = vadd.f32 1.0, %v1091_v16  ;;  %v1092_v31 = vadd.f32 1.0, %v1088_v17  ;;  %v1142_v42 = vsub.f32 0.0, %v1086_v14 }
 0x3f1   :  { %v1094_v32 = vadd.f32 1.0, %v1090_v30  ;;  %v1145_v15 = vmul.f32 %v1141_v13, %v1085_v24  ;;  %v1147_v28 = vmul.f32 %v1143_v33, %v1087_v11  ;;  %v1144_v40 = vmul.f32 %v1140_v35, %v1084_v12 }
 0x3f2   :  { %2068 = vrcp.f32 %v1093_v21  ;;  %v1146_v58 = vmul.f32 %v1142_v42, %v1086_v14  ;;  %vm1166_vm1 = vcmp.ge.f32.partialorder %v2467_v4, 0.0 }
 0x3f3   :  { %2070 = vrcp.f32 %v1095_v29  ;;  %v1150_v45 = vmul.f32 1.442695, %v1145_v15  ;;  %v1154_v43 = vmul.f32 1.442695, %v1147_v28  ;;  %v1148_v53 = vmul.f32 1.442695, %v1144_v40 }
 0x3f4   :  { %2072 = vrcp.f32 %v1092_v31  ;;  %v1152_v0 = vmul.f32 1.442695, %v1146_v58 }
 0x3f5   :  { %2074 = vrcp.f32 %v1094_v32 }
 0x3f6   :  { %2076 = vpow2.f32 %v1150_v45 }
 0x3f7   :  { %2078 = vpow2.f32 %v1154_v43 }
 0x3f8   :  { %2080 = vpow2.f32 %v1148_v53  ;;  %v1079_v53 = vmul.f32 0.5, %v2451_v6 }
 0x3f9   :  { %2082 = vpow2.f32 %v1152_v0 }
 0x3fc   :  { %v2069_v34 = vpop.eup %2068 }
 0x3fd   :  { %v2071_v38 = vpop.eup %2070  ;;  %v1105_v39 = vmul.f32 1.0614054, %v2069_v34 }
 0x3fe   :  { %v1107_v41 = vmul.f32 1.0614054, %v2071_v38  ;;  %v2073_v36 = vpop.eup %2072 }
 0x3ff   :  { %v1109_v44 = vadd.f32 -1.4531521, %v1105_v39  ;;  %v1104_v56 = vmul.f32 1.0614054, %v2073_v36  ;;  %v2075_v48 = vpop.eup %2074 }
 0x400   :  { %v1111_v46 = vadd.f32 -1.4531521, %v1107_v41  ;;  %v1106_v52 = vmul.f32 1.0614054, %v2075_v48  ;;  %v2077_v32 = vpop.eup %2076 }
 0x401   :  { %v1113_v47 = vmul.f32 %v2069_v34, %v1109_v44  ;;  %v1108_v22 = vadd.f32 -1.4531521, %v1104_v56  ;;  %v2079_v33 = vpop.eup %2078 }
 0x402   :  { %v1115_v50 = vmul.f32 %v2071_v38, %v1111_v46  ;;  %v1110_v55 = vadd.f32 -1.4531521, %v1106_v52  ;;  %v2081_v45 = vpop.eup %2080 }
 0x403   :  { %v1117_v51 = vadd.f32 1.4214138, %v1113_v47  ;;  %v1112_v49 = vmul.f32 %v2073_v36, %v1108_v22  ;;  %v2083_v47 = vpop.eup %2082  ;;  %v1077_v22 = vmul.f32 0.5, %v2449_v5  ;;  %v1078_v5 = vmul.f32 0.5, %v2455_v19 }
 0x404   :  { %v1119_v61 = vadd.f32 1.4214138, %v1115_v50  ;;  %v1114_v18 = vmul.f32 %v2075_v48, %v1110_v55 }
 0x405   :  { %v1121_v54 = vmul.f32 %v2069_v34, %v1117_v51  ;;  %v1116_v23 = vadd.f32 1.4214138, %v1112_v49 }
 0x406   :  { %v1123_v57 = vmul.f32 %v2071_v38, %v1119_v61  ;;  %v1118_v12 = vadd.f32 1.4214138, %v1114_v18 }
 0x407   :  { %v1125_v1 = vadd.f32 -0.28449672, %v1121_v54  ;;  %v1120_v24 = vmul.f32 %v2073_v36, %v1116_v23 }
 0x408   :  { %v1127_v2 = vadd.f32 -0.28449672, %v1123_v57  ;;  %v1122_v17 = vmul.f32 %v2075_v48, %v1118_v12  ;;  %v1076_v57 = vmul.f32 0.5, %v2453_v7 }
 0x409   :  { %v1129_v11 = vmul.f32 %v2069_v34, %v1125_v1  ;;  %v1124_v25 = vadd.f32 -0.28449672, %v1120_v24 }
 0x40a   :  { %v1131_v14 = vmul.f32 %v2071_v38, %v1127_v2  ;;  %v1126_v31 = vadd.f32 -0.28449672, %v1122_v17 }
 0x40b   :  { %v1133_v16 = vadd.f32 0.2548296, %v1129_v11  ;;  %v1128_v29 = vmul.f32 %v2073_v36, %v1124_v25 }
 0x40c   :  { %v1135_v21 = vadd.f32 0.2548296, %v1131_v14  ;;  %v1130_v28 = vmul.f32 %v2075_v48, %v1126_v31 }
 0x40d   :  { %v1137_v30 = vmul.f32 %v2069_v34, %v1133_v16  ;;  %v1132_v15 = vadd.f32 0.2548296, %v1128_v29 }
 0x40e   :  { %v1139_v13 = vmul.f32 %v2071_v38, %v1135_v21  ;;  %v1134_v44 = vadd.f32 0.2548296, %v1130_v28 }
 0x40f   :  { %v1157_v35 = vmul.f32 %v2077_v32, %v1137_v30  ;;  %v1136_v41 = vmul.f32 %v2073_v36, %v1132_v15 }
 0x410   :  { %v1159_v39 = vmul.f32 %v2079_v33, %v1139_v13  ;;  %v1138_v56 = vmul.f32 %v2075_v48, %v1134_v44 }
 0x411   :  { %v1161_v42 = vsub.f32 1.0, %v1157_v35  ;;  %v1156_v46 = vmul.f32 %v2081_v45, %v1136_v41 }
 0x412   :  { %v1163_v40 = vsub.f32 1.0, %v1159_v39  ;;  %v1158_v38 = vmul.f32 %v2083_v47, %v1138_v56 }
 0x413   :  { %v1169_v43 = vsub.f32 0.0, %v1161_v42  ;;  %v1160_v50 = vsub.f32 1.0, %v1156_v46 }
 0x414   :  { %v1171_v34 = vsub.f32 0.0, %v1163_v40  ;;  %v1162_v49 = vsub.f32 1.0, %v1158_v38 }
 0x415   :  { %v1173_v58 = vsel %vm1165_vm14, %v1161_v42, %v1169_v43  ;;  %v1168_v52 = vsub.f32 0.0, %v1160_v50 }
 0x416   :  { %v1177_v51 = vadd.f32 1.0, %v1173_v58  ;;  %v1175_v36 = vsel %vm1167_vm15, %v1163_v40, %v1171_v34  ;;  %v1170_v55 = vsub.f32 0.0, %v1162_v49 }
 0x417   :  { %v1179_v61 = vadd.f32 1.0, %v1175_v36  ;;  %v1172_v54 = vsel %vm1164_vm0, %v1160_v50, %v1168_v52 }
 0x418   :  { %v1181_v48 = vmul.f32 %v1177_v51, %v1077_v22  ;;  %v1176_v0 = vadd.f32 1.0, %v1172_v54  ;;  %v1174_v23 = vsel %vm1166_vm1, %v1162_v49, %v1170_v55 }
 0x419   :  { %v1183_v8 = vmul.f32 %v1179_v61, %v1079_v53  ;;  %v1178_v6 = vadd.f32 1.0, %v1174_v23 }
 0x41a   :  { %v1185_v9 = vrot.slane %v1181_v48, 7  ;;  %v1180_v1 = vmul.f32 %v1176_v0, %v1076_v57  ;;  %v1197_v2 = vrot.slane %v1181_v48, 1 }
 0x41b   :  { %v1187_v18 = vrot.slane %v1183_v8, 7  ;;  %v1199_v24 = vrot.slane %v1183_v8, 1  ;;  %v1182_v12 = vmul.f32 %v1178_v6, %v1078_v5 }
 0x41c   :  { %v1209_v11 = vpack.c.bf16 %v1181_v48, %v1180_v1  ;;  %v1184_v10 = vrot.slane %v1180_v1, 7  ;;  %v1196_v14 = vrot.slane %v1180_v1, 1 }
 0x41d   :  { %v1198_v25 = vrot.slane %v1182_v12, 1  ;;  %v1212_v17 = vpack.c.bf16 %v1183_v8, %v1182_v12  ;;  %v1186_v29 = vrot.slane %v1182_v12, 7 }
 0x41e   :  { %1438 = vmatprep.mubr.bf16.mxu0 %v1209_v11  ;;  %v1190_v7 = vsel %vm433_vm2, %v1184_v10, %v1185_v9  ;;  %v1191_v4 = vsel %vm433_vm2, %v1187_v18, %v1184_v10  ;;  %v1202_v19 = vsel %vm446_vm5, %v1196_v14, %v1197_v2  ;;  %v1203_v21 = vsel %vm446_vm5, %v1199_v24, %v1196_v14 }
 0x41f   :  { %v1192_v16 = vmul.f32 %v2343_v20, %v1191_v4  ;;  %v1201_v30 = vsel %vm446_vm5, %v1197_v2, %v1198_v25  ;;  %v1200_v31 = vsel %vm446_vm5, %v1198_v25, %v1199_v24  ;;  %v1207_v32 = vmul.f32 %v2351_v26, %v1203_v21 }
 0x420   :  { %v1205_v33 = vmul.f32 %v2353_v27, %v1201_v30  ;;  %v1188_v15 = vsel %vm433_vm2, %v1186_v29, %v1187_v18  ;;  %v1189_v20 = vsel %vm433_vm2, %v1185_v9, %v1186_v29  ;;  %v1541_v30 = vsub.s32 6, %v2287_v3 }
 0x421   :  { %v1208_v13 = vpack.c.bf16 %v1190_v7, %v1192_v16  ;;  %v1213_v35 = vpack.c.bf16 %v1207_v32, %v1200_v31  ;;  %v1194_v28 = vmul.f32 %v2365_v37, %v1189_v20  ;;  %v2102_v32 = vld [vmem:[#allocation6] sm:$0xff]  ;;  %v1549_v20 = vsub.s32 7, %v2287_v3 }
 0x422   :  { %v1210_v39 = vpack.c.bf16 %v1205_v33, %v1202_v19 }
 0x423   :  { %1439 = vmatmul.mubr.bf16.vlgmr.msra.gmra.mrb[8].mxu0 %v1208_v13  ;;  %v1211_v41 = vpack.c.bf16 %v1188_v15, %v1194_v28 }
 0x424   :  { %1446 = vmatprep.mubr.bf16.mxu0 %v1212_v17  ;;  %1954 = vmatprep.mubr.bf16.mxu1 %v1210_v39 }
 0x425   :  { %1955 = vmatmul.mubr.bf16.vlgmr.msra.gmra.mrb[12].mxu1 %v1213_v35 }
 0x42b   :  { %1447 = vmatmul.mubr.bf16.gmra.mrb[12].mxu0 %v1211_v41 }
 0x4f6   :  { %v1856_v26 = vpop.f32.mrb[8].mxu0 }
 0x4f7   :  { %v1857_v42 = vpop.f32.mrb[9].mxu0 }
 0x4f8   :  { %v1858_v44 = vadd.f32 %v1857_v42, %v1856_v26  ;;  %v1859_v27 = vpop.f32.mrb[10].mxu0  ;;  %v1956_v45 = vpop.f32.mrb[12].mxu1 }
 0x4f9   :  { %v1860_v40 = vpop.f32.mrb[11].mxu0  ;;  %v1489_v46 = vpop.f32.mrb[13].mxu1 }
 0x4fa   :  { %v1861_v43 = vadd.f32 %v1860_v40, %v1859_v27  ;;  %v1490_v56 = vadd.f32 %v1858_v44, %v1489_v46  ;;  %v1957_v47 = vpop.f32.mrb[14].mxu1 }
 0x4fb   :  { %v1492_v34 = vpop.f32.mrb[15].mxu1 }
 0x4fc   :  { %v1493_v50 = vadd.f32 %v1861_v43, %v1492_v34  ;;  %v1513_v58 = vmul.f32 %v1490_v56, %v1490_v56 }
 0x4fe   :  { %v1862_v37 = vpop.f32.mrb[12].mxu0  ;;  %v1504_v38 = vadd.f32 %v1493_v50, %v1490_v56  ;;  %v1514_v22 = vmul.f32 %v1493_v50, %v1493_v50 }
 0x4ff   :  { %v1863_v51 = vpop.f32.mrb[13].mxu0 }
 0x500   :  { %v1864_v36 = vadd.f32 %v1863_v51, %v1862_v37  ;;  %v1865_v52 = vpop.f32.mrb[14].mxu0  ;;  %v1517_v53 = vadd.f32 %v1514_v22, %v1513_v58 }
 0x501   :  { %v1866_v61 = vpop.f32.mrb[15].mxu0 }
 0x502   :  { %v1498_v49 = vadd.f32 %v1956_v45, %v1864_v36  ;;  %v1867_v48 = vadd.f32 %v1866_v61, %v1865_v52 }
 0x504   :  { %v1505_v54 = vadd.f32 %v1504_v38, %v1498_v49  ;;  %v1515_v8 = vmul.f32 %v1498_v49, %v1498_v49  ;;  %v1501_v55 = vadd.f32 %v1957_v47, %v1867_v48 }
 0x506   :  { %v1518_v57 = vadd.f32 %v1517_v53, %v1515_v8  ;;  %v1506_v0 = vadd.f32 %v1505_v54, %v1501_v55  ;;  %v1516_v9 = vmul.f32 %v1501_v55, %v1501_v55 }
 0x508   :  { %v1507_v5 = vrot.slane %v1506_v0, 4  ;;  %v1519_v23 = vadd.f32 %v1518_v57, %v1516_v9 }
 0x50a   :  { %v1508_v1 = vadd.f32 %v1507_v5, %v1506_v0  ;;  %v1520_v18 = vrot.slane %v1519_v23, 4 }
 0x50c   :  { %v1509_v6 = vrot.slane %v1508_v1, 2  ;;  %v1521_v2 = vadd.f32 %v1520_v18, %v1519_v23 }
 0x50e   :  { %v1510_v24 = vadd.f32 %v1509_v6, %v1508_v1  ;;  %v1522_v11 = vrot.slane %v1521_v2, 2 }
 0x510   :  { %v1511_v10 = vrot.slane %v1510_v24, 1  ;;  %v1523_v12 = vadd.f32 %v1522_v11, %v1521_v2 }
 0x512   :  { %v1512_v14 = vadd.f32 %v1511_v10, %v1510_v24  ;;  %v1524_v7 = vrot.slane %v1523_v12, 1 }
 0x514   :  { %v1525_v4 = vadd.f32 %v1524_v7, %v1523_v12  ;;  %v1526_v25 = vmul.f32 0.03125, %v1512_v14 }
 0x516   :  { %v1527_v19 = vmul.f32 0.03125, %v1525_v4  ;;  %v1528_v16 = vmul.f32 %v1526_v25, %v1526_v25 }
 0x518   :  { %v1529_v17 = vsub.f32 %v1527_v19, %v1528_v16 }
 0x51a   :  { %v1530_v21 = vmax.f32 %v1529_v17, 0.0 }
 0x51c   :  { %v1531_v29 = vadd.f32 1e-05, %v1530_v21 }
 0x51e   :  { %2084 = vrsqrt.f32 %v1531_v29 }
 0x528   :  { %v2085_v31 = vpop.eup %2084 }
 0x529   :  { %v1533_v13 = vmul.f32 %v2102_v32, %v2085_v31 }
 0x52b   :  { %v1534_v33 = vmul.f32 %v1533_v13, %v1526_v25  ;;  %v1542_v15 = vrot.slane %v1533_v13, %v1541_v30 }
 0x52d   :  { %v1536_v35 = vrot.slane %v1534_v33, 7  ;;  %v1543_v28 = vmul.f32 %v1542_v15, %v1490_v56  ;;  %v1544_v39 = vmul.f32 %v1542_v15, %v1493_v50  ;;  %v1545_v41 = vmul.f32 %v1542_v15, %v1498_v49 }
 0x52e   :  { %v1546_v26 = vmul.f32 %v1542_v15, %v1501_v55 }
 0x52f   :  { %v1538_v42 = vsub.f32 %v2102_v32, %v1536_v35 }
 0x531   :  { %v1550_v44 = vrot.slane %v1538_v42, %v1549_v20 }
 0x533   :  { %v2503_v27 = vadd.f32 %v1550_v44, %v1543_v28  ;;  %v2505_v45 = vadd.f32 %v1550_v44, %v1544_v39  ;;  %v2507_v40 = vadd.f32 %v1550_v44, %v1545_v41  ;;  %v2509_v46 = vadd.f32 %v1550_v44, %v1546_v26 }
 0x535   :  { %v2512_v43 = vmul.f32 0.70710677, %v2503_v27  ;;  %v2515_v3 = vmul.f32 0.70710677, %v2505_v45  ;;  %v2518_v56 = vmul.f32 0.70710677, %v2507_v40 }
 0x536   :  { %v2521_v47 = vmul.f32 0.70710677, %v2509_v46 }
 0x537   :  { %v1563_v34 = vand.u32 2147483647, %v2512_v43  ;;  %v1564_v50 = vand.u32 2147483647, %v2515_v3  ;;  %v1565_v37 = vand.u32 2147483647, %v2518_v56 }
 0x538   :  { %v1566_v58 = vand.u32 2147483647, %v2521_v47  ;;  %vm1643_vm2 = vcmp.ge.f32.partialorder %v2512_v43, 0.0  ;;  %vm1644_vm3 = vcmp.ge.f32.partialorder %v2515_v3, 0.0  ;;  %vm1645_vm4 = vcmp.ge.f32.partialorder %v2518_v56, 0.0 }
 0x539   :  { %v1567_v38 = vmul.f32 0.3275911, %v1563_v34  ;;  %v1568_v22 = vmul.f32 0.3275911, %v1564_v50  ;;  %v1569_v51 = vmul.f32 0.3275911, %v1565_v37 }
 0x53a   :  { %v1570_v36 = vmul.f32 0.3275911, %v1566_v58  ;;  %v1619_v48 = vsub.f32 0.0, %v1563_v34  ;;  %v1620_v54 = vsub.f32 0.0, %v1564_v50  ;;  %v1621_v8 = vsub.f32 0.0, %v1565_v37 }
 0x53b   :  { %v1571_v52 = vadd.f32 1.0, %v1567_v38  ;;  %v1572_v53 = vadd.f32 1.0, %v1568_v22  ;;  %v1573_v61 = vadd.f32 1.0, %v1569_v51  ;;  %v1622_v55 = vsub.f32 0.0, %v1566_v58 }
 0x53c   :  { %v1574_v49 = vadd.f32 1.0, %v1570_v36  ;;  %v1623_v0 = vmul.f32 %v1619_v48, %v1563_v34  ;;  %v1624_v23 = vmul.f32 %v1620_v54, %v1564_v50  ;;  %v1625_v6 = vmul.f32 %v1621_v8, %v1565_v37 }
 0x53d   :  { %2086 = vrcp.f32 %v1571_v52  ;;  %v1626_v10 = vmul.f32 %v1622_v55, %v1566_v58  ;;  %vm1646_vm5 = vcmp.ge.f32.partialorder %v2521_v47, 0.0  ;;  %v1557_v43 = vmul.f32 0.5, %v2507_v40 }
 0x53e   :  { %2088 = vrcp.f32 %v1572_v53  ;;  %v1627_v7 = vmul.f32 1.442695, %v1623_v0  ;;  %v1629_v19 = vmul.f32 1.442695, %v1624_v23  ;;  %v1631_v21 = vmul.f32 1.442695, %v1625_v6 }
 0x53f   :  { %2090 = vrcp.f32 %v1573_v61  ;;  %v1633_v31 = vmul.f32 1.442695, %v1626_v10  ;;  %v1558_v3 = vmul.f32 0.5, %v2509_v46 }
 0x540   :  { %2092 = vrcp.f32 %v1574_v49 }
 0x541   :  { %2094 = vpow2.f32 %v1627_v7 }
 0x542   :  { %2096 = vpow2.f32 %v1629_v19 }
 0x543   :  { %2098 = vpow2.f32 %v1631_v21 }
 0x544   :  { %2100 = vpow2.f32 %v1633_v31 }
 0x547   :  { %v2087_v57 = vpop.eup %2086 }
 0x548   :  { %v2089_v9 = vpop.eup %2088  ;;  %v1583_v5 = vmul.f32 1.0614054, %v2087_v57 }
 0x549   :  { %v2091_v1 = vpop.eup %2090  ;;  %v1584_v18 = vmul.f32 1.0614054, %v2089_v9 }
 0x54a   :  { %v2093_v2 = vpop.eup %2092  ;;  %v1585_v24 = vmul.f32 1.0614054, %v2091_v1  ;;  %v1587_v11 = vadd.f32 -1.4531521, %v1583_v5 }
 0x54b   :  { %v1586_v12 = vmul.f32 1.0614054, %v2093_v2  ;;  %v1588_v14 = vadd.f32 -1.4531521, %v1584_v18  ;;  %v2095_v52 = vpop.eup %2094 }
 0x54c   :  { %v1589_v4 = vadd.f32 -1.4531521, %v1585_v24  ;;  %v1591_v25 = vmul.f32 %v2087_v57, %v1587_v11  ;;  %v2097_v49 = vpop.eup %2096 }
 0x54d   :  { %v1590_v16 = vadd.f32 -1.4531521, %v1586_v12  ;;  %v1592_v17 = vmul.f32 %v2089_v9, %v1588_v14  ;;  %v2099_v8 = vpop.eup %2098  ;;  %v1555_v14 = vmul.f32 0.5, %v2503_v27 }
 0x54e   :  { %v1593_v29 = vmul.f32 %v2091_v1, %v1589_v4  ;;  %v1595_v30 = vadd.f32 1.4214138, %v1591_v25  ;;  %v2101_v5 = vpop.eup %2100  ;;  %v1556_v25 = vmul.f32 0.5, %v2505_v45 }
 0x54f   :  { %v1594_v32 = vmul.f32 %v2093_v2, %v1590_v16  ;;  %v1596_v13 = vadd.f32 1.4214138, %v1592_v17 }
 0x550   :  { %v1597_v33 = vadd.f32 1.4214138, %v1593_v29  ;;  %v1599_v15 = vmul.f32 %v2087_v57, %v1595_v30 }
 0x551   :  { %v1598_v20 = vadd.f32 1.4214138, %v1594_v32  ;;  %v1600_v35 = vmul.f32 %v2089_v9, %v1596_v13 }
 0x552   :  { %v1601_v28 = vmul.f32 %v2091_v1, %v1597_v33  ;;  %v1603_v39 = vadd.f32 -0.28449672, %v1599_v15 }
 0x553   :  { %v1602_v41 = vmul.f32 %v2093_v2, %v1598_v20  ;;  %v1604_v26 = vadd.f32 -0.28449672, %v1600_v35 }
 0x554   :  { %v1605_v42 = vadd.f32 -0.28449672, %v1601_v28  ;;  %v1607_v44 = vmul.f32 %v2087_v57, %v1603_v39 }
 0x555   :  { %v1606_v34 = vadd.f32 -0.28449672, %v1602_v41  ;;  %v1608_v50 = vmul.f32 %v2089_v9, %v1604_v26 }
 0x556   :  { %v1609_v37 = vmul.f32 %v2091_v1, %v1605_v42  ;;  %v1611_v58 = vadd.f32 0.2548296, %v1607_v44 }
 0x557   :  { %v1610_v38 = vmul.f32 %v2093_v2, %v1606_v34  ;;  %v1612_v22 = vadd.f32 0.2548296, %v1608_v50 }
 0x558   :  { %v1613_v51 = vadd.f32 0.2548296, %v1609_v37  ;;  %v1615_v36 = vmul.f32 %v2087_v57, %v1611_v58 }
 0x559   :  { %v1614_v53 = vadd.f32 0.2548296, %v1610_v38  ;;  %v1616_v61 = vmul.f32 %v2089_v9, %v1612_v22 }
 0x55a   :  { %v1617_v48 = vmul.f32 %v2091_v1, %v1613_v51  ;;  %v1635_v54 = vmul.f32 %v2095_v52, %v1615_v36 }
 0x55b   :  { %v1618_v55 = vmul.f32 %v2093_v2, %v1614_v53  ;;  %v1636_v0 = vmul.f32 %v2097_v49, %v1616_v61 }
 0x55c   :  { %v1637_v23 = vmul.f32 %v2099_v8, %v1617_v48  ;;  %v1639_v18 = vsub.f32 1.0, %v1635_v54 }
 0x55d   :  { %v1638_v6 = vmul.f32 %v2101_v5, %v1618_v55  ;;  %v1640_v24 = vsub.f32 1.0, %v1636_v0 }
 0x55e   :  { %v1641_v11 = vsub.f32 1.0, %v1637_v23  ;;  %v1647_v10 = vsub.f32 0.0, %v1639_v18 }
 0x55f   :  { %v1642_v12 = vsub.f32 1.0, %v1638_v6  ;;  %v1648_v57 = vsub.f32 0.0, %v1640_v24 }
 0x560   :  { %v1649_v9 = vsub.f32 0.0, %v1641_v11  ;;  %v1651_v1 = vsel %vm1643_vm2, %v1639_v18, %v1647_v10 }
 0x561   :  { %v1650_v2 = vsub.f32 0.0, %v1642_v12  ;;  %v1652_v7 = vsel %vm1644_vm3, %v1640_v24, %v1648_v57  ;;  %v1655_v4 = vadd.f32 1.0, %v1651_v1 }
 0x562   :  { %v1653_v19 = vsel %vm1645_vm4, %v1641_v11, %v1649_v9  ;;  %v1656_v16 = vadd.f32 1.0, %v1652_v7 }
 0x563   :  { %v1654_v17 = vsel %vm1646_vm5, %v1642_v12, %v1650_v2  ;;  %v1657_v21 = vadd.f32 1.0, %v1653_v19  ;;  %v1659_v27 = vmul.f32 %v1655_v4, %v1555_v14 }
 0x564   :  { %v1658_v29 = vadd.f32 1.0, %v1654_v17  ;;  %v1660_v30 = vmul.f32 %v1656_v16, %v1556_v25 }
 0x565   :  { %v1661_v31 = vmul.f32 %v1657_v21, %v1557_v43  ;;  %v1663_v56 = vadd.f32 %v1659_v27, %v2430_v62 }
 0x566   :  { %v1662_v32 = vmul.f32 %v1658_v29, %v1558_v3  ;;  %v1664_v13 = vadd.f32 %v1660_v30, %v2434_v63 }
 0x567   :  { %v1665_v45 = vadd.f32 %v1661_v31, %v2441_v60 }
 0x568   :  { %v1666_v47 = vadd.f32 %v1662_v32, %v2436_v59  ;;  %v1774_v33 = vpack.c.bf16 %v1664_v13, %v1663_v56 }
 0x56a   :  { %1775 = vst [vmem:[%s2551_s6] sm:$0xff] %v1774_v33   ;;  %v1779_v40 = vpack.c.bf16 %v1666_v47, %v1665_v45 }
 0x56c   :  { %1781 = vst [vmem:[%s2551_s6 + $0x8] sm:$0xff] %v1779_v40  }
 0x56d   :  { %1691 = vsyncpa [#allocation3], 1 }
 0x56e   :  { %1692 = vsyncpa [#allocation5], 1 }

// kernel: encoder_forward.7
= control target key start
LH: loop header
LB: loop body
LE: loop exit
PB: predicated region body
PF: predicated region fallthrough
CT: control target
= control target key end

     0   :  { %v1925_v22 = vmov 1966171168   ;;  %v286_v24 = vlaneseq  ;;  %s2376_s1 = inlined_call_operand.vmem [shape: bf16[2048,128], index: 1, kind: input, shape index: {}]   ;;  %s2377_s0 = inlined_call_operand.vmem [shape: bf16[2,2048], index: 0, kind: input, shape index: {}]   ;;  %s2378_s2 = inlined_call_operand.vmem [shape: f32[1,128], index: 2, kind: input, shape index: {}]   ;;  %s2379_s3 = inlined_call_operand.vmem [shape: f32[2,128], index: 3, kind: output, shape index: {}]  }
   0x1   :  { %v1795_v0 = vld [vmem:[%s2376_s1 + $0x40] sm:$0xff]   ;;  %v1799_v4 = vld [vmem:[%s2376_s1 + $0x48] sm:$0xff]   ;;  %v1803_v8 = vld [vmem:[%s2376_s1 + $0x50] sm:$0xff]   ;;  %v284_v23 = vunpack.c.l.s4 %v1925_v22 }
   0x2   :  { %v1796_v1 = vld [vmem:[%s2376_s1 + $0xc0] sm:$0xff]   ;;  %1618 = vmatprep.subr.bf16.mxu0 %v1795_v0  ;;  %v1800_v5 = vld [vmem:[%s2376_s1 + $0xc8] sm:$0xff]   ;;  %v1804_v9 = vld [vmem:[%s2376_s1 + $0xd0] sm:$0xff]   ;;  %v287_v30 = vshrl.u32 %v286_v24, 7 }
   0x3   :  { %v1797_v2 = vld [vmem:[%s2376_s1] sm:$0xff]   ;;  %1640 = vmatprep.subr.bf16.mxu1 %v1796_v1  ;;  %v1801_v6 = vld [vmem:[%s2376_s1 + $0x8] sm:$0xff]   ;;  %v1805_v10 = vld [vmem:[%s2376_s1 + $0x10] sm:$0xff]   ;;  %v285_v29 = vunpack.c.0.s8 %v284_v23 }
   0x4   :  { %v1798_v3 = vld [vmem:[%s2376_s1 + $0x80] sm:$0xff]   ;;  %1619 = vmatpush3.bf16.msra.mxu0 %v1797_v2  ;;  %v1802_v7 = vld [vmem:[%s2376_s1 + $0x88] sm:$0xff]   ;;  %v1806_v11 = vld [vmem:[%s2376_s1 + $0x90] sm:$0xff]  }
   0x5   :  { %1641 = vmatpush3.bf16.msra.mxu1 %v1798_v3  ;;  %1620 = vmatprep.subr.bf16.mxu0 %v1799_v4  ;;  %v1807_v12 = vld [vmem:[%s2376_s1 + $0x58] sm:$0xff]   ;;  %v1811_v16 = vld [vmem:[%s2376_s1 + $0x60] sm:$0xff]   ;;  %v1815_v20 = vld [vmem:[%s2376_s1 + $0x68] sm:$0xff]   ;;  %v2036_v35 = vsub.s32 %v285_v29, %v287_v30 }
   0x6   :  { %1642 = vmatprep.subr.bf16.mxu1 %v1800_v5  ;;  %v1808_v13 = vld [vmem:[%s2376_s1 + $0xd8] sm:$0xff]   ;;  %v1812_v17 = vld [vmem:[%s2376_s1 + $0xe0] sm:$0xff]   ;;  %v1816_v21 = vld [vmem:[%s2376_s1 + $0xe8] sm:$0xff]  }
   0x7   :  { %v1809_v14 = vld [vmem:[%s2376_s1 + $0x18] sm:$0xff]   ;;  %v1813_v18 = vld [vmem:[%s2376_s1 + $0x20] sm:$0xff]   ;;  %v1817_v25 = vld [vmem:[%s2376_s1 + $0x28] sm:$0xff]  }
   0x8   :  { %1621 = vmatpush3.bf16.msra.mxu0 %v1801_v6  ;;  %v1810_v15 = vld [vmem:[%s2376_s1 + $0x98] sm:$0xff]   ;;  %v1814_v19 = vld [vmem:[%s2376_s1 + $0xa0] sm:$0xff]   ;;  %v1818_v26 = vld [vmem:[%s2376_s1 + $0xa8] sm:$0xff]  }
   0x9   :  { %1643 = vmatpush3.bf16.msra.mxu1 %v1802_v7  ;;  %1622 = vmatprep.subr.bf16.mxu0 %v1803_v8  ;;  %v1819_v27 = vld [vmem:[%s2376_s1 + $0x70] sm:$0xff]   ;;  %v1823_v33 = vld [vmem:[%s2376_s1 + $0x78] sm:$0xff]   ;;  %v15_v38 = vld [vmem:[%s2377_s0] sm:$0xff] }
   0xa   :  { %1644 = vmatprep.subr.bf16.mxu1 %v1804_v9  ;;  %v1820_v28 = vld [vmem:[%s2376_s1 + $0xf0] sm:$0xff]   ;;  %v1824_v34 = vld [vmem:[%s2376_s1 + $0xf8] sm:$0xff]   ;;  %v282_v39 = vcombine.high %v15_v38, %v15_v38  ;;  %v289_v40 = vrot.slane %v15_v38, %v2036_v35  ;;  %v1829_v41 = vld [vmem:[%s2376_s1 + $0x140] sm:$0xff]  }
   0xb   :  { %v1821_v31 = vld [vmem:[%s2376_s1 + $0x30] sm:$0xff]   ;;  %v1825_v36 = vld [vmem:[%s2376_s1 + $0x38] sm:$0xff]   ;;  %v1830_v42 = vld [vmem:[%s2376_s1 + $0x1c0] sm:$0xff]  }
   0xc   :  { %1623 = vmatpush3.bf16.msra.mxu0 %v1805_v10  ;;  %v1822_v32 = vld [vmem:[%s2376_s1 + $0xb0] sm:$0xff]   ;;  %v1826_v37 = vld [vmem:[%s2376_s1 + $0xb8] sm:$0xff]   ;;  %v297_v43 = vcombine.high %v289_v40, %v289_v40  ;;  %v305_v44 = vrot.slane %v289_v40, %v2036_v35  ;;  %v2056_v45 = vrot.slane %v282_v39, %v2036_v35  ;;  %v1831_v47 = vld [vmem:[%s2376_s1 + $0x100] sm:$0xff]  }
   0xd   :  { %1645 = vmatpush3.bf16.msra.mxu1 %v1806_v11  ;;  %1624 = vmatprep.subr.bf16.mxu0 %v1807_v12  ;;  %v1833_v50 = vld [vmem:[%s2376_s1 + $0x148] sm:$0xff]   ;;  %v1832_v52 = vld [vmem:[%s2376_s1 + $0x180] sm:$0xff]   ;;  %v1837_v57 = vld [vmem:[%s2376_s1 + $0x150] sm:$0xff]  }
   0xe   :  { %1646 = vmatprep.subr.bf16.mxu1 %v1808_v13  ;;  %v319_v46 = vrot.slane %v297_v43, %v2036_v35  ;;  %v298_v48 = vcombine.high %v2056_v45, %v2056_v45  ;;  %v327_v49 = vcombine.high %v305_v44, %v305_v44  ;;  %v1834_v54 = vld [vmem:[%s2376_s1 + $0x1c8] sm:$0xff]   ;;  %v1838_v59 = vld [vmem:[%s2376_s1 + $0x1d0] sm:$0xff]   ;;  %v1841_v61 = vld [vmem:[%s2376_s1 + $0x158] sm:$0xff]  }
   0xf   :  { %v1835_v55 = vld [vmem:[%s2376_s1 + $0x108] sm:$0xff]   ;;  %v1839_v60 = vld [vmem:[%s2376_s1 + $0x110] sm:$0xff]   ;;  %v1842_v63 = vld [vmem:[%s2376_s1 + $0x1d8] sm:$0xff]  }
  0x10   :  { %1625 = vmatpush3.bf16.msra.mxu0 %v1809_v14  ;;  %1196 = vmatprep.mubr.bf16.mxu0 %v319_v46  ;;  %v329_v51 = vcombine.high %v319_v46, %v319_v46  ;;  %v326_v53 = vrot.slane %v298_v48, %v2036_v35  ;;  %v1836_v58 = vld [vmem:[%s2376_s1 + $0x188] sm:$0xff]   ;;  %v1840_v62 = vld [vmem:[%s2376_s1 + $0x190] sm:$0xff]   ;;  %v1843_v0 = vld [vmem:[%s2376_s1 + $0x118] sm:$0xff]  }
  0x11   :  { %1647 = vmatpush3.bf16.msra.mxu1 %v1810_v15  ;;  %1626 = vmatprep.subr.bf16.mxu0 %v1811_v16  ;;  %v1845_v1 = vld [vmem:[%s2376_s1 + $0x160] sm:$0xff]   ;;  %v1844_v2 = vld [vmem:[%s2376_s1 + $0x198] sm:$0xff]   ;;  %v2116_v5 = vld [vmem:[%s2377_s0 + $0x8] sm:$0xff] }
  0x12   :  { %1648 = vmatprep.subr.bf16.mxu1 %v1812_v17  ;;  %1236 = vmatprep.mubr.bf16.mxu1 %v329_v51  ;;  %v330_v56 = vcombine.high %v326_v53, %v326_v53  ;;  %v1846_v3 = vld [vmem:[%s2376_s1 + $0x1e0] sm:$0xff]   ;;  %v1849_v6 = vld [vmem:[%s2376_s1 + $0x168] sm:$0xff]   ;;  %v1853_v10 = vld [vmem:[%s2376_s1 + $0x170] sm:$0xff]   ;;  %v2138_v12 = vrot.slane %v2116_v5, %v2036_v35  ;;  %v331_v46 = vcombine.high %v2116_v5, %v2116_v5 }
  0x13   :  { %v1847_v4 = vld [vmem:[%s2376_s1 + $0x120] sm:$0xff]   ;;  %v1850_v8 = vld [vmem:[%s2376_s1 + $0x1e8] sm:$0xff]   ;;  %v1854_v13 = vld [vmem:[%s2376_s1 + $0x1f0] sm:$0xff]  }
  0x14   :  { %1627 = vmatpush3.bf16.msra.mxu0 %v1813_v18  ;;  %v1848_v7 = vld [vmem:[%s2376_s1 + $0x1a0] sm:$0xff]   ;;  %v1851_v9 = vld [vmem:[%s2376_s1 + $0x128] sm:$0xff]   ;;  %v1855_v14 = vld [vmem:[%s2376_s1 + $0x130] sm:$0xff]   ;;  %v346_v17 = vcombine.high %v2138_v12, %v2138_v12 }
  0x15   :  { %1649 = vmatpush3.bf16.msra.mxu1 %v1814_v19  ;;  %1628 = vmatprep.subr.bf16.mxu0 %v1815_v20  ;;  %v1852_v11 = vld [vmem:[%s2376_s1 + $0x1a8] sm:$0xff]   ;;  %v1857_v15 = vld [vmem:[%s2376_s1 + $0x178] sm:$0xff]   ;;  %v1856_v16 = vld [vmem:[%s2376_s1 + $0x1b0] sm:$0xff]   ;;  %v312_v20 = vrot.slane %v2056_v45, %v2036_v35 }
  0x16   :  { %1650 = vmatprep.subr.bf16.mxu1 %v1816_v21  ;;  %v1858_v18 = vld [vmem:[%s2376_s1 + $0x1f8] sm:$0xff]   ;;  %v1861_v21 = vld [vmem:[%s2376_s1 + $0x240] sm:$0xff]   ;;  %v368_v23 = vrot.slane %v346_v17, %v2036_v35  ;;  %v1866_v30 = vld [vmem:[%s2376_s1 + $0x2c8] sm:$0xff]  }
  0x17   :  { %v1859_v19 = vld [vmem:[%s2376_s1 + $0x138] sm:$0xff]   ;;  %v1862_v24 = vld [vmem:[%s2376_s1 + $0x2c0] sm:$0xff]   ;;  %v1872_v38 = vld [vmem:[%s2376_s1 + $0x290] sm:$0xff]  }
  0x18   :  { %1629 = vmatpush3.bf16.msra.mxu0 %v1817_v25  ;;  %v1860_v22 = vld [vmem:[%s2376_s1 + $0x1b8] sm:$0xff]   ;;  %v1863_v25 = vld [vmem:[%s2376_s1 + $0x200] sm:$0xff]   ;;  %v378_v29 = vcombine.high %v368_v23, %v368_v23  ;;  %v1881_v45 = vld [vmem:[%s2376_s1 + $0x268] sm:$0xff]  }
  0x19   :  { %1651 = vmatpush3.bf16.msra.mxu1 %v1818_v26  ;;  %1630 = vmatprep.subr.bf16.mxu0 %v1819_v27  ;;  %v328_v26 = vcombine.high %v312_v20, %v312_v20  ;;  %v1865_v27 = vld [vmem:[%s2376_s1 + $0x248] sm:$0xff]   ;;  %v1874_v39 = vld [vmem:[%s2376_s1 + $0x2d8] sm:$0xff]   ;;  %v1878_v43 = vld [vmem:[%s2376_s1 + $0x2e0] sm:$0xff]  }
  0x1a   :  { %1652 = vmatprep.subr.bf16.mxu1 %v1820_v28  ;;  %v1864_v28 = vld [vmem:[%s2376_s1 + $0x280] sm:$0xff]   ;;  %v1875_v40 = vld [vmem:[%s2376_s1 + $0x218] sm:$0xff]   ;;  %v1882_v48 = vld [vmem:[%s2376_s1 + $0x2e8] sm:$0xff]  }
  0x1b   :  { %v1884_v51 = vld [vmem:[%s2376_s1 + $0x2a8] sm:$0xff]   ;;  %v1908_v17 = vld [vmem:[%s2376_s1 + $0x398] sm:$0xff]  }
  0x1c   :  { %1631 = vmatpush3.bf16.msra.mxu0 %v1821_v31  ;;  %v1867_v31 = vld [vmem:[%s2376_s1 + $0x208] sm:$0xff]  }
  0x1d   :  { %1653 = vmatpush3.bf16.msra.mxu1 %v1822_v32  ;;  %1632 = vmatprep.subr.bf16.mxu0 %v1823_v33  ;;  %v1869_v32 = vld [vmem:[%s2376_s1 + $0x250] sm:$0xff]   ;;  %v1868_v33 = vld [vmem:[%s2376_s1 + $0x288] sm:$0xff]  }
  0x1e   :  { %1654 = vmatprep.subr.bf16.mxu1 %v1824_v34  ;;  %v1870_v34 = vld [vmem:[%s2376_s1 + $0x2d0] sm:$0xff]  }
  0x20   :  { %1633 = vmatpush3.bf16.msra.mxu0 %v1825_v36  ;;  %v1871_v36 = vld [vmem:[%s2376_s1 + $0x210] sm:$0xff]  }
  0x21   :  { %1655 = vmatpush3.bf16.msra.mxu1 %v1826_v37  ;;  %1662 = vmatprep.subr.bf16.mxu0 %v1829_v41  ;;  %v1873_v37 = vld [vmem:[%s2376_s1 + $0x258] sm:$0xff]   ;;  %v1877_v41 = vld [vmem:[%s2376_s1 + $0x260] sm:$0xff]  }
  0x22   :  { %1684 = vmatprep.subr.bf16.mxu1 %v1830_v42  ;;  %v1876_v42 = vld [vmem:[%s2376_s1 + $0x298] sm:$0xff]  }
  0x23   :  { %1197 = vmatmul.mubr.bf16.vlgmr.msra.gmra.mrb[0].mxu0 %v305_v44  ;;  %v1879_v44 = vld [vmem:[%s2376_s1 + $0x220] sm:$0xff]  }
  0x24   :  { %1663 = vmatpush3.bf16.msra.mxu0 %v1831_v47  ;;  %1237 = vmatmul.mubr.bf16.vlgmr.msra.gmra.mrb[0].mxu1 %v327_v49  ;;  %v1880_v47 = vld [vmem:[%s2376_s1 + $0x2a0] sm:$0xff]   ;;  %v1883_v49 = vld [vmem:[%s2376_s1 + $0x228] sm:$0xff]  }
  0x25   :  { %1664 = vmatprep.subr.bf16.mxu0 %v1833_v50  ;;  %1685 = vmatpush3.bf16.msra.mxu1 %v1832_v52  ;;  %v1885_v50 = vld [vmem:[%s2376_s1 + $0x270] sm:$0xff]   ;;  %v2244_v52 = vrot.slane %v331_v46, %v2036_v35 }
  0x26   :  { %1276 = vmatprep.mubr.bf16.mxu0 %v326_v53  ;;  %1686 = vmatprep.subr.bf16.mxu1 %v1834_v54  ;;  %v1886_v53 = vld [vmem:[%s2376_s1 + $0x2f0] sm:$0xff]  }
  0x27   :  { %1316 = vmatprep.mubr.bf16.mxu1 %v330_v56  ;;  %v1887_v54 = vld [vmem:[%s2376_s1 + $0x230] sm:$0xff]  }
  0x28   :  { %1665 = vmatpush3.bf16.msra.mxu0 %v1835_v55  ;;  %v1889_v55 = vld [vmem:[%s2376_s1 + $0x278] sm:$0xff]   ;;  %v1888_v56 = vld [vmem:[%s2376_s1 + $0x2b0] sm:$0xff]  }
  0x29   :  { %1666 = vmatprep.subr.bf16.mxu0 %v1837_v57  ;;  %1687 = vmatpush3.bf16.msra.mxu1 %v1836_v58  ;;  %v347_v57 = vcombine.high %v2244_v52, %v2244_v52  ;;  %v1890_v58 = vld [vmem:[%s2376_s1 + $0x2f8] sm:$0xff]  }
  0x2a   :  { %1688 = vmatprep.subr.bf16.mxu1 %v1838_v59  ;;  %v1891_v59 = vld [vmem:[%s2376_s1 + $0x238] sm:$0xff]  }
  0x2c   :  { %1667 = vmatpush3.bf16.msra.mxu0 %v1839_v60  ;;  %v354_v60 = vrot.slane %v2138_v12, %v2036_v35  ;;  %v1905_v12 = vld [vmem:[%s2376_s1 + $0x358] sm:$0xff]  }
  0x2d   :  { %1668 = vmatprep.subr.bf16.mxu0 %v1841_v61  ;;  %1689 = vmatpush3.bf16.msra.mxu1 %v1840_v62  ;;  %v1893_v61 = vld [vmem:[%s2376_s1 + $0x340] sm:$0xff]   ;;  %v1892_v62 = vld [vmem:[%s2376_s1 + $0x2b8] sm:$0xff]  }
  0x2e   :  { %1690 = vmatprep.subr.bf16.mxu1 %v1842_v63  ;;  %v375_v63 = vrot.slane %v347_v57, %v2036_v35 }
  0x30   :  { %1669 = vmatpush3.bf16.msra.mxu0 %v1843_v0  ;;  %v1894_v0 = vld [vmem:[%s2376_s1 + $0x3c0] sm:$0xff]   ;;  %v379_v5 = vcombine.high %v375_v63, %v375_v63 }
  0x31   :  { %1670 = vmatprep.subr.bf16.mxu0 %v1845_v1  ;;  %1691 = vmatpush3.bf16.msra.mxu1 %v1844_v2  ;;  %v1895_v1 = vld [vmem:[%s2376_s1 + $0x300] sm:$0xff]   ;;  %v376_v2 = vcombine.high %v354_v60, %v354_v60 }
  0x32   :  { %1692 = vmatprep.subr.bf16.mxu1 %v1846_v3  ;;  %v1897_v3 = vld [vmem:[%s2376_s1 + $0x348] sm:$0xff]  }
  0x34   :  { %1671 = vmatpush3.bf16.msra.mxu0 %v1847_v4  ;;  %v1896_v4 = vld [vmem:[%s2376_s1 + $0x380] sm:$0xff]  }
  0x35   :  { %1672 = vmatprep.subr.bf16.mxu0 %v1849_v6  ;;  %1693 = vmatpush3.bf16.msra.mxu1 %v1848_v7  ;;  %v1898_v6 = vld [vmem:[%s2376_s1 + $0x3c8] sm:$0xff]  }
  0x36   :  { %1694 = vmatprep.subr.bf16.mxu1 %v1850_v8  ;;  %v1899_v7 = vld [vmem:[%s2376_s1 + $0x308] sm:$0xff]   ;;  %v1901_v8 = vld [vmem:[%s2376_s1 + $0x350] sm:$0xff]  }
  0x38   :  { %1673 = vmatpush3.bf16.msra.mxu0 %v1851_v9  ;;  %v1900_v9 = vld [vmem:[%s2376_s1 + $0x388] sm:$0xff]  }
  0x39   :  { %1674 = vmatprep.subr.bf16.mxu0 %v1853_v10  ;;  %1695 = vmatpush3.bf16.msra.mxu1 %v1852_v11  ;;  %v1902_v10 = vld [vmem:[%s2376_s1 + $0x3d0] sm:$0xff]  }
  0x3a   :  { %1696 = vmatprep.subr.bf16.mxu1 %v1854_v13  ;;  %v1903_v11 = vld [vmem:[%s2376_s1 + $0x310] sm:$0xff]  }
  0x3b   :  { %v1904_v13 = vld [vmem:[%s2376_s1 + $0x390] sm:$0xff]  }
  0x3c   :  { %1675 = vmatpush3.bf16.msra.mxu0 %v1855_v14  ;;  %v1906_v14 = vld [vmem:[%s2376_s1 + $0x3d8] sm:$0xff]  }
  0x3d   :  { %1676 = vmatprep.subr.bf16.mxu0 %v1857_v15  ;;  %1697 = vmatpush3.bf16.msra.mxu1 %v1856_v16  ;;  %v1907_v15 = vld [vmem:[%s2376_s1 + $0x318] sm:$0xff]   ;;  %v1909_v16 = vld [vmem:[%s2376_s1 + $0x360] sm:$0xff]  }
  0x3e   :  { %1698 = vmatprep.subr.bf16.mxu1 %v1858_v18  ;;  %v1910_v18 = vld [vmem:[%s2376_s1 + $0x3e0] sm:$0xff]  }
  0x40   :  { %1677 = vmatpush3.bf16.msra.mxu0 %v1859_v19  ;;  %v1911_v19 = vld [vmem:[%s2376_s1 + $0x320] sm:$0xff]  }
  0x41   :  { %1706 = vmatprep.subr.bf16.mxu0 %v1861_v21  ;;  %1699 = vmatpush3.bf16.msra.mxu1 %v1860_v22  ;;  %v1912_v21 = vld [vmem:[%s2376_s1 + $0x3a0] sm:$0xff]   ;;  %v1914_v22 = vld [vmem:[%s2376_s1 + $0x3e8] sm:$0xff]  }
  0x42   :  { %1728 = vmatprep.subr.bf16.mxu1 %v1862_v24  ;;  %v1917_v24 = vld [vmem:[%s2376_s1 + $0x370] sm:$0xff]  }
  0x43   :  { %1277 = vmatmul.mubr.bf16.vlgmr.msra.gmra.mrb[4].mxu0 %v312_v20  ;;  %v1913_v20 = vld [vmem:[%s2376_s1 + $0x368] sm:$0xff]  }
  0x44   :  { %1707 = vmatpush3.bf16.msra.mxu0 %v1863_v25  ;;  %1356 = vmatprep.mubr.bf16.mxu0 %v368_v23  ;;  %v1915_v23 = vld [vmem:[%s2376_s1 + $0x328] sm:$0xff]  }
  0x45   :  { %1317 = vmatmul.mubr.bf16.vlgmr.msra.gmra.mrb[4].mxu1 %v328_v26  ;;  %1708 = vmatprep.subr.bf16.mxu0 %v1865_v27  ;;  %v1916_v25 = vld [vmem:[%s2376_s1 + $0x3a8] sm:$0xff]   ;;  %v1918_v26 = vld [vmem:[%s2376_s1 + $0x3f0] sm:$0xff]  }
  0x46   :  { %1729 = vmatpush3.bf16.msra.mxu1 %v1864_v28  ;;  %1396 = vmatprep.mubr.bf16.mxu1 %v378_v29  ;;  %v1919_v27 = vld [vmem:[%s2376_s1 + $0x330] sm:$0xff]   ;;  %v1921_v28 = vld [vmem:[%s2376_s1 + $0x378] sm:$0xff]  }
  0x47   :  { %1730 = vmatprep.subr.bf16.mxu1 %v1866_v30  ;;  %v1920_v29 = vld [vmem:[%s2376_s1 + $0x3b0] sm:$0xff]   ;;  %v1922_v30 = vld [vmem:[%s2376_s1 + $0x3f8] sm:$0xff]  }
  0x48   :  { %1709 = vmatpush3.bf16.msra.mxu0 %v1867_v31  ;;  %v1923_v31 = vld [vmem:[%s2376_s1 + $0x338] sm:$0xff]  }
  0x49   :  { %1710 = vmatprep.subr.bf16.mxu0 %v1869_v32  ;;  %v361_v32 = vrot.slane %v2244_v52, %v2036_v35 }
  0x4a   :  { %1731 = vmatpush3.bf16.msra.mxu1 %v1868_v33  ;;  %v1924_v33 = vld [vmem:[%s2376_s1 + $0x3b8] sm:$0xff]  }
  0x4b   :  { %1732 = vmatprep.subr.bf16.mxu1 %v1870_v34  ;;  %v377_v34 = vcombine.high %v361_v32, %v361_v32 }
  0x4c   :  { %1711 = vmatpush3.bf16.msra.mxu0 %v1871_v36 }
  0x4d   :  { %1712 = vmatprep.subr.bf16.mxu0 %v1873_v37  ;;  %v1489_v37 = vld [vmem:[%s2378_s2] ss:$0 sm:$0xff] }
  0x4e   :  { %1733 = vmatpush3.bf16.msra.mxu1 %v1872_v38 }
  0x4f   :  { %1734 = vmatprep.subr.bf16.mxu1 %v1874_v39 }
  0x50   :  { %1713 = vmatpush3.bf16.msra.mxu0 %v1875_v40 }
  0x51   :  { %1714 = vmatprep.subr.bf16.mxu0 %v1877_v41 }
  0x52   :  { %1735 = vmatpush3.bf16.msra.mxu1 %v1876_v42 }
  0x53   :  { %1736 = vmatprep.subr.bf16.mxu1 %v1878_v43 }
  0x54   :  { %1715 = vmatpush3.bf16.msra.mxu0 %v1879_v44 }
  0x55   :  { %1716 = vmatprep.subr.bf16.mxu0 %v1881_v45 }
  0x56   :  { %1737 = vmatpush3.bf16.msra.mxu1 %v1880_v47 }
  0x57   :  { %1738 = vmatprep.subr.bf16.mxu1 %v1882_v48 }
  0x58   :  { %1717 = vmatpush3.bf16.msra.mxu0 %v1883_v49 }
  0x59   :  { %1718 = vmatprep.subr.bf16.mxu0 %v1885_v50 }
  0x5a   :  { %1739 = vmatpush3.bf16.msra.mxu1 %v1884_v51 }
  0x5b   :  { %1740 = vmatprep.subr.bf16.mxu1 %v1886_v53 }
  0x5c   :  { %1719 = vmatpush3.bf16.msra.mxu0 %v1887_v54 }
  0x5d   :  { %1720 = vmatprep.subr.bf16.mxu0 %v1889_v55 }
  0x5e   :  { %1741 = vmatpush3.bf16.msra.mxu1 %v1888_v56 }
  0x5f   :  { %1742 = vmatprep.subr.bf16.mxu1 %v1890_v58 }
  0x60   :  { %1721 = vmatpush3.bf16.msra.mxu0 %v1891_v59 }
  0x61   :  { %1750 = vmatprep.subr.bf16.mxu0 %v1893_v61 }
  0x62   :  { %1743 = vmatpush3.bf16.msra.mxu1 %v1892_v62 }
  0x63   :  { %1357 = vmatmul.mubr.bf16.vlgmr.msra.gmra.mrb[8].mxu0 %v354_v60  ;;  %1772 = vmatprep.subr.bf16.mxu1 %v1894_v0 }
  0x64   :  { %1751 = vmatpush3.bf16.msra.mxu0 %v1895_v1  ;;  %1436 = vmatprep.mubr.bf16.mxu0 %v375_v63 }
  0x65   :  { %1397 = vmatmul.mubr.bf16.vlgmr.msra.gmra.mrb[8].mxu1 %v376_v2  ;;  %1752 = vmatprep.subr.bf16.mxu0 %v1897_v3 }
  0x66   :  { %1773 = vmatpush3.bf16.msra.mxu1 %v1896_v4  ;;  %1476 = vmatprep.mubr.bf16.mxu1 %v379_v5 }
  0x67   :  { %1774 = vmatprep.subr.bf16.mxu1 %v1898_v6 }
  0x68   :  { %1753 = vmatpush3.bf16.msra.mxu0 %v1899_v7 }
  0x69   :  { %1754 = vmatprep.subr.bf16.mxu0 %v1901_v8 }
  0x6a   :  { %1775 = vmatpush3.bf16.msra.mxu1 %v1900_v9 }
  0x6b   :  { %1776 = vmatprep.subr.bf16.mxu1 %v1902_v10 }
  0x6c   :  { %1755 = vmatpush3.bf16.msra.mxu0 %v1903_v11 }
  0x6d   :  { %1756 = vmatprep.subr.bf16.mxu0 %v1905_v12 }
  0x6e   :  { %1777 = vmatpush3.bf16.msra.mxu1 %v1904_v13 }
  0x6f   :  { %1778 = vmatprep.subr.bf16.mxu1 %v1906_v14 }
  0x70   :  { %1757 = vmatpush3.bf16.msra.mxu0 %v1907_v15 }
  0x71   :  { %1758 = vmatprep.subr.bf16.mxu0 %v1909_v16 }
  0x72   :  { %1779 = vmatpush3.bf16.msra.mxu1 %v1908_v17 }
  0x73   :  { %1780 = vmatprep.subr.bf16.mxu1 %v1910_v18 }
  0x74   :  { %1759 = vmatpush3.bf16.msra.mxu0 %v1911_v19 }
  0x75   :  { %1760 = vmatprep.subr.bf16.mxu0 %v1913_v20 }
  0x76   :  { %1781 = vmatpush3.bf16.msra.mxu1 %v1912_v21 }
  0x77   :  { %1782 = vmatprep.subr.bf16.mxu1 %v1914_v22 }
  0x78   :  { %1761 = vmatpush3.bf16.msra.mxu0 %v1915_v23 }
  0x79   :  { %1762 = vmatprep.subr.bf16.mxu0 %v1917_v24 }
  0x7a   :  { %1783 = vmatpush3.bf16.msra.mxu1 %v1916_v25 }
  0x7b   :  { %1784 = vmatprep.subr.bf16.mxu1 %v1918_v26 }
  0x7c   :  { %1763 = vmatpush3.bf16.msra.mxu0 %v1919_v27 }
  0x7d   :  { %1764 = vmatprep.subr.bf16.mxu0 %v1921_v28 }
  0x7e   :  { %1785 = vmatpush3.bf16.msra.mxu1 %v1920_v29 }
  0x7f   :  { %1786 = vmatprep.subr.bf16.mxu1 %v1922_v30 }
  0x80   :  { %1765 = vmatpush3.bf16.msra.mxu0 %v1923_v31 }
  0x82   :  { %1787 = vmatpush3.bf16.msra.mxu1 %v1924_v33 }
  0x83   :  { %1437 = vmatmul.mubr.bf16.vlgmr.msra.gmra.mrb[12].mxu0 %v361_v32 }
  0x85   :  { %1477 = vmatmul.mubr.bf16.vlgmr.msra.gmra.mrb[12].mxu1 %v377_v34 }
  0xf6   :  { %v1634_v36 = vpop.f32.mrb[0].mxu0 }
  0xf7   :  { %v1635_v38 = vpop.f32.mrb[1].mxu0  ;;  %v1656_v39 = vpop.f32.mrb[0].mxu1 }
  0xf8   :  { %v1636_v40 = vadd.f32 %v1635_v38, %v1634_v36  ;;  %v1637_v35 = vpop.f32.mrb[2].mxu0  ;;  %v1657_v41 = vpop.f32.mrb[1].mxu1 }
  0xf9   :  { %v1638_v42 = vpop.f32.mrb[3].mxu0  ;;  %v1658_v44 = vadd.f32 %v1657_v41, %v1656_v39  ;;  %v1659_v45 = vpop.f32.mrb[2].mxu1 }
  0xfa   :  { %v1199_v43 = vadd.f32 %v1636_v40, %v1489_v37  ;;  %v1660_v46 = vpop.f32.mrb[3].mxu1 }
  0xfc   :  { %v1239_v47 = vadd.f32 %v1658_v44, %v1199_v43 }
 0x116   :  { %v1678_v48 = vpop.f32.mrb[4].mxu0 }
 0x117   :  { %v1679_v49 = vpop.f32.mrb[5].mxu0 }
 0x118   :  { %v1700_v50 = vpop.f32.mrb[4].mxu1  ;;  %v1680_v51 = vadd.f32 %v1679_v49, %v1678_v48  ;;  %v1681_v52 = vpop.f32.mrb[6].mxu0 }
 0x119   :  { %v1701_v53 = vpop.f32.mrb[5].mxu1  ;;  %v1682_v54 = vpop.f32.mrb[7].mxu0 }
 0x11a   :  { %v1279_v55 = vadd.f32 %v1680_v51, %v1239_v47  ;;  %v1702_v56 = vadd.f32 %v1701_v53, %v1700_v50  ;;  %v1703_v57 = vpop.f32.mrb[6].mxu1 }
 0x11b   :  { %v1704_v58 = vpop.f32.mrb[7].mxu1 }
 0x11c   :  { %v1319_v59 = vadd.f32 %v1702_v56, %v1279_v55 }
 0x136   :  { %v1722_v60 = vpop.f32.mrb[8].mxu0 }
 0x137   :  { %v1723_v61 = vpop.f32.mrb[9].mxu0 }
 0x138   :  { %v1744_v62 = vpop.f32.mrb[8].mxu1  ;;  %v1724_v63 = vadd.f32 %v1723_v61, %v1722_v60  ;;  %v1725_v0 = vpop.f32.mrb[10].mxu0 }
 0x139   :  { %v1745_v1 = vpop.f32.mrb[9].mxu1  ;;  %v1726_v2 = vpop.f32.mrb[11].mxu0 }
 0x13a   :  { %v1359_v3 = vadd.f32 %v1724_v63, %v1319_v59  ;;  %v1746_v4 = vadd.f32 %v1745_v1, %v1744_v62  ;;  %v1747_v5 = vpop.f32.mrb[10].mxu1 }
 0x13b   :  { %v1748_v6 = vpop.f32.mrb[11].mxu1 }
 0x13c   :  { %v1399_v7 = vadd.f32 %v1746_v4, %v1359_v3 }
 0x156   :  { %v1766_v8 = vpop.f32.mrb[12].mxu0 }
 0x157   :  { %v1767_v9 = vpop.f32.mrb[13].mxu0 }
 0x158   :  { %v1788_v10 = vpop.f32.mrb[12].mxu1  ;;  %v1768_v11 = vadd.f32 %v1767_v9, %v1766_v8  ;;  %v1769_v12 = vpop.f32.mrb[14].mxu0 }
 0x159   :  { %v1789_v13 = vpop.f32.mrb[13].mxu1  ;;  %v1770_v14 = vpop.f32.mrb[15].mxu0 }
 0x15a   :  { %v1439_v15 = vadd.f32 %v1768_v11, %v1399_v7  ;;  %v1790_v16 = vadd.f32 %v1789_v13, %v1788_v10  ;;  %v1791_v17 = vpop.f32.mrb[14].mxu1 }
 0x15b   :  { %v1792_v18 = vpop.f32.mrb[15].mxu1 }
 0x15c   :  { %v1479_v19 = vadd.f32 %v1790_v16, %v1439_v15 }
 0x15e   :  { %1484 = vst [vmem:[%s2379_s3] sm:$0x3] %v1479_v19 }

// kernel: encoder_forward.6
= control target key start
LH: loop header
LB: loop body
LE: loop exit
PB: predicated region body
PF: predicated region fallthrough
CT: control target
= control target key end

     0   :  { %s2535_s1 = inlined_call_operand.vmem [shape: bf16[128,128], index: 1, kind: input, shape index: {}]   ;;  %s2536_s0 = inlined_call_operand.vmem [shape: bf16[32,128], index: 0, kind: input, shape index: {}]   ;;  %s2537_s2 = inlined_call_operand.vmem [shape: bf16[384,128], index: 2, kind: input, shape index: {}]   ;;  %s2538_s5 = inlined_call_operand.vmem [shape: f32[8,128], index: 5, kind: input, shape index: {}]   ;;  %s2539_s3 = inlined_call_operand.vmem [shape: bf16[128,128], index: 3, kind: input, shape index: {}]   ;;  %s2540_s4 = inlined_call_operand.vmem [shape: bf16[384,128], index: 4, kind: input, shape index: {}]   ;;  %s2541_s6 = inlined_call_operand.vmem [shape: bf16[32,128], index: 6, kind: output, shape index: {}]  }
   0x1   :  { %v1918_v0 = vld [vmem:[%s2535_s1] sm:$0xff]   ;;  %v1919_v1 = vld [vmem:[%s2535_s1 + $0x8] sm:$0xff]   ;;  %v1920_v2 = vld [vmem:[%s2535_s1 + $0x10] sm:$0xff]  }
   0x2   :  { %1837 = vmatprep.subr.bf16.mxu0 %v1918_v0  ;;  %v1921_v3 = vld [vmem:[%s2535_s1 + $0x18] sm:$0xff]   ;;  %v1926_v4 = vld [vmem:[%s2536_s0] sm:$0xff]   ;;  %v1923_v6 = vld [vmem:[%s2535_s1 + $0x28] sm:$0xff]  }
   0x3   :  { %1838 = vmatpush3.bf16.msra.mxu0 %v1918_v0  ;;  %1853 = vmatprep.mubr.bf16.mxu0 %v1926_v4  ;;  %v1922_v5 = vld [vmem:[%s2535_s1 + $0x20] sm:$0xff]   ;;  %v1924_v7 = vld [vmem:[%s2535_s1 + $0x30] sm:$0xff]   ;;  %v1925_v8 = vld [vmem:[%s2535_s1 + $0x38] sm:$0xff]  }
   0x4   :  { %1839 = vmatprep.subr.bf16.mxu0 %v1919_v1  ;;  %v1927_v9 = vld [vmem:[%s2536_s0 + $0x8] sm:$0xff]   ;;  %v1928_v10 = vld [vmem:[%s2537_s2 + $0x40] sm:$0xff]   ;;  %v1934_v16 = vld [vmem:[%s2537_s2 + $0x50] sm:$0xff]  }
   0x5   :  { %v1929_v11 = vld [vmem:[%s2537_s2] sm:$0xff]   ;;  %1751 = vmatprep.subr.bf16.mxu1 %v1928_v10  ;;  %v1931_v13 = vld [vmem:[%s2537_s2 + $0x48] sm:$0xff]   ;;  %v1935_v17 = vld [vmem:[%s2537_s2 + $0x10] sm:$0xff]  }
   0x6   :  { %v1930_v12 = vld [vmem:[%s2537_s2 + $0x80] sm:$0xff]   ;;  %1752 = vmatpush3.bf16.msra.mxu1 %v1929_v11  ;;  %v1932_v14 = vld [vmem:[%s2537_s2 + $0x8] sm:$0xff]   ;;  %v1936_v18 = vld [vmem:[%s2537_s2 + $0x90] sm:$0xff]  }
   0x7   :  { %1840 = vmatpush3.bf16.msra.mxu0 %v1919_v1  ;;  %1753 = vmatprep.subr.bf16.mxu1 %v1931_v13  ;;  %v1933_v15 = vld [vmem:[%s2537_s2 + $0x88] sm:$0xff]   ;;  %v1937_v19 = vld [vmem:[%s2537_s2 + $0x58] sm:$0xff]   ;;  %v1940_v22 = vld [vmem:[%s2537_s2 + $0x60] sm:$0xff]  }
   0x8   :  { %1841 = vmatprep.subr.bf16.mxu0 %v1920_v2  ;;  %v1938_v20 = vld [vmem:[%s2537_s2 + $0x18] sm:$0xff]   ;;  %v1942_v23 = vld [vmem:[%s2537_s2 + $0xa0] sm:$0xff]   ;;  %v1943_v25 = vld [vmem:[%s2537_s2 + $0x68] sm:$0xff]  }
   0x9   :  { %v1939_v21 = vld [vmem:[%s2537_s2 + $0x98] sm:$0xff]   ;;  %v1941_v24 = vld [vmem:[%s2537_s2 + $0x20] sm:$0xff]   ;;  %v1944_v26 = vld [vmem:[%s2537_s2 + $0x28] sm:$0xff]  }
   0xa   :  { %1754 = vmatpush3.bf16.msra.mxu1 %v1932_v14  ;;  %v1945_v27 = vld [vmem:[%s2537_s2 + $0xa8] sm:$0xff]   ;;  %v1946_v28 = vld [vmem:[%s2537_s2 + $0x70] sm:$0xff]   ;;  %v1949_v31 = vld [vmem:[%s2537_s2 + $0x78] sm:$0xff]  }
   0xb   :  { %1842 = vmatpush3.bf16.msra.mxu0 %v1920_v2  ;;  %1755 = vmatprep.subr.bf16.mxu1 %v1934_v16  ;;  %v1948_v29 = vld [vmem:[%s2537_s2 + $0xb0] sm:$0xff]   ;;  %v1950_v32 = vld [vmem:[%s2537_s2 + $0x38] sm:$0xff]   ;;  %v25_v2 = vlaneseq  ;;  %v2200_v4 = vld [vmem:[%s2538_s5] sm:$0xff] }
   0xc   :  { %1843 = vmatprep.subr.bf16.mxu0 %v1921_v3  ;;  %v1947_v30 = vld [vmem:[%s2537_s2 + $0x30] sm:$0xff]   ;;  %v1951_v33 = vld [vmem:[%s2537_s2 + $0xb8] sm:$0xff]  }
   0xe   :  { %1756 = vmatpush3.bf16.msra.mxu1 %v1935_v17 }
   0xf   :  { %1844 = vmatpush3.bf16.msra.mxu0 %v1921_v3  ;;  %1757 = vmatprep.subr.bf16.mxu1 %v1937_v19  ;;  %v2195_v3 = vshrl.u32 %v25_v2, 7 }
  0x10   :  { %1845 = vmatprep.subr.bf16.mxu0 %v1922_v5 }
  0x11   :  { %v276_v10 = vsub.s32 1, %v2195_v3  ;;  %vm394_vm2 = vcmp.lt.s32.totalorder %v2195_v3, 1  ;;  %vm407_vm5 = vcmp.lt.s32.totalorder %v2195_v3, 7 }
  0x12   :  { %1758 = vmatpush3.bf16.msra.mxu1 %v1938_v20 }
  0x13   :  { %1846 = vmatpush3.bf16.msra.mxu0 %v1922_v5  ;;  %1759 = vmatprep.subr.bf16.mxu1 %v1940_v22  ;;  %v268_v5 = vsub.s32 0, %v2195_v3 }
  0x14   :  { %1847 = vmatprep.subr.bf16.mxu0 %v1923_v6 }
  0x16   :  { %1760 = vmatpush3.bf16.msra.mxu1 %v1941_v24 }
  0x17   :  { %1848 = vmatpush3.bf16.msra.mxu0 %v1923_v6  ;;  %1761 = vmatprep.subr.bf16.mxu1 %v1943_v25 }
  0x18   :  { %1849 = vmatprep.subr.bf16.mxu0 %v1924_v7 }
  0x1a   :  { %1762 = vmatpush3.bf16.msra.mxu1 %v1944_v26 }
  0x1b   :  { %1850 = vmatpush3.bf16.msra.mxu0 %v1924_v7  ;;  %1763 = vmatprep.subr.bf16.mxu1 %v1946_v28 }
  0x1c   :  { %1851 = vmatprep.subr.bf16.mxu0 %v1925_v8 }
  0x1e   :  { %1764 = vmatpush3.bf16.msra.mxu1 %v1947_v30 }
  0x1f   :  { %1852 = vmatpush3.bf16.msra.mxu0 %v1925_v8  ;;  %1765 = vmatprep.subr.bf16.mxu1 %v1949_v31 }
  0x20   :  { %1857 = vmatprep.subr.bf16.mxu0 %v1930_v12 }
  0x22   :  { %1854 = vmatmul.mubr.bf16.vlgmr.msra.gmra.mrb[0].mxu0 %v1927_v9  ;;  %1766 = vmatpush3.bf16.msra.mxu1 %v1950_v32 }
  0x23   :  { %1858 = vmatpush3.bf16.msra.mxu0 %v1930_v12 }
  0x24   :  { %1859 = vmatprep.subr.bf16.mxu0 %v1933_v15 }
  0x27   :  { %1860 = vmatpush3.bf16.msra.mxu0 %v1933_v15 }
  0x28   :  { %1861 = vmatprep.subr.bf16.mxu0 %v1936_v18 }
  0x2b   :  { %1862 = vmatpush3.bf16.msra.mxu0 %v1936_v18 }
  0x2c   :  { %1863 = vmatprep.subr.bf16.mxu0 %v1939_v21 }
  0x2f   :  { %1864 = vmatpush3.bf16.msra.mxu0 %v1939_v21 }
  0x30   :  { %1865 = vmatprep.subr.bf16.mxu0 %v1942_v23 }
  0x33   :  { %1866 = vmatpush3.bf16.msra.mxu0 %v1942_v23 }
  0x34   :  { %1867 = vmatprep.subr.bf16.mxu0 %v1945_v27 }
  0x37   :  { %1868 = vmatpush3.bf16.msra.mxu0 %v1945_v27 }
  0x38   :  { %1869 = vmatprep.subr.bf16.mxu0 %v1948_v29 }
  0x3b   :  { %1870 = vmatpush3.bf16.msra.mxu0 %v1948_v29 }
  0x3c   :  { %1871 = vmatprep.subr.bf16.mxu0 %v1951_v33 }
  0x3f   :  { %1872 = vmatpush3.bf16.msra.mxu0 %v1951_v33 }
  0xf5   :  { %v1855_v34 = vpop.f32.mrb[0].mxu0 }
  0xf6   :  { %v216_v35 = vpop.f32.mrb[1].mxu0  ;;  %v242_v41 = vmul.f32 %v1855_v34, %v1855_v34 }
  0xf7   :  { %v1856_v36 = vpop.f32.mrb[2].mxu0  ;;  %v240_v38 = vmul.f32 %v216_v35, %v216_v35 }
  0xf8   :  { %v219_v37 = vpop.f32.mrb[3].mxu0  ;;  %v243_v44 = vmul.f32 %v1856_v36, %v1856_v36 }
  0xf9   :  { %v231_v39 = vadd.f32 %v219_v37, %v216_v35  ;;  %v241_v40 = vmul.f32 %v219_v37, %v219_v37 }
  0xfb   :  { %v232_v42 = vadd.f32 %v1855_v34, %v231_v39  ;;  %v244_v43 = vadd.f32 %v241_v40, %v240_v38 }
  0xfd   :  { %v233_v45 = vadd.f32 %v1856_v36, %v232_v42  ;;  %v245_v46 = vadd.f32 %v244_v43, %v242_v41 }
  0xff   :  { %v234_v47 = vrot.slane %v233_v45, 4  ;;  %v246_v48 = vadd.f32 %v245_v46, %v243_v44 }
 0x101   :  { %v235_v49 = vadd.f32 %v234_v47, %v233_v45  ;;  %v247_v50 = vrot.slane %v246_v48, 4 }
 0x103   :  { %v236_v51 = vrot.slane %v235_v49, 2  ;;  %v248_v52 = vadd.f32 %v247_v50, %v246_v48 }
 0x105   :  { %v237_v53 = vadd.f32 %v236_v51, %v235_v49  ;;  %v249_v54 = vrot.slane %v248_v52, 2 }
 0x107   :  { %v238_v55 = vrot.slane %v237_v53, 1  ;;  %v250_v56 = vadd.f32 %v249_v54, %v248_v52 }
 0x109   :  { %v239_v57 = vadd.f32 %v238_v55, %v237_v53  ;;  %v251_v58 = vrot.slane %v250_v56, 1 }
 0x10b   :  { %v252_v59 = vadd.f32 %v251_v58, %v250_v56  ;;  %v253_v60 = vmul.f32 0.03125, %v239_v57 }
 0x10d   :  { %v254_v61 = vmul.f32 0.03125, %v252_v59  ;;  %v255_v62 = vmul.f32 %v253_v60, %v253_v60 }
 0x10f   :  { %v256_v63 = vsub.f32 %v254_v61, %v255_v62 }
 0x111   :  { %v257_v0 = vmax.f32 %v256_v63, 0.0 }
 0x113   :  { %v258_v1 = vadd.f32 1e-05, %v257_v0 }
 0x115   :  { %1984 = vrsqrt.f32 %v258_v1 }
 0x11f   :  { %v1985_v6 = vpop.eup %1984 }
 0x120   :  { %v260_v7 = vmul.f32 %v1985_v6, %v2200_v4 }
 0x122   :  { %v261_v8 = vmul.f32 %v260_v7, %v253_v60  ;;  %v269_v9 = vrot.slane %v260_v7, %v268_v5 }
 0x124   :  { %v263_v11 = vrot.slane %v261_v8, 7  ;;  %v271_v12 = vmul.f32 %v269_v9, %v219_v37  ;;  %v272_v13 = vmul.f32 %v1855_v34, %v269_v9  ;;  %v273_v14 = vmul.f32 %v1856_v36, %v269_v9 }
 0x125   :  { %v270_v15 = vmul.f32 %v269_v9, %v216_v35 }
 0x126   :  { %v265_v16 = vsub.f32 %v2200_v4, %v263_v11 }
 0x128   :  { %v277_v17 = vrot.slane %v265_v16, %v276_v10 }
 0x12a   :  { %v2206_v18 = vadd.f32 %v277_v17, %v271_v12  ;;  %v2208_v19 = vadd.f32 %v277_v17, %v270_v15  ;;  %v2210_v20 = vadd.f32 %v277_v17, %v273_v14  ;;  %v2212_v21 = vadd.f32 %v277_v17, %v272_v13 }
 0x12c   :  { %v2215_v22 = vmul.f32 0.70710677, %v2206_v18  ;;  %v2218_v23 = vmul.f32 0.70710677, %v2208_v19  ;;  %v2221_v24 = vmul.f32 0.70710677, %v2210_v20 }
 0x12d   :  { %v2224_v25 = vmul.f32 0.70710677, %v2212_v21 }
 0x12e   :  { %v291_v26 = vand.u32 2147483647, %v2215_v22  ;;  %v290_v27 = vand.u32 2147483647, %v2218_v23  ;;  %v293_v28 = vand.u32 2147483647, %v2221_v24 }
 0x12f   :  { %v292_v29 = vand.u32 2147483647, %v2224_v25  ;;  %vm371_vm1 = vcmp.ge.f32.partialorder %v2215_v22, 0.0  ;;  %vm370_vm3 = vcmp.ge.f32.partialorder %v2218_v23, 0.0  ;;  %vm373_vm4 = vcmp.ge.f32.partialorder %v2221_v24, 0.0 }
 0x130   :  { %v295_v30 = vmul.f32 0.3275911, %v291_v26  ;;  %v294_v31 = vmul.f32 0.3275911, %v290_v27  ;;  %v297_v32 = vmul.f32 0.3275911, %v293_v28 }
 0x131   :  { %v296_v35 = vmul.f32 0.3275911, %v292_v29  ;;  %v347_v38 = vsub.f32 0.0, %v291_v26  ;;  %v346_v39 = vsub.f32 0.0, %v290_v27  ;;  %v349_v42 = vsub.f32 0.0, %v293_v28 }
 0x132   :  { %v299_v33 = vadd.f32 1.0, %v295_v30  ;;  %v298_v34 = vadd.f32 1.0, %v294_v31  ;;  %v301_v36 = vadd.f32 1.0, %v297_v32  ;;  %v348_v47 = vsub.f32 0.0, %v292_v29 }
 0x133   :  { %v300_v37 = vadd.f32 1.0, %v296_v35  ;;  %v351_v41 = vmul.f32 %v347_v38, %v291_v26  ;;  %v350_v45 = vmul.f32 %v346_v39, %v290_v27  ;;  %v353_v52 = vmul.f32 %v349_v42, %v293_v28 }
 0x134   :  { %1986 = vrcp.f32 %v299_v33  ;;  %v352_v58 = vmul.f32 %v348_v47, %v292_v29  ;;  %v34_v32 = vand.u32 15, %v2195_v3  ;;  %v29_v39 = vadd.s32 24, %v2195_v3 }
 0x135   :  { %1988 = vrcp.f32 %v298_v34  ;;  %v356_v50 = vmul.f32 1.442695, %v351_v41  ;;  %v354_v54 = vmul.f32 1.442695, %v350_v45  ;;  %v360_v63 = vmul.f32 1.442695, %v353_v52 }
 0x136   :  { %1990 = vrcp.f32 %v301_v36  ;;  %v358_v6 = vmul.f32 1.442695, %v352_v58  ;;  %v27_v36 = vadd.s32 8, %v2195_v3  ;;  %vm2233_vm0 = vcmp.ne.s32.totalorder %v34_v32, 0 }
 0x137   :  { %1992 = vrcp.f32 %v300_v37  ;;  %v283_v58 = vmul.f32 0.5, %v2206_v18  ;;  %v285_v18 = vmul.f32 0.5, %v2210_v20  ;;  %vm372_vm7 = vcmp.ge.f32.partialorder %v2224_v25, 0.0 }
 0x138   :  { %1994 = vpow2.f32 %v356_v50  ;;  %v41_v50 = vand.u32 15, %v27_v36 }
 0x139   :  { %1996 = vpow2.f32 %v354_v54 }
 0x13a   :  { %1998 = vpow2.f32 %v360_v63  ;;  %vm91_vm8 = vcmp.ne.s32.totalorder %v41_v50, 15  ;;  %v1955_v50 = vld [vmem:[%s2539_s3 + $0x18] sm:$0xff]  }
 0x13b   :  { %2000 = vpow2.f32 %v358_v6 }
 0x13e   :  { %v1987_v40 = vpop.eup %1986 }
 0x13f   :  { %v1989_v43 = vpop.eup %1988  ;;  %v311_v44 = vmul.f32 1.0614054, %v1987_v40 }
 0x140   :  { %v310_v46 = vmul.f32 1.0614054, %v1989_v43  ;;  %v1991_v49 = vpop.eup %1990 }
 0x141   :  { %v315_v48 = vadd.f32 -1.4531521, %v311_v44  ;;  %v313_v55 = vmul.f32 1.0614054, %v1991_v49  ;;  %v1993_v56 = vpop.eup %1992 }
 0x142   :  { %v314_v51 = vadd.f32 -1.4531521, %v310_v46  ;;  %v312_v61 = vmul.f32 1.0614054, %v1993_v56  ;;  %v1995_v30 = vpop.eup %1994 }
 0x143   :  { %v319_v53 = vmul.f32 %v1987_v40, %v315_v48  ;;  %v317_v60 = vadd.f32 -1.4531521, %v313_v55  ;;  %v1997_v33 = vpop.eup %1996 }
 0x144   :  { %v318_v57 = vmul.f32 %v1989_v43, %v314_v51  ;;  %v316_v2 = vadd.f32 -1.4531521, %v312_v61  ;;  %v1999_v45 = vpop.eup %1998 }
 0x145   :  { %v323_v59 = vadd.f32 1.4214138, %v319_v53  ;;  %v321_v1 = vmul.f32 %v1991_v49, %v317_v60  ;;  %v2001_v52 = vpop.eup %2000 }
 0x146   :  { %v322_v62 = vadd.f32 1.4214138, %v318_v57  ;;  %v320_v9 = vmul.f32 %v1993_v56, %v316_v2 }
 0x147   :  { %v327_v0 = vmul.f32 %v1987_v40, %v323_v59  ;;  %v325_v8 = vadd.f32 1.4214138, %v321_v1 }
 0x148   :  { %v326_v5 = vmul.f32 %v1989_v43, %v322_v62  ;;  %v324_v13 = vadd.f32 1.4214138, %v320_v9  ;;  %v282_v62 = vmul.f32 0.5, %v2208_v19 }
 0x149   :  { %v331_v7 = vadd.f32 -0.28449672, %v327_v0  ;;  %v329_v12 = vmul.f32 %v1991_v49, %v325_v8 }
 0x14a   :  { %v330_v10 = vadd.f32 -0.28449672, %v326_v5  ;;  %v328_v17 = vmul.f32 %v1993_v56, %v324_v13 }
 0x14b   :  { %v335_v11 = vmul.f32 %v1987_v40, %v331_v7  ;;  %v333_v16 = vadd.f32 -0.28449672, %v329_v12  ;;  %v284_v12 = vmul.f32 0.5, %v2212_v21 }
 0x14c   :  { %v334_v14 = vmul.f32 %v1989_v43, %v330_v10  ;;  %v332_v29 = vadd.f32 -0.28449672, %v328_v17 }
 0x14d   :  { %v339_v15 = vadd.f32 0.2548296, %v335_v11  ;;  %v337_v28 = vmul.f32 %v1991_v49, %v333_v16 }
 0x14e   :  { %v338_v26 = vadd.f32 0.2548296, %v334_v14  ;;  %v336_v37 = vmul.f32 %v1993_v56, %v332_v29  ;;  %v2057_v14 = vmov 0.0  }
 0x14f   :  { %v343_v27 = vmul.f32 %v1987_v40, %v339_v15  ;;  %v341_v35 = vadd.f32 0.2548296, %v337_v28  ;;  %v2254_v20 = vsel %vm2233_vm0, 1.0, %v2057_v14 }
 0x150   :  { %v342_v31 = vmul.f32 %v1989_v43, %v338_v26  ;;  %v340_v44 = vadd.f32 0.2548296, %v336_v37  ;;  %v28_v43 = vadd.s32 16, %v2195_v3 }
 0x151   :  { %v363_v34 = vmul.f32 %v1995_v30, %v343_v27  ;;  %v345_v42 = vmul.f32 %v1991_v49, %v341_v35  ;;  %v55_v49 = vand.u32 15, %v29_v39  ;;  %v2264_v27 = vsel %vm91_vm8, 1.0, %v2057_v14 }
 0x152   :  { %v362_v38 = vmul.f32 %v1997_v33, %v342_v31  ;;  %v344_v51 = vmul.f32 %v1993_v56, %v340_v44  ;;  %v48_v61 = vand.u32 15, %v28_v43  ;;  %v1952_v43 = vld [vmem:[%s2539_s3] sm:$0xff]  }
 0x153   :  { %v367_v41 = vsub.f32 1.0, %v363_v34  ;;  %v365_v48 = vmul.f32 %v1999_v45, %v345_v42  ;;  %vm2245_vm6 = vcmp.ne.s32.totalorder %v55_v49, 15  ;;  %1877 = vmatprep.subr.bf16.mxu1 %v1952_v43  ;;  %v1959_v49 = vld [vmem:[%s2539_s3 + $0x38] sm:$0xff]  }
 0x154   :  { %v366_v40 = vsub.f32 1.0, %v362_v38  ;;  %v364_v57 = vmul.f32 %v2001_v52, %v344_v51  ;;  %v2262_v26 = vsel %vm2245_vm6, 1.0, %v2057_v14  ;;  %vm80_vm9 = vcmp.ne.s32.totalorder %v48_v61, 0  ;;  %v1956_v51 = vld [vmem:[%s2539_s3 + $0x20] sm:$0xff]   ;;  %v1957_v52 = vld [vmem:[%s2539_s3 + $0x28] sm:$0xff]  }
 0x155   :  { %v375_v47 = vsub.f32 0.0, %v367_v41  ;;  %v369_v55 = vsub.f32 1.0, %v365_v48  ;;  %v2276_v37 = vsel %vm80_vm9, 1.0, %v2057_v14  ;;  %v1954_v48 = vld [vmem:[%s2539_s3 + $0x10] sm:$0xff]  }
 0x156   :  { %v374_v53 = vsub.f32 0.0, %v366_v40  ;;  %v368_v0 = vsub.f32 1.0, %v364_v57 }
 0x157   :  { %v379_v54 = vsel %vm371_vm1, %v367_v41, %v375_v47  ;;  %v377_v63 = vsub.f32 0.0, %v369_v55  ;;  %v1953_v47 = vld [vmem:[%s2539_s3 + $0x8] sm:$0xff]  }
 0x158   :  { %v378_v59 = vsel %vm370_vm3, %v366_v40, %v374_v53  ;;  %v383_v60 = vadd.f32 1.0, %v379_v54  ;;  %v376_v5 = vsub.f32 0.0, %v368_v0  ;;  %v1958_v53 = vld [vmem:[%s2539_s3 + $0x30] sm:$0xff]  }
 0x159   :  { %v382_v56 = vadd.f32 1.0, %v378_v59  ;;  %v381_v2 = vsel %vm373_vm4, %v369_v55, %v377_v63 }
 0x15a   :  { %v387_v22 = vmul.f32 %v383_v60, %v283_v58  ;;  %v385_v19 = vadd.f32 1.0, %v381_v2  ;;  %v380_v24 = vsel %vm372_vm7, %v368_v0, %v376_v5 }
 0x15b   :  { %v386_v1 = vmul.f32 %v382_v56, %v282_v62  ;;  %v384_v13 = vadd.f32 1.0, %v380_v24 }
 0x15c   :  { %v391_v6 = vrot.slane %v387_v22, 7  ;;  %v404_v7 = vrot.slane %v387_v22, 1  ;;  %v389_v11 = vmul.f32 %v385_v19, %v285_v18 }
 0x15d   :  { %v390_v8 = vrot.slane %v386_v1, 7  ;;  %v403_v9 = vrot.slane %v386_v1, 1  ;;  %v417_v10 = vpack.c.bf16 %v387_v22, %v386_v1  ;;  %v388_v17 = vmul.f32 %v384_v13, %v284_v12 }
 0x15e   :  { %v393_v16 = vrot.slane %v389_v11, 7  ;;  %v406_v21 = vrot.slane %v389_v11, 1 }
 0x15f   :  { %646 = vmatprep.mubr.bf16.mxu1 %v417_v10  ;;  %v397_v15 = vsel %vm394_vm2, %v390_v8, %v391_v6  ;;  %v410_v25 = vsel %vm407_vm5, %v403_v9, %v404_v7  ;;  %v405_v29 = vrot.slane %v388_v17, 1  ;;  %v420_v30 = vpack.c.bf16 %v389_v11, %v388_v17 }
 0x160   :  { %v398_v28 = vsel %vm394_vm2, %v393_v16, %v390_v8  ;;  %v411_v31 = vsel %vm407_vm5, %v406_v21, %v403_v9  ;;  %v392_v34 = vrot.slane %v388_v17, 7 }
 0x161   :  { %v399_v32 = vmul.f32 %v2254_v20, %v398_v28  ;;  %v415_v33 = vmul.f32 %v2262_v26, %v411_v31  ;;  %v409_v35 = vsel %vm407_vm5, %v404_v7, %v405_v29  ;;  %v408_v36 = vsel %vm407_vm5, %v405_v29, %v406_v21 }
 0x162   :  { %v413_v39 = vmul.f32 %v2264_v27, %v409_v35  ;;  %v395_v42 = vsel %vm394_vm2, %v392_v34, %v393_v16  ;;  %v396_v44 = vsel %vm394_vm2, %v391_v6, %v392_v34 }
 0x163   :  { %v416_v38 = vpack.c.bf16 %v397_v15, %v399_v32  ;;  %v421_v41 = vpack.c.bf16 %v415_v33, %v408_v36  ;;  %v401_v40 = vmul.f32 %v2276_v37, %v396_v44 }
 0x164   :  { %v418_v45 = vpack.c.bf16 %v413_v39, %v410_v25 }
 0x165   :  { %647 = vmatmul.mubr.bf16.vlgmr.msra.gmra.mrb[0].mxu1 %v416_v38  ;;  %v419_v46 = vpack.c.bf16 %v395_v42, %v401_v40  ;;  %v749_v40 = vsub.s32 2, %v2195_v3 }
 0x166   :  { %654 = vmatprep.mubr.bf16.mxu1 %v420_v30  ;;  %1873 = vmatprep.mubr.bf16.mxu0 %v418_v45 }
 0x167   :  { %1874 = vmatmul.mubr.bf16.vlgmr.msra.gmra.mrb[4].mxu0 %v421_v41  ;;  %1878 = vmatpush3.bf16.msra.mxu1 %v1952_v43 }
 0x168   :  { %1879 = vmatprep.subr.bf16.mxu1 %v1953_v47 }
 0x16b   :  { %1880 = vmatpush3.bf16.msra.mxu1 %v1953_v47 }
 0x16c   :  { %1881 = vmatprep.subr.bf16.mxu1 %v1954_v48 }
 0x16d   :  { %655 = vmatmul.mubr.bf16.gmra.mrb[4].mxu1 %v419_v46 }
 0x16f   :  { %1882 = vmatpush3.bf16.msra.mxu1 %v1954_v48 }
 0x170   :  { %1883 = vmatprep.subr.bf16.mxu1 %v1955_v50 }
 0x173   :  { %1884 = vmatpush3.bf16.msra.mxu1 %v1955_v50  ;;  %v757_v50 = vsub.s32 3, %v2195_v3 }
 0x174   :  { %1885 = vmatprep.subr.bf16.mxu1 %v1956_v51 }
 0x177   :  { %1886 = vmatpush3.bf16.msra.mxu1 %v1956_v51 }
 0x178   :  { %1887 = vmatprep.subr.bf16.mxu1 %v1957_v52 }
 0x17b   :  { %1888 = vmatpush3.bf16.msra.mxu1 %v1957_v52 }
 0x17c   :  { %1889 = vmatprep.subr.bf16.mxu1 %v1958_v53 }
 0x17f   :  { %1890 = vmatpush3.bf16.msra.mxu1 %v1958_v53 }
 0x180   :  { %1891 = vmatprep.subr.bf16.mxu1 %v1959_v49 }
 0x183   :  { %1892 = vmatpush3.bf16.msra.mxu1 %v1959_v49 }
 0x238   :  { %v1767_v54 = vpop.f32.mrb[0].mxu1 }
 0x239   :  { %v1768_v55 = vpop.f32.mrb[1].mxu1 }
 0x23a   :  { %v1769_v57 = vadd.f32 %v1768_v55, %v1767_v54  ;;  %v1770_v58 = vpop.f32.mrb[2].mxu1  ;;  %v1875_v59 = vpop.f32.mrb[4].mxu0 }
 0x23b   :  { %v1771_v60 = vpop.f32.mrb[3].mxu1  ;;  %v697_v61 = vpop.f32.mrb[5].mxu0 }
 0x23c   :  { %v1772_v62 = vadd.f32 %v1771_v60, %v1770_v58  ;;  %v698_v56 = vadd.f32 %v1769_v57, %v697_v61  ;;  %v1876_v63 = vpop.f32.mrb[6].mxu0 }
 0x23d   :  { %v700_v0 = vpop.f32.mrb[7].mxu0 }
 0x23e   :  { %v701_v22 = vadd.f32 %v1772_v62, %v700_v0  ;;  %v721_v1 = vmul.f32 %v698_v56, %v698_v56 }
 0x240   :  { %v1773_v23 = vpop.f32.mrb[4].mxu1  ;;  %v712_v18 = vadd.f32 %v701_v22, %v698_v56  ;;  %v722_v2 = vmul.f32 %v701_v22, %v701_v22 }
 0x241   :  { %v1774_v5 = vpop.f32.mrb[5].mxu1 }
 0x242   :  { %v1775_v6 = vadd.f32 %v1774_v5, %v1773_v23  ;;  %v1776_v7 = vpop.f32.mrb[6].mxu1  ;;  %v725_v19 = vadd.f32 %v722_v2, %v721_v1 }
 0x243   :  { %v1777_v8 = vpop.f32.mrb[7].mxu1 }
 0x244   :  { %v706_v9 = vadd.f32 %v1875_v59, %v1775_v6  ;;  %v1778_v10 = vadd.f32 %v1777_v8, %v1776_v7 }
 0x246   :  { %v713_v24 = vadd.f32 %v712_v18, %v706_v9  ;;  %v723_v11 = vmul.f32 %v706_v9, %v706_v9  ;;  %v709_v12 = vadd.f32 %v1876_v63, %v1778_v10 }
 0x248   :  { %v726_v13 = vadd.f32 %v725_v19, %v723_v11  ;;  %v714_v14 = vadd.f32 %v713_v24, %v709_v12  ;;  %v724_v15 = vmul.f32 %v709_v12, %v709_v12 }
 0x24a   :  { %v715_v25 = vrot.slane %v714_v14, 4  ;;  %v727_v16 = vadd.f32 %v726_v13, %v724_v15 }
 0x24c   :  { %v716_v17 = vadd.f32 %v715_v25, %v714_v14  ;;  %v728_v21 = vrot.slane %v727_v16, 4 }
 0x24e   :  { %v717_v28 = vrot.slane %v716_v17, 2  ;;  %v729_v29 = vadd.f32 %v728_v21, %v727_v16 }
 0x250   :  { %v718_v30 = vadd.f32 %v717_v28, %v716_v17  ;;  %v730_v31 = vrot.slane %v729_v29, 2 }
 0x252   :  { %v719_v32 = vrot.slane %v718_v30, 1  ;;  %v731_v33 = vadd.f32 %v730_v31, %v729_v29 }
 0x254   :  { %v720_v34 = vadd.f32 %v719_v32, %v718_v30  ;;  %v732_v35 = vrot.slane %v731_v33, 1 }
 0x256   :  { %v733_v36 = vadd.f32 %v732_v35, %v731_v33  ;;  %v734_v38 = vmul.f32 0.03125, %v720_v34 }
 0x258   :  { %v735_v39 = vmul.f32 0.03125, %v733_v36  ;;  %v736_v41 = vmul.f32 %v734_v38, %v734_v38 }
 0x25a   :  { %v737_v42 = vsub.f32 %v735_v39, %v736_v41 }
 0x25c   :  { %v738_v44 = vmax.f32 %v737_v42, 0.0 }
 0x25e   :  { %v739_v45 = vadd.f32 1e-05, %v738_v44 }
 0x260   :  { %2002 = vrsqrt.f32 %v739_v45 }
 0x26a   :  { %v2003_v46 = vpop.eup %2002 }
 0x26b   :  { %v741_v43 = vmul.f32 %v2003_v46, %v2200_v4 }
 0x26d   :  { %v742_v47 = vmul.f32 %v741_v43, %v734_v38  ;;  %v750_v48 = vrot.slane %v741_v43, %v749_v40 }
 0x26f   :  { %v744_v51 = vrot.slane %v742_v47, 7  ;;  %v754_v52 = vmul.f32 %v750_v48, %v709_v12  ;;  %v751_v53 = vmul.f32 %v750_v48, %v698_v56  ;;  %v752_v49 = vmul.f32 %v750_v48, %v701_v22 }
 0x270   :  { %v753_v54 = vmul.f32 %v750_v48, %v706_v9 }
 0x271   :  { %v746_v55 = vsub.f32 %v2200_v4, %v744_v51 }
 0x273   :  { %v758_v57 = vrot.slane %v746_v55, %v757_v50 }
 0x275   :  { %v2312_v58 = vadd.f32 %v758_v57, %v754_v52  ;;  %v2314_v59 = vadd.f32 %v758_v57, %v751_v53  ;;  %v2316_v60 = vadd.f32 %v758_v57, %v752_v49  ;;  %v2318_v61 = vadd.f32 %v758_v57, %v753_v54 }
 0x277   :  { %v2321_v62 = vmul.f32 0.70710677, %v2312_v58  ;;  %v2324_v63 = vmul.f32 0.70710677, %v2314_v59  ;;  %v2327_v56 = vmul.f32 0.70710677, %v2316_v60 }
 0x278   :  { %v2331_v0 = vmul.f32 0.70710677, %v2318_v61 }
 0x279   :  { %v774_v4 = vand.u32 2147483647, %v2321_v62  ;;  %v771_v22 = vand.u32 2147483647, %v2324_v63  ;;  %v772_v23 = vand.u32 2147483647, %v2327_v56 }
 0x27a   :  { %v773_v18 = vand.u32 2147483647, %v2331_v0  ;;  %vm854_vm10 = vcmp.ge.f32.partialorder %v2321_v62, 0.0  ;;  %vm851_vm11 = vcmp.ge.f32.partialorder %v2324_v63, 0.0  ;;  %vm852_vm12 = vcmp.ge.f32.partialorder %v2327_v56, 0.0 }
 0x27b   :  { %v778_v1 = vmul.f32 0.3275911, %v774_v4  ;;  %v775_v2 = vmul.f32 0.3275911, %v771_v22  ;;  %v776_v5 = vmul.f32 0.3275911, %v772_v23 }
 0x27c   :  { %v777_v7 = vmul.f32 0.3275911, %v773_v18  ;;  %v830_v10 = vsub.f32 0.0, %v774_v4  ;;  %v827_v24 = vsub.f32 0.0, %v771_v22  ;;  %v828_v11 = vsub.f32 0.0, %v772_v23 }
 0x27d   :  { %v782_v6 = vadd.f32 1.0, %v778_v1  ;;  %v779_v19 = vadd.f32 1.0, %v775_v2  ;;  %v780_v8 = vadd.f32 1.0, %v776_v5  ;;  %v829_v17 = vsub.f32 0.0, %v773_v18 }
 0x27e   :  { %v781_v9 = vadd.f32 1.0, %v777_v7  ;;  %v834_v13 = vmul.f32 %v830_v10, %v774_v4  ;;  %v831_v25 = vmul.f32 %v827_v24, %v771_v22  ;;  %v832_v29 = vmul.f32 %v828_v11, %v772_v23 }
 0x27f   :  { %2004 = vrcp.f32 %v782_v6  ;;  %v833_v39 = vmul.f32 %v829_v17, %v773_v18  ;;  %vm853_vm13 = vcmp.ge.f32.partialorder %v2331_v0, 0.0  ;;  %v765_v56 = vmul.f32 0.5, %v2318_v61  ;;  %v1961_v0 = vld [vmem:[%s2540_s4] sm:$0xff]  }
 0x280   :  { %2006 = vrcp.f32 %v779_v19  ;;  %v841_v30 = vmul.f32 1.442695, %v834_v13  ;;  %v835_v34 = vmul.f32 1.442695, %v831_v25  ;;  %v837_v42 = vmul.f32 1.442695, %v832_v29 }
 0x281   :  { %2008 = vrcp.f32 %v780_v8  ;;  %v839_v50 = vmul.f32 1.442695, %v833_v39  ;;  %v1962_v61 = vld [vmem:[%s2540_s4 + $0x80] sm:$0xff]  }
 0x282   :  { %2010 = vrcp.f32 %v781_v9  ;;  %1897 = vmatprep.subr.bf16.mxu1 %v1962_v61 }
 0x283   :  { %2012 = vpow2.f32 %v841_v30 }
 0x284   :  { %2014 = vpow2.f32 %v835_v34 }
 0x285   :  { %2016 = vpow2.f32 %v837_v42 }
 0x286   :  { %2018 = vpow2.f32 %v839_v50  ;;  %v1964_v50 = vld [vmem:[%s2540_s4 + $0x8] sm:$0xff]  }
 0x289   :  { %v2005_v12 = vpop.eup %2004 }
 0x28a   :  { %v2007_v14 = vpop.eup %2006  ;;  %v794_v15 = vmul.f32 1.0614054, %v2005_v12 }
 0x28b   :  { %v791_v16 = vmul.f32 1.0614054, %v2007_v14  ;;  %v2009_v21 = vpop.eup %2008 }
 0x28c   :  { %v798_v28 = vadd.f32 -1.4531521, %v794_v15  ;;  %v792_v31 = vmul.f32 1.0614054, %v2009_v21  ;;  %v2011_v35 = vpop.eup %2010 }
 0x28d   :  { %v795_v32 = vadd.f32 -1.4531521, %v791_v16  ;;  %v793_v44 = vmul.f32 1.0614054, %v2011_v35  ;;  %v2013_v6 = vpop.eup %2012 }
 0x28e   :  { %v802_v33 = vmul.f32 %v2005_v12, %v798_v28  ;;  %v796_v36 = vadd.f32 -1.4531521, %v792_v31  ;;  %v2015_v8 = vpop.eup %2014 }
 0x28f   :  { %v799_v38 = vmul.f32 %v2007_v14, %v795_v32  ;;  %v797_v43 = vadd.f32 -1.4531521, %v793_v44  ;;  %v2017_v13 = vpop.eup %2016 }
 0x290   :  { %v806_v41 = vadd.f32 1.4214138, %v802_v33  ;;  %v800_v45 = vmul.f32 %v2009_v21, %v796_v36  ;;  %v2019_v30 = vpop.eup %2018 }
 0x291   :  { %v803_v40 = vadd.f32 1.4214138, %v799_v38  ;;  %v801_v52 = vmul.f32 %v2011_v35, %v797_v43 }
 0x292   :  { %v810_v46 = vmul.f32 %v2005_v12, %v806_v41  ;;  %v804_v47 = vadd.f32 1.4214138, %v800_v45  ;;  %v766_v45 = vmul.f32 0.5, %v2312_v58  ;;  %v1960_v58 = vld [vmem:[%s2540_s4 + $0x40] sm:$0xff]  }
 0x293   :  { %v807_v48 = vmul.f32 %v2007_v14, %v803_v40  ;;  %v805_v55 = vadd.f32 1.4214138, %v801_v52  ;;  %1799 = vmatprep.subr.bf16.mxu0 %v1960_v58  ;;  %v1966_v52 = vld [vmem:[%s2540_s4 + $0x50] sm:$0xff]  }
 0x294   :  { %v814_v51 = vadd.f32 -0.28449672, %v810_v46  ;;  %v808_v53 = vmul.f32 %v2009_v21, %v804_v47  ;;  %1800 = vmatpush3.bf16.msra.mxu0 %v1961_v0  ;;  %v1023_v0 = vsub.s32 4, %v2195_v3 }
 0x295   :  { %v811_v49 = vadd.f32 -0.28449672, %v807_v48  ;;  %v809_v23 = vmul.f32 %v2011_v35, %v805_v55  ;;  %v1963_v48 = vld [vmem:[%s2540_s4 + $0x48] sm:$0xff]   ;;  %v1970_v55 = vld [vmem:[%s2540_s4 + $0x18] sm:$0xff]  }
 0x296   :  { %v818_v54 = vmul.f32 %v2005_v12, %v814_v51  ;;  %v812_v57 = vadd.f32 -0.28449672, %v808_v53  ;;  %1801 = vmatprep.subr.bf16.mxu0 %v1963_v48  ;;  %v1965_v51 = vld [vmem:[%s2540_s4 + $0x88] sm:$0xff]   ;;  %v1967_v53 = vld [vmem:[%s2540_s4 + $0x10] sm:$0xff]   ;;  %v2432_v48 = vld [vmem:[%s2538_s5] sm:$0xff] }
 0x297   :  { %v815_v4 = vmul.f32 %v2007_v14, %v811_v49  ;;  %v813_v5 = vadd.f32 -0.28449672, %v809_v23  ;;  %v1968_v49 = vld [vmem:[%s2540_s4 + $0x90] sm:$0xff]   ;;  %v1973_v23 = vld [vmem:[%s2540_s4 + $0x20] sm:$0xff]  }
 0x298   :  { %v822_v22 = vadd.f32 0.2548296, %v818_v54  ;;  %v816_v1 = vmul.f32 %v2009_v21, %v812_v57  ;;  %1802 = vmatpush3.bf16.msra.mxu0 %v1964_v50  ;;  %v1969_v54 = vld [vmem:[%s2540_s4 + $0x58] sm:$0xff]  }
 0x299   :  { %v819_v18 = vadd.f32 0.2548296, %v815_v4  ;;  %v817_v10 = vmul.f32 %v2011_v35, %v813_v5  ;;  %1803 = vmatprep.subr.bf16.mxu0 %v1966_v52  ;;  %v1971_v57 = vld [vmem:[%s2540_s4 + $0x98] sm:$0xff]   ;;  %v1972_v4 = vld [vmem:[%s2540_s4 + $0x60] sm:$0xff]   ;;  %v1978_v5 = vld [vmem:[%s2540_s4 + $0x70] sm:$0xff]  }
 0x29a   :  { %v826_v2 = vmul.f32 %v2005_v12, %v822_v22  ;;  %v820_v7 = vadd.f32 0.2548296, %v816_v1  ;;  %v1974_v22 = vld [vmem:[%s2540_s4 + $0xa0] sm:$0xff]   ;;  %v1975_v1 = vld [vmem:[%s2540_s4 + $0x68] sm:$0xff]  }
 0x29b   :  { %v823_v19 = vmul.f32 %v2007_v14, %v819_v18  ;;  %v821_v25 = vadd.f32 0.2548296, %v817_v10  ;;  %v1976_v18 = vld [vmem:[%s2540_s4 + $0x28] sm:$0xff]  }
 0x29c   :  { %v846_v9 = vmul.f32 %v2013_v6, %v826_v2  ;;  %v824_v24 = vmul.f32 %v2009_v21, %v820_v7  ;;  %v763_v21 = vmul.f32 0.5, %v2314_v59  ;;  %1804 = vmatpush3.bf16.msra.mxu0 %v1967_v53  ;;  %v1977_v2 = vld [vmem:[%s2540_s4 + $0xa8] sm:$0xff]   ;;  %v1980_v6 = vld [vmem:[%s2540_s4 + $0xb0] sm:$0xff]   ;;  %v1031_v53 = vsub.s32 5, %v2195_v3 }
 0x29d   :  { %v843_v11 = vmul.f32 %v2015_v8, %v823_v19  ;;  %v825_v29 = vmul.f32 %v2011_v35, %v821_v25  ;;  %v764_v35 = vmul.f32 0.5, %v2316_v60  ;;  %1805 = vmatprep.subr.bf16.mxu0 %v1969_v54  ;;  %v1979_v7 = vld [vmem:[%s2540_s4 + $0x30] sm:$0xff]   ;;  %v1981_v19 = vld [vmem:[%s2540_s4 + $0x78] sm:$0xff]  }
 0x29e   :  { %v850_v15 = vsub.f32 1.0, %v846_v9  ;;  %v844_v16 = vmul.f32 %v2017_v13, %v824_v24  ;;  %v1982_v8 = vld [vmem:[%s2540_s4 + $0x38] sm:$0xff]  }
 0x29f   :  { %v847_v17 = vsub.f32 1.0, %v843_v11  ;;  %v845_v14 = vmul.f32 %v2019_v30, %v825_v29  ;;  %v1983_v9 = vld [vmem:[%s2540_s4 + $0xb8] sm:$0xff]  }
 0x2a0   :  { %v858_v28 = vsub.f32 0.0, %v850_v15  ;;  %v848_v12 = vsub.f32 1.0, %v844_v16  ;;  %1806 = vmatpush3.bf16.msra.mxu0 %v1970_v55 }
 0x2a1   :  { %v855_v31 = vsub.f32 0.0, %v847_v17  ;;  %v849_v38 = vsub.f32 1.0, %v845_v14  ;;  %1807 = vmatprep.subr.bf16.mxu0 %v1972_v4 }
 0x2a2   :  { %v862_v32 = vsel %vm854_vm10, %v850_v15, %v858_v28  ;;  %v856_v33 = vsub.f32 0.0, %v848_v12 }
 0x2a3   :  { %v859_v34 = vsel %vm851_vm11, %v847_v17, %v855_v31  ;;  %v866_v39 = vadd.f32 1.0, %v862_v32  ;;  %v857_v44 = vsub.f32 0.0, %v849_v38 }
 0x2a4   :  { %v863_v36 = vadd.f32 1.0, %v859_v34  ;;  %v860_v41 = vsel %vm852_vm12, %v848_v12, %v856_v33  ;;  %1808 = vmatpush3.bf16.msra.mxu0 %v1973_v23 }
 0x2a5   :  { %v864_v42 = vadd.f32 1.0, %v860_v41  ;;  %v861_v40 = vsel %vm853_vm13, %v849_v38, %v857_v44  ;;  %v2347_v59 = vmul.f32 %v866_v39, %v766_v45  ;;  %1809 = vmatprep.subr.bf16.mxu0 %v1975_v1 }
 0x2a6   :  { %v2341_v62 = vmul.f32 %v863_v36, %v763_v21  ;;  %v865_v46 = vadd.f32 1.0, %v861_v40 }
 0x2a7   :  { %v2345_v63 = vmul.f32 %v864_v42, %v764_v35 }
 0x2a8   :  { %v2352_v60 = vmul.f32 %v865_v46, %v765_v56  ;;  %1810 = vmatpush3.bf16.msra.mxu0 %v1976_v18 }
 0x2a9   :  { %v871_v43 = vpack.c.bf16 %v2345_v63, %v2341_v62  ;;  %1811 = vmatprep.subr.bf16.mxu0 %v1978_v5 }
 0x2aa   :  { %v872_v47 = vpack.c.bf16 %v2347_v59, %v2352_v60 }
 0x2ab   :  { %1893 = vmatprep.mubr.bf16.mxu1 %v871_v43 }
 0x2ac   :  { %1894 = vmatmul.mubr.bf16.vlgmr.msra.gmra.mrb[8].mxu1 %v872_v47  ;;  %1812 = vmatpush3.bf16.msra.mxu0 %v1979_v7 }
 0x2ad   :  { %1898 = vmatpush3.bf16.msra.mxu1 %v1962_v61  ;;  %1813 = vmatprep.subr.bf16.mxu0 %v1981_v19 }
 0x2ae   :  { %1899 = vmatprep.subr.bf16.mxu1 %v1965_v51 }
 0x2b0   :  { %1814 = vmatpush3.bf16.msra.mxu0 %v1982_v8 }
 0x2b1   :  { %1900 = vmatpush3.bf16.msra.mxu1 %v1965_v51 }
 0x2b2   :  { %1901 = vmatprep.subr.bf16.mxu1 %v1968_v49 }
 0x2b5   :  { %1902 = vmatpush3.bf16.msra.mxu1 %v1968_v49 }
 0x2b6   :  { %1903 = vmatprep.subr.bf16.mxu1 %v1971_v57 }
 0x2b9   :  { %1904 = vmatpush3.bf16.msra.mxu1 %v1971_v57 }
 0x2ba   :  { %1905 = vmatprep.subr.bf16.mxu1 %v1974_v22 }
 0x2bd   :  { %1906 = vmatpush3.bf16.msra.mxu1 %v1974_v22 }
 0x2be   :  { %1907 = vmatprep.subr.bf16.mxu1 %v1977_v2 }
 0x2c1   :  { %1908 = vmatpush3.bf16.msra.mxu1 %v1977_v2 }
 0x2c2   :  { %1909 = vmatprep.subr.bf16.mxu1 %v1980_v6 }
 0x2c5   :  { %1910 = vmatpush3.bf16.msra.mxu1 %v1980_v6 }
 0x2c6   :  { %1911 = vmatprep.subr.bf16.mxu1 %v1983_v9 }
 0x2c9   :  { %1912 = vmatpush3.bf16.msra.mxu1 %v1983_v9 }
 0x37f   :  { %v1895_v10 = vpop.f32.mrb[8].mxu1 }
 0x380   :  { %v971_v24 = vpop.f32.mrb[9].mxu1  ;;  %v997_v17 = vmul.f32 %v1895_v10, %v1895_v10 }
 0x381   :  { %v1896_v11 = vpop.f32.mrb[10].mxu1  ;;  %v995_v15 = vmul.f32 %v971_v24, %v971_v24 }
 0x382   :  { %v974_v13 = vpop.f32.mrb[11].mxu1  ;;  %v998_v30 = vmul.f32 %v1896_v11, %v1896_v11 }
 0x383   :  { %v986_v25 = vadd.f32 %v974_v13, %v971_v24  ;;  %v996_v16 = vmul.f32 %v974_v13, %v974_v13 }
 0x385   :  { %v987_v28 = vadd.f32 %v1895_v10, %v986_v25  ;;  %v999_v29 = vadd.f32 %v996_v16, %v995_v15 }
 0x387   :  { %v988_v12 = vadd.f32 %v1896_v11, %v987_v28  ;;  %v1000_v31 = vadd.f32 %v999_v29, %v997_v17 }
 0x389   :  { %v989_v32 = vrot.slane %v988_v12, 4  ;;  %v1001_v14 = vadd.f32 %v1000_v31, %v998_v30 }
 0x38b   :  { %v990_v33 = vadd.f32 %v989_v32, %v988_v12  ;;  %v1002_v34 = vrot.slane %v1001_v14, 4 }
 0x38d   :  { %v991_v21 = vrot.slane %v990_v33, 2  ;;  %v1003_v36 = vadd.f32 %v1002_v34, %v1001_v14 }
 0x38f   :  { %v992_v38 = vadd.f32 %v991_v21, %v990_v33  ;;  %v1004_v39 = vrot.slane %v1003_v36, 2 }
 0x391   :  { %v993_v41 = vrot.slane %v992_v38, 1  ;;  %v1005_v35 = vadd.f32 %v1004_v39, %v1003_v36 }
 0x393   :  { %v994_v42 = vadd.f32 %v993_v41, %v992_v38  ;;  %v1006_v44 = vrot.slane %v1005_v35, 1 }
 0x395   :  { %v1007_v45 = vadd.f32 %v1006_v44, %v1005_v35  ;;  %v1008_v40 = vmul.f32 0.03125, %v994_v42 }
 0x397   :  { %v1009_v56 = vmul.f32 0.03125, %v1007_v45  ;;  %v1010_v46 = vmul.f32 %v1008_v40, %v1008_v40 }
 0x399   :  { %v1011_v43 = vsub.f32 %v1009_v56, %v1010_v46 }
 0x39b   :  { %v1012_v47 = vmax.f32 %v1011_v43, 0.0 }
 0x39d   :  { %v1013_v58 = vadd.f32 1e-05, %v1012_v47 }
 0x39f   :  { %2020 = vrsqrt.f32 %v1013_v58 }
 0x3a9   :  { %v2021_v61 = vpop.eup %2020 }
 0x3aa   :  { %v1015_v50 = vmul.f32 %v2432_v48, %v2021_v61 }
 0x3ac   :  { %v1016_v51 = vmul.f32 %v1015_v50, %v1008_v40  ;;  %v1024_v52 = vrot.slane %v1015_v50, %v1023_v0 }
 0x3ae   :  { %v1018_v49 = vrot.slane %v1016_v51, 7  ;;  %v1026_v54 = vmul.f32 %v1024_v52, %v974_v13  ;;  %v1027_v55 = vmul.f32 %v1895_v10, %v1024_v52  ;;  %v1028_v57 = vmul.f32 %v1896_v11, %v1024_v52 }
 0x3af   :  { %v1025_v4 = vmul.f32 %v1024_v52, %v971_v24 }
 0x3b0   :  { %v1020_v22 = vsub.f32 %v2432_v48, %v1018_v49 }
 0x3b2   :  { %v1032_v23 = vrot.slane %v1020_v22, %v1031_v53 }
 0x3b4   :  { %v2437_v1 = vadd.f32 %v1032_v23, %v1026_v54  ;;  %v2439_v18 = vadd.f32 %v1032_v23, %v1028_v57  ;;  %v2441_v2 = vadd.f32 %v1032_v23, %v1025_v4  ;;  %v2443_v5 = vadd.f32 %v1032_v23, %v1027_v55 }
 0x3b6   :  { %v2446_v6 = vmul.f32 0.70710677, %v2437_v1  ;;  %v2449_v7 = vmul.f32 0.70710677, %v2439_v18  ;;  %v2452_v19 = vmul.f32 0.70710677, %v2441_v2 }
 0x3b7   :  { %v2455_v8 = vmul.f32 0.70710677, %v2443_v5 }
 0x3b8   :  { %v1046_v9 = vand.u32 2147483647, %v2446_v6  ;;  %v1048_v10 = vand.u32 2147483647, %v2449_v7  ;;  %v1045_v24 = vand.u32 2147483647, %v2452_v19 }
 0x3b9   :  { %v1047_v11 = vand.u32 2147483647, %v2455_v8  ;;  %vm1126_vm14 = vcmp.ge.f32.partialorder %v2446_v6, 0.0  ;;  %vm1128_vm15 = vcmp.ge.f32.partialorder %v2449_v7, 0.0  ;;  %vm1125_vm0 = vcmp.ge.f32.partialorder %v2452_v19, 0.0 }
 0x3ba   :  { %v1050_v13 = vmul.f32 0.3275911, %v1046_v9  ;;  %v1052_v15 = vmul.f32 0.3275911, %v1048_v10  ;;  %v1049_v25 = vmul.f32 0.3275911, %v1045_v24 }
 0x3bb   :  { %v1051_v28 = vmul.f32 0.3275911, %v1047_v11  ;;  %v1102_v12 = vsub.f32 0.0, %v1046_v9  ;;  %v1104_v31 = vsub.f32 0.0, %v1048_v10  ;;  %v1101_v33 = vsub.f32 0.0, %v1045_v24 }
 0x3bc   :  { %v1054_v16 = vadd.f32 1.0, %v1050_v13  ;;  %v1056_v17 = vadd.f32 1.0, %v1052_v15  ;;  %v1053_v29 = vadd.f32 1.0, %v1049_v25  ;;  %v1103_v39 = vsub.f32 0.0, %v1047_v11 }
 0x3bd   :  { %v1055_v30 = vadd.f32 1.0, %v1051_v28  ;;  %v1106_v14 = vmul.f32 %v1102_v12, %v1046_v9  ;;  %v1108_v21 = vmul.f32 %v1104_v31, %v1048_v10  ;;  %v1105_v44 = vmul.f32 %v1101_v33, %v1045_v24 }
 0x3be   :  { %2022 = vrcp.f32 %v1054_v16  ;;  %v1107_v58 = vmul.f32 %v1103_v39, %v1047_v11  ;;  %vm1127_vm1 = vcmp.ge.f32.partialorder %v2455_v8, 0.0 }
 0x3bf   :  { %2024 = vrcp.f32 %v1056_v17  ;;  %v1111_v42 = vmul.f32 1.442695, %v1106_v14  ;;  %v1115_v40 = vmul.f32 1.442695, %v1108_v21  ;;  %v1109_v51 = vmul.f32 1.442695, %v1105_v44 }
 0x3c0   :  { %2026 = vrcp.f32 %v1053_v29  ;;  %v1113_v57 = vmul.f32 1.442695, %v1107_v58 }
 0x3c1   :  { %2028 = vrcp.f32 %v1055_v30 }
 0x3c2   :  { %2030 = vpow2.f32 %v1111_v42 }
 0x3c3   :  { %2032 = vpow2.f32 %v1115_v40 }
 0x3c4   :  { %2034 = vpow2.f32 %v1109_v51 }
 0x3c5   :  { %2036 = vpow2.f32 %v1113_v57  ;;  %v1037_v57 = vmul.f32 0.5, %v2441_v2 }
 0x3c8   :  { %v2023_v32 = vpop.eup %2022 }
 0x3c9   :  { %v2025_v34 = vpop.eup %2024  ;;  %v1066_v36 = vmul.f32 1.0614054, %v2023_v32 }
 0x3ca   :  { %v1068_v38 = vmul.f32 1.0614054, %v2025_v34  ;;  %v2027_v35 = vpop.eup %2026 }
 0x3cb   :  { %v1070_v41 = vadd.f32 -1.4531521, %v1066_v36  ;;  %v1065_v56 = vmul.f32 1.0614054, %v2027_v35  ;;  %v2029_v43 = vpop.eup %2028 }
 0x3cc   :  { %v1072_v45 = vadd.f32 -1.4531521, %v1068_v38  ;;  %v1067_v50 = vmul.f32 1.0614054, %v2029_v43  ;;  %v2031_v12 = vpop.eup %2030 }
 0x3cd   :  { %v1074_v46 = vmul.f32 %v2023_v32, %v1070_v41  ;;  %v1069_v0 = vadd.f32 -1.4531521, %v1065_v56  ;;  %v2033_v14 = vpop.eup %2032 }
 0x3ce   :  { %v1076_v47 = vmul.f32 %v2025_v34, %v1072_v45  ;;  %v1071_v54 = vadd.f32 -1.4531521, %v1067_v50  ;;  %v2035_v44 = vpop.eup %2034 }
 0x3cf   :  { %v1078_v61 = vadd.f32 1.4214138, %v1074_v46  ;;  %v1073_v53 = vmul.f32 %v2027_v35, %v1069_v0 }
 0x3d0   :  { %v1080_v52 = vadd.f32 1.4214138, %v1076_v47  ;;  %v1075_v23 = vmul.f32 %v2029_v43, %v1071_v54  ;;  %v2037_v47 = vpop.eup %2036 }
 0x3d1   :  { %v1082_v49 = vmul.f32 %v2023_v32, %v1078_v61  ;;  %v1077_v4 = vadd.f32 1.4214138, %v1073_v53  ;;  %v1038_v61 = vmul.f32 0.5, %v2437_v1  ;;  %v1039_v1 = vmul.f32 0.5, %v2443_v5 }
 0x3d2   :  { %v1084_v55 = vmul.f32 %v2025_v34, %v1080_v52  ;;  %v1079_v11 = vadd.f32 1.4214138, %v1075_v23  ;;  %v1040_v52 = vmul.f32 0.5, %v2439_v18 }
 0x3d3   :  { %v1086_v22 = vadd.f32 -0.28449672, %v1082_v49  ;;  %v1081_v10 = vmul.f32 %v2027_v35, %v1077_v4 }
 0x3d4   :  { %v1088_v9 = vadd.f32 -0.28449672, %v1084_v55  ;;  %v1083_v16 = vmul.f32 %v2029_v43, %v1079_v11 }
 0x3d5   :  { %v1090_v24 = vmul.f32 %v2023_v32, %v1086_v22  ;;  %v1085_v15 = vadd.f32 -0.28449672, %v1081_v10 }
 0x3d6   :  { %v1092_v13 = vmul.f32 %v2025_v34, %v1088_v9  ;;  %v1087_v30 = vadd.f32 -0.28449672, %v1083_v16 }
 0x3d7   :  { %v1094_v25 = vadd.f32 0.2548296, %v1090_v24  ;;  %v1089_v28 = vmul.f32 %v2027_v35, %v1085_v15 }
 0x3d8   :  { %v1096_v17 = vadd.f32 0.2548296, %v1092_v13  ;;  %v1091_v36 = vmul.f32 %v2029_v43, %v1087_v30 }
 0x3d9   :  { %v1098_v29 = vmul.f32 %v2023_v32, %v1094_v25  ;;  %v1093_v33 = vadd.f32 0.2548296, %v1089_v28 }
 0x3da   :  { %v1100_v31 = vmul.f32 %v2025_v34, %v1096_v17  ;;  %v1095_v42 = vadd.f32 0.2548296, %v1091_v36 }
 0x3db   :  { %v1118_v21 = vmul.f32 %v2031_v12, %v1098_v29  ;;  %v1097_v39 = vmul.f32 %v2027_v35, %v1093_v33 }
 0x3dc   :  { %v1120_v38 = vmul.f32 %v2033_v14, %v1100_v31  ;;  %v1099_v46 = vmul.f32 %v2029_v43, %v1095_v42 }
 0x3dd   :  { %v1122_v41 = vsub.f32 1.0, %v1118_v21  ;;  %v1117_v40 = vmul.f32 %v2035_v44, %v1097_v39 }
 0x3de   :  { %v1124_v45 = vsub.f32 1.0, %v1120_v38  ;;  %v1119_v34 = vmul.f32 %v2037_v47, %v1099_v46 }
 0x3df   :  { %v1130_v56 = vsub.f32 0.0, %v1122_v41  ;;  %v1121_v58 = vsub.f32 1.0, %v1117_v40 }
 0x3e0   :  { %v1132_v32 = vsub.f32 0.0, %v1124_v45  ;;  %v1123_v49 = vsub.f32 1.0, %v1119_v34 }
 0x3e1   :  { %v1134_v0 = vsel %vm1126_vm14, %v1122_v41, %v1130_v56  ;;  %v1129_v51 = vsub.f32 0.0, %v1121_v58 }
 0x3e2   :  { %v1138_v50 = vadd.f32 1.0, %v1134_v0  ;;  %v1136_v35 = vsel %vm1128_vm15, %v1124_v45, %v1132_v32  ;;  %v1131_v55 = vsub.f32 0.0, %v1123_v49 }
 0x3e3   :  { %v1140_v53 = vadd.f32 1.0, %v1136_v35  ;;  %v1133_v54 = vsel %vm1125_vm0, %v1121_v58, %v1129_v51 }
 0x3e4   :  { %v1142_v43 = vmul.f32 %v1138_v50, %v1038_v61  ;;  %v1137_v4 = vadd.f32 1.0, %v1133_v54  ;;  %v1135_v22 = vsel %vm1127_vm1, %v1123_v49, %v1131_v55 }
 0x3e5   :  { %v1144_v6 = vmul.f32 %v1140_v53, %v1040_v52  ;;  %v1139_v18 = vadd.f32 1.0, %v1135_v22 }
 0x3e6   :  { %v1146_v7 = vrot.slane %v1142_v43, 7  ;;  %v1141_v23 = vmul.f32 %v1137_v4, %v1037_v57  ;;  %v1158_v10 = vrot.slane %v1142_v43, 1 }
 0x3e7   :  { %v1148_v9 = vrot.slane %v1144_v6, 7  ;;  %v1160_v24 = vrot.slane %v1144_v6, 1  ;;  %v1143_v13 = vmul.f32 %v1139_v18, %v1039_v1 }
 0x3e8   :  { %v1170_v11 = vpack.c.bf16 %v1142_v43, %v1141_v23  ;;  %v1145_v19 = vrot.slane %v1141_v23, 7  ;;  %v1157_v15 = vrot.slane %v1141_v23, 1 }
 0x3e9   :  { %v1159_v25 = vrot.slane %v1143_v13, 1  ;;  %v1173_v17 = vpack.c.bf16 %v1144_v6, %v1143_v13  ;;  %v1147_v29 = vrot.slane %v1143_v13, 7 }
 0x3ea   :  { %1399 = vmatprep.mubr.bf16.mxu0 %v1170_v11  ;;  %v1151_v2 = vsel %vm394_vm2, %v1145_v19, %v1146_v7  ;;  %v1152_v8 = vsel %vm394_vm2, %v1148_v9, %v1145_v19  ;;  %v1163_v5 = vsel %vm407_vm5, %v1157_v15, %v1158_v10  ;;  %v1164_v28 = vsel %vm407_vm5, %v1160_v24, %v1157_v15 }
 0x3eb   :  { %v1153_v16 = vmul.f32 %v2254_v20, %v1152_v8  ;;  %v1162_v30 = vsel %vm407_vm5, %v1158_v10, %v1159_v25  ;;  %v1161_v12 = vsel %vm407_vm5, %v1159_v25, %v1160_v24  ;;  %v1168_v31 = vmul.f32 %v2262_v26, %v1164_v28 }
 0x3ec   :  { %v1166_v33 = vmul.f32 %v2264_v27, %v1162_v30  ;;  %v1149_v21 = vsel %vm394_vm2, %v1147_v29, %v1148_v9  ;;  %v1150_v20 = vsel %vm394_vm2, %v1146_v7, %v1147_v29 }
 0x3ed   :  { %v1169_v14 = vpack.c.bf16 %v1151_v2, %v1153_v16  ;;  %v1174_v36 = vpack.c.bf16 %v1168_v31, %v1161_v12  ;;  %v1155_v38 = vmul.f32 %v2276_v37, %v1150_v20  ;;  %v1502_v12 = vsub.s32 6, %v2195_v3 }
 0x3ee   :  { %v1171_v39 = vpack.c.bf16 %v1166_v33, %v1163_v5  ;;  %v1510_v20 = vsub.s32 7, %v2195_v3 }
 0x3ef   :  { %1400 = vmatmul.mubr.bf16.vlgmr.msra.gmra.mrb[8].mxu0 %v1169_v14  ;;  %v1172_v41 = vpack.c.bf16 %v1149_v21, %v1155_v38 }
 0x3f0   :  { %1407 = vmatprep.mubr.bf16.mxu0 %v1173_v17  ;;  %1913 = vmatprep.mubr.bf16.mxu1 %v1171_v39 }
 0x3f1   :  { %1914 = vmatmul.mubr.bf16.vlgmr.msra.gmra.mrb[12].mxu1 %v1174_v36 }
 0x3f7   :  { %1408 = vmatmul.mubr.bf16.gmra.mrb[12].mxu0 %v1172_v41 }
 0x4c2   :  { %v1815_v26 = vpop.f32.mrb[8].mxu0 }
 0x4c3   :  { %v1816_v42 = vpop.f32.mrb[9].mxu0 }
 0x4c4   :  { %v1817_v44 = vadd.f32 %v1816_v42, %v1815_v26  ;;  %v1818_v27 = vpop.f32.mrb[10].mxu0  ;;  %v1915_v45 = vpop.f32.mrb[12].mxu1 }
 0x4c5   :  { %v1819_v40 = vpop.f32.mrb[11].mxu0  ;;  %v1450_v56 = vpop.f32.mrb[13].mxu1 }
 0x4c6   :  { %v1820_v46 = vadd.f32 %v1819_v40, %v1818_v27  ;;  %v1451_v47 = vadd.f32 %v1817_v44, %v1450_v56  ;;  %v1916_v32 = vpop.f32.mrb[14].mxu1 }
 0x4c7   :  { %v1453_v58 = vpop.f32.mrb[15].mxu1 }
 0x4c8   :  { %v1454_v0 = vadd.f32 %v1820_v46, %v1453_v58  ;;  %v1474_v34 = vmul.f32 %v1451_v47, %v1451_v47 }
 0x4ca   :  { %v1821_v37 = vpop.f32.mrb[12].mxu0  ;;  %v1465_v61 = vadd.f32 %v1454_v0, %v1451_v47  ;;  %v1475_v50 = vmul.f32 %v1454_v0, %v1454_v0 }
 0x4cb   :  { %v1822_v35 = vpop.f32.mrb[13].mxu0 }
 0x4cc   :  { %v1823_v51 = vadd.f32 %v1822_v35, %v1821_v37  ;;  %v1824_v52 = vpop.f32.mrb[14].mxu0  ;;  %v1478_v53 = vadd.f32 %v1475_v50, %v1474_v34 }
 0x4cd   :  { %v1825_v49 = vpop.f32.mrb[15].mxu0 }
 0x4ce   :  { %v1459_v43 = vadd.f32 %v1915_v45, %v1823_v51  ;;  %v1826_v54 = vadd.f32 %v1825_v49, %v1824_v52 }
 0x4d0   :  { %v1466_v6 = vadd.f32 %v1465_v61, %v1459_v43  ;;  %v1476_v55 = vmul.f32 %v1459_v43, %v1459_v43  ;;  %v1462_v57 = vadd.f32 %v1916_v32, %v1826_v54 }
 0x4d2   :  { %v1479_v4 = vadd.f32 %v1478_v53, %v1476_v55  ;;  %v1467_v7 = vadd.f32 %v1466_v6, %v1462_v57  ;;  %v1477_v1 = vmul.f32 %v1462_v57, %v1462_v57 }
 0x4d4   :  { %v1468_v22 = vrot.slane %v1467_v7, 4  ;;  %v1480_v23 = vadd.f32 %v1479_v4, %v1477_v1 }
 0x4d6   :  { %v1469_v9 = vadd.f32 %v1468_v22, %v1467_v7  ;;  %v1481_v18 = vrot.slane %v1480_v23, 4 }
 0x4d8   :  { %v1470_v10 = vrot.slane %v1469_v9, 2  ;;  %v1482_v24 = vadd.f32 %v1481_v18, %v1480_v23 }
 0x4da   :  { %v1471_v11 = vadd.f32 %v1470_v10, %v1469_v9  ;;  %v1483_v19 = vrot.slane %v1482_v24, 2 }
 0x4dc   :  { %v1472_v13 = vrot.slane %v1471_v11, 1  ;;  %v1484_v15 = vadd.f32 %v1483_v19, %v1482_v24 }
 0x4de   :  { %v1473_v2 = vadd.f32 %v1472_v13, %v1471_v11  ;;  %v1485_v8 = vrot.slane %v1484_v15, 1 }
 0x4e0   :  { %v1486_v25 = vadd.f32 %v1485_v8, %v1484_v15  ;;  %v1487_v5 = vmul.f32 0.03125, %v1473_v2 }
 0x4e2   :  { %v1488_v16 = vmul.f32 0.03125, %v1486_v25  ;;  %v1489_v17 = vmul.f32 %v1487_v5, %v1487_v5 }
 0x4e4   :  { %v1490_v28 = vsub.f32 %v1488_v16, %v1489_v17 }
 0x4e6   :  { %v1491_v29 = vmax.f32 %v1490_v28, 0.0 }
 0x4e8   :  { %v1492_v30 = vadd.f32 1e-05, %v1491_v29 }
 0x4ea   :  { %2038 = vrsqrt.f32 %v1492_v30 }
 0x4f4   :  { %v2039_v31 = vpop.eup %2038 }
 0x4f5   :  { %v1494_v14 = vmul.f32 %v2432_v48, %v2039_v31 }
 0x4f7   :  { %v1495_v33 = vmul.f32 %v1494_v14, %v1487_v5  ;;  %v1503_v21 = vrot.slane %v1494_v14, %v1502_v12 }
 0x4f9   :  { %v1497_v36 = vrot.slane %v1495_v33, 7  ;;  %v1504_v38 = vmul.f32 %v1503_v21, %v1451_v47  ;;  %v1505_v39 = vmul.f32 %v1503_v21, %v1454_v0  ;;  %v1506_v41 = vmul.f32 %v1503_v21, %v1459_v43 }
 0x4fa   :  { %v1507_v26 = vmul.f32 %v1503_v21, %v1462_v57 }
 0x4fb   :  { %v1499_v42 = vsub.f32 %v2432_v48, %v1497_v36 }
 0x4fd   :  { %v1511_v44 = vrot.slane %v1499_v42, %v1510_v20 }
 0x4ff   :  { %v2493_v27 = vadd.f32 %v1511_v44, %v1504_v38  ;;  %v2495_v45 = vadd.f32 %v1511_v44, %v1505_v39  ;;  %v2497_v40 = vadd.f32 %v1511_v44, %v1506_v41  ;;  %v2499_v56 = vadd.f32 %v1511_v44, %v1507_v26 }
 0x501   :  { %v2502_v46 = vmul.f32 0.70710677, %v2493_v27  ;;  %v2505_v3 = vmul.f32 0.70710677, %v2495_v45  ;;  %v2508_v47 = vmul.f32 0.70710677, %v2497_v40 }
 0x502   :  { %v2511_v48 = vmul.f32 0.70710677, %v2499_v56 }
 0x503   :  { %v1524_v32 = vand.u32 2147483647, %v2502_v46  ;;  %v1525_v58 = vand.u32 2147483647, %v2505_v3  ;;  %v1526_v0 = vand.u32 2147483647, %v2508_v47 }
 0x504   :  { %v1527_v37 = vand.u32 2147483647, %v2511_v48  ;;  %vm1604_vm2 = vcmp.ge.f32.partialorder %v2502_v46, 0.0  ;;  %vm1605_vm3 = vcmp.ge.f32.partialorder %v2505_v3, 0.0  ;;  %vm1606_vm4 = vcmp.ge.f32.partialorder %v2508_v47, 0.0 }
 0x505   :  { %v1528_v34 = vmul.f32 0.3275911, %v1524_v32  ;;  %v1529_v61 = vmul.f32 0.3275911, %v1525_v58  ;;  %v1530_v50 = vmul.f32 0.3275911, %v1526_v0 }
 0x506   :  { %v1531_v35 = vmul.f32 0.3275911, %v1527_v37  ;;  %v1580_v43 = vsub.f32 0.0, %v1524_v32  ;;  %v1581_v54 = vsub.f32 0.0, %v1525_v58  ;;  %v1582_v6 = vsub.f32 0.0, %v1526_v0 }
 0x507   :  { %v1532_v51 = vadd.f32 1.0, %v1528_v34  ;;  %v1533_v52 = vadd.f32 1.0, %v1529_v61  ;;  %v1534_v53 = vadd.f32 1.0, %v1530_v50  ;;  %v1583_v55 = vsub.f32 0.0, %v1527_v37 }
 0x508   :  { %v1535_v49 = vadd.f32 1.0, %v1531_v35  ;;  %v1584_v4 = vmul.f32 %v1580_v43, %v1524_v32  ;;  %v1585_v22 = vmul.f32 %v1581_v54, %v1525_v58  ;;  %v1586_v18 = vmul.f32 %v1582_v6, %v1526_v0 }
 0x509   :  { %2040 = vrcp.f32 %v1532_v51  ;;  %v1587_v19 = vmul.f32 %v1583_v55, %v1527_v37  ;;  %vm1607_vm5 = vcmp.ge.f32.partialorder %v2511_v48, 0.0  ;;  %v1518_v46 = vmul.f32 0.5, %v2497_v40 }
 0x50a   :  { %2042 = vrcp.f32 %v1533_v52  ;;  %v1588_v2 = vmul.f32 1.442695, %v1584_v4  ;;  %v1590_v5 = vmul.f32 1.442695, %v1585_v22  ;;  %v1592_v28 = vmul.f32 1.442695, %v1586_v18 }
 0x50b   :  { %2044 = vrcp.f32 %v1534_v53  ;;  %v1594_v12 = vmul.f32 1.442695, %v1587_v19  ;;  %v1519_v3 = vmul.f32 0.5, %v2499_v56 }
 0x50c   :  { %2046 = vrcp.f32 %v1535_v49 }
 0x50d   :  { %2048 = vpow2.f32 %v1588_v2 }
 0x50e   :  { %2050 = vpow2.f32 %v1590_v5 }
 0x50f   :  { %2052 = vpow2.f32 %v1592_v28 }
 0x510   :  { %2054 = vpow2.f32 %v1594_v12 }
 0x513   :  { %v2041_v57 = vpop.eup %2040 }
 0x514   :  { %v2043_v7 = vpop.eup %2042  ;;  %v1544_v1 = vmul.f32 1.0614054, %v2041_v57 }
 0x515   :  { %v2045_v23 = vpop.eup %2044  ;;  %v1545_v9 = vmul.f32 1.0614054, %v2043_v7 }
 0x516   :  { %v2047_v10 = vpop.eup %2046  ;;  %v1546_v24 = vmul.f32 1.0614054, %v2045_v23  ;;  %v1548_v11 = vadd.f32 -1.4531521, %v1544_v1 }
 0x517   :  { %v1547_v13 = vmul.f32 1.0614054, %v2047_v10  ;;  %v1549_v15 = vadd.f32 -1.4531521, %v1545_v9  ;;  %v2049_v51 = vpop.eup %2048 }
 0x518   :  { %v1550_v8 = vadd.f32 -1.4531521, %v1546_v24  ;;  %v1552_v25 = vmul.f32 %v2041_v57, %v1548_v11  ;;  %v2051_v49 = vpop.eup %2050 }
 0x519   :  { %v1551_v16 = vadd.f32 -1.4531521, %v1547_v13  ;;  %v1553_v17 = vmul.f32 %v2043_v7, %v1549_v15  ;;  %v2053_v6 = vpop.eup %2052  ;;  %v1516_v15 = vmul.f32 0.5, %v2493_v27 }
 0x51a   :  { %v1554_v29 = vmul.f32 %v2045_v23, %v1550_v8  ;;  %v1556_v30 = vadd.f32 1.4214138, %v1552_v25  ;;  %v2055_v1 = vpop.eup %2054  ;;  %v1517_v25 = vmul.f32 0.5, %v2495_v45 }
 0x51b   :  { %v1555_v31 = vmul.f32 %v2047_v10, %v1551_v16  ;;  %v1557_v14 = vadd.f32 1.4214138, %v1553_v17 }
 0x51c   :  { %v1558_v33 = vadd.f32 1.4214138, %v1554_v29  ;;  %v1560_v21 = vmul.f32 %v2041_v57, %v1556_v30 }
 0x51d   :  { %v1559_v20 = vadd.f32 1.4214138, %v1555_v31  ;;  %v1561_v36 = vmul.f32 %v2043_v7, %v1557_v14 }
 0x51e   :  { %v1562_v38 = vmul.f32 %v2045_v23, %v1558_v33  ;;  %v1564_v39 = vadd.f32 -0.28449672, %v1560_v21 }
 0x51f   :  { %v1563_v41 = vmul.f32 %v2047_v10, %v1559_v20  ;;  %v1565_v26 = vadd.f32 -0.28449672, %v1561_v36 }
 0x520   :  { %v1566_v42 = vadd.f32 -0.28449672, %v1562_v38  ;;  %v1568_v44 = vmul.f32 %v2041_v57, %v1564_v39 }
 0x521   :  { %v1567_v32 = vadd.f32 -0.28449672, %v1563_v41  ;;  %v1569_v58 = vmul.f32 %v2043_v7, %v1565_v26 }
 0x522   :  { %v1570_v0 = vmul.f32 %v2045_v23, %v1566_v42  ;;  %v1572_v37 = vadd.f32 0.2548296, %v1568_v44 }
 0x523   :  { %v1571_v34 = vmul.f32 %v2047_v10, %v1567_v32  ;;  %v1573_v61 = vadd.f32 0.2548296, %v1569_v58 }
 0x524   :  { %v1574_v50 = vadd.f32 0.2548296, %v1570_v0  ;;  %v1576_v35 = vmul.f32 %v2041_v57, %v1572_v37 }
 0x525   :  { %v1575_v52 = vadd.f32 0.2548296, %v1571_v34  ;;  %v1577_v53 = vmul.f32 %v2043_v7, %v1573_v61 }
 0x526   :  { %v1578_v43 = vmul.f32 %v2045_v23, %v1574_v50  ;;  %v1596_v54 = vmul.f32 %v2049_v51, %v1576_v35 }
 0x527   :  { %v1579_v55 = vmul.f32 %v2047_v10, %v1575_v52  ;;  %v1597_v4 = vmul.f32 %v2051_v49, %v1577_v53 }
 0x528   :  { %v1598_v22 = vmul.f32 %v2053_v6, %v1578_v43  ;;  %v1600_v9 = vsub.f32 1.0, %v1596_v54 }
 0x529   :  { %v1599_v18 = vmul.f32 %v2055_v1, %v1579_v55  ;;  %v1601_v24 = vsub.f32 1.0, %v1597_v4 }
 0x52a   :  { %v1602_v11 = vsub.f32 1.0, %v1598_v22  ;;  %v1608_v19 = vsub.f32 0.0, %v1600_v9 }
 0x52b   :  { %v1603_v13 = vsub.f32 1.0, %v1599_v18  ;;  %v1609_v57 = vsub.f32 0.0, %v1601_v24 }
 0x52c   :  { %v1610_v7 = vsub.f32 0.0, %v1602_v11  ;;  %v1612_v23 = vsel %vm1604_vm2, %v1600_v9, %v1608_v19 }
 0x52d   :  { %v1611_v10 = vsub.f32 0.0, %v1603_v13  ;;  %v1613_v2 = vsel %vm1605_vm3, %v1601_v24, %v1609_v57  ;;  %v1616_v8 = vadd.f32 1.0, %v1612_v23 }
 0x52e   :  { %v1614_v5 = vsel %vm1606_vm4, %v1602_v11, %v1610_v7  ;;  %v1617_v16 = vadd.f32 1.0, %v1613_v2 }
 0x52f   :  { %v1615_v17 = vsel %vm1607_vm5, %v1603_v13, %v1611_v10  ;;  %v1618_v28 = vadd.f32 1.0, %v1614_v5  ;;  %v1620_v27 = vmul.f32 %v1616_v8, %v1516_v15 }
 0x530   :  { %v1619_v29 = vadd.f32 1.0, %v1615_v17  ;;  %v1621_v30 = vmul.f32 %v1617_v16, %v1517_v25 }
 0x531   :  { %v1622_v12 = vmul.f32 %v1618_v28, %v1518_v46  ;;  %v1624_v47 = vadd.f32 %v1620_v27, %v2341_v62 }
 0x532   :  { %v1623_v31 = vmul.f32 %v1619_v29, %v1519_v3  ;;  %v1625_v14 = vadd.f32 %v1621_v30, %v2345_v63 }
 0x533   :  { %v1626_v45 = vadd.f32 %v1622_v12, %v2352_v60 }
 0x534   :  { %v1627_v48 = vadd.f32 %v1623_v31, %v2347_v59  ;;  %v1733_v33 = vpack.c.bf16 %v1625_v14, %v1624_v47 }
 0x536   :  { %1734 = vst [vmem:[%s2541_s6] sm:$0xff] %v1733_v33   ;;  %v1738_v40 = vpack.c.bf16 %v1627_v48, %v1626_v45 }
 0x538   :  { %1740 = vst [vmem:[%s2541_s6 + $0x8] sm:$0xff] %v1738_v40  }

// kernel: encoder_forward.5
= control target key start
LH: loop header
LB: loop body
LE: loop exit
PB: predicated region body
PF: predicated region fallthrough
CT: control target
= control target key end

     0   :  { %8 = vsyncpa [#allocation3], 0  ;;  %s2085_s0 = inlined_call_operand.vmem [shape: bf16[2,2048], index: 0, kind: input, shape index: {}]   ;;  %s2086_s1 = inlined_call_operand.hbm [shape: bf16[2048,128], index: 1, kind: input, shape index: {}]   ;;  %s2087_s2 = inlined_call_operand.vmem [shape: f32[1,128], index: 2, kind: input, shape index: {}]   ;;  %s2088_s3 = inlined_call_operand.hbm [shape: f32[2,128], index: 3, kind: output, shape index: {}]  }
   0x1   :  { %9 = vsyncpa [#allocation4], 0  ;;  %s2003_s12 = smov [#allocation2]   ;;  %s1955_s16 = scalar_lea.hbm %s2086_s1, 16384 }
   0x2   :  { %s17_s13 = sshll.u32 %s2003_s12, 4  ;;  %p1956_p0 = scmp.ne.s32.totalorder %s2086_s1, %s1955_s16  ;;  %s18_s13 = int_to_ptr.vmem [resolvable:$true] %s17_s13 }
   0x3   :  { %p1959_p1 = scmp.lt.u32.totalorder %s1955_s16, %s2086_s1 }
   0x5   :  { %p1961_p2 = pnand %p1959_p1, %p1956_p0 }
   0x7   :  { %1964 = shalt.err (!%p1961_p2)
}
   0x8   :  { %s1965_s21 = scalar_lea.vmem %s18_s13, 16384  ;;  %p1970_p4 = scmp.lt.s32.totalorder %s18_s13, %s18_s13 }
   0x9   :  { %p1966_p3 = scmp.ne.s32.totalorder %s18_s13, %s1965_s21  ;;  %p1971_p5 = scmp.lt.s32.totalorder %s1965_s21, %s1965_s21 }
   0xb   :  { %p1972_p6 = por %p1971_p5, %p1970_p4 }
   0xd   :  { %p1973_p7 = pnand %p1972_p6, %p1966_p3 }
   0xf   :  { %1976 = shalt.err (!%p1973_p7)
}
  0x10   :  { %s2004_s22 = smov 64   ;;  %s2005_s23 = smov 4  }
  0x11   :  { %23 = dma.hbm_to_vmem [thread:$0]  %s2086_s1, 16384, %s18_s13, [#allocation3], %s2004_s22, %s2004_s22, %s2005_s23  }
  0x12   :  { %1999 = dma.done.wait [#allocation3], 16384  }
  0x13   :  { %2000 = vsyncadd [#allocation3], 4294950912  ;;  %v1825_v0 = vld [vmem:[#allocation2 + $0x40] sm:$0xff]   ;;  %v1829_v4 = vld [vmem:[#allocation2 + $0x48] sm:$0xff]   ;;  %v2006_v22 = vmov 1966171168   ;;  %v301_v24 = vlaneseq }
  0x14   :  { %v1826_v1 = vld [vmem:[#allocation2 + $0xc0] sm:$0xff]   ;;  %1644 = vmatprep.subr.bf16.mxu0 %v1825_v0  ;;  %v1830_v5 = vld [vmem:[#allocation2 + $0xc8] sm:$0xff]   ;;  %v1833_v8 = vld [vmem:[#allocation2 + $0x50] sm:$0xff]   ;;  %v299_v23 = vunpack.c.l.s4 %v2006_v22 }
  0x15   :  { %v1827_v2 = vld [vmem:[#allocation2] sm:$0xff]   ;;  %1666 = vmatprep.subr.bf16.mxu1 %v1826_v1  ;;  %v1831_v6 = vld [vmem:[#allocation2 + $0x8] sm:$0xff]   ;;  %v1834_v9 = vld [vmem:[#allocation2 + $0xd0] sm:$0xff]   ;;  %v302_v30 = vshrl.u32 %v301_v24, 7 }
  0x16   :  { %v1828_v3 = vld [vmem:[#allocation2 + $0x80] sm:$0xff]   ;;  %1645 = vmatpush3.bf16.msra.mxu0 %v1827_v2  ;;  %v1832_v7 = vld [vmem:[#allocation2 + $0x88] sm:$0xff]   ;;  %v1835_v10 = vld [vmem:[#allocation2 + $0x10] sm:$0xff]   ;;  %v300_v29 = vunpack.c.0.s8 %v299_v23 }
  0x17   :  { %1667 = vmatpush3.bf16.msra.mxu1 %v1828_v3  ;;  %1646 = vmatprep.subr.bf16.mxu0 %v1829_v4  ;;  %v1836_v11 = vld [vmem:[#allocation2 + $0x90] sm:$0xff]   ;;  %v1837_v12 = vld [vmem:[#allocation2 + $0x58] sm:$0xff]   ;;  %v1841_v16 = vld [vmem:[#allocation2 + $0x60] sm:$0xff]  }
  0x18   :  { %1668 = vmatprep.subr.bf16.mxu1 %v1830_v5  ;;  %v1838_v13 = vld [vmem:[#allocation2 + $0xd8] sm:$0xff]   ;;  %v1842_v17 = vld [vmem:[#allocation2 + $0xe0] sm:$0xff]   ;;  %v1845_v20 = vld [vmem:[#allocation2 + $0x68] sm:$0xff]   ;;  %v2040_v35 = vsub.s32 %v300_v29, %v302_v30 }
  0x19   :  { %v1839_v14 = vld [vmem:[#allocation2 + $0x18] sm:$0xff]   ;;  %v1843_v18 = vld [vmem:[#allocation2 + $0x20] sm:$0xff]   ;;  %v1846_v21 = vld [vmem:[#allocation2 + $0xe8] sm:$0xff]  }
  0x1a   :  { %1647 = vmatpush3.bf16.msra.mxu0 %v1831_v6  ;;  %v1840_v15 = vld [vmem:[#allocation2 + $0x98] sm:$0xff]   ;;  %v1844_v19 = vld [vmem:[#allocation2 + $0xa0] sm:$0xff]   ;;  %v1847_v25 = vld [vmem:[#allocation2 + $0x28] sm:$0xff]  }
  0x1b   :  { %1669 = vmatpush3.bf16.msra.mxu1 %v1832_v7  ;;  %1648 = vmatprep.subr.bf16.mxu0 %v1833_v8  ;;  %v1848_v26 = vld [vmem:[#allocation2 + $0xa8] sm:$0xff]   ;;  %v1849_v27 = vld [vmem:[#allocation2 + $0x70] sm:$0xff]   ;;  %v1853_v33 = vld [vmem:[#allocation2 + $0x78] sm:$0xff]  }
  0x1c   :  { %1670 = vmatprep.subr.bf16.mxu1 %v1834_v9  ;;  %v1850_v28 = vld [vmem:[#allocation2 + $0xf0] sm:$0xff]   ;;  %v1854_v34 = vld [vmem:[#allocation2 + $0xf8] sm:$0xff]   ;;  %v30_v38 = vld [vmem:[%s2085_s0] sm:$0xff] }
  0x1d   :  { %v1851_v31 = vld [vmem:[#allocation2 + $0x30] sm:$0xff]   ;;  %v1855_v36 = vld [vmem:[#allocation2 + $0x38] sm:$0xff]   ;;  %v297_v39 = vcombine.high %v30_v38, %v30_v38  ;;  %v304_v40 = vrot.slane %v30_v38, %v2040_v35  ;;  %v1858_v41 = vld [vmem:[#allocation2 + $0x140] sm:$0xff]  }
  0x1e   :  { %1649 = vmatpush3.bf16.msra.mxu0 %v1835_v10  ;;  %v1852_v32 = vld [vmem:[#allocation2 + $0xb0] sm:$0xff]   ;;  %v1856_v37 = vld [vmem:[#allocation2 + $0xb8] sm:$0xff]   ;;  %v1859_v42 = vld [vmem:[#allocation2 + $0x1c0] sm:$0xff]  }
  0x1f   :  { %1671 = vmatpush3.bf16.msra.mxu1 %v1836_v11  ;;  %1650 = vmatprep.subr.bf16.mxu0 %v1837_v12  ;;  %v312_v43 = vcombine.high %v304_v40, %v304_v40  ;;  %v320_v44 = vrot.slane %v304_v40, %v2040_v35  ;;  %v2048_v45 = vrot.slane %v297_v39, %v2040_v35  ;;  %v1860_v47 = vld [vmem:[#allocation2 + $0x100] sm:$0xff]   ;;  %v1862_v50 = vld [vmem:[#allocation2 + $0x148] sm:$0xff]   ;;  %v1866_v57 = vld [vmem:[#allocation2 + $0x150] sm:$0xff]  }
  0x20   :  { %1672 = vmatprep.subr.bf16.mxu1 %v1838_v13  ;;  %v1861_v52 = vld [vmem:[#allocation2 + $0x180] sm:$0xff]   ;;  %v1863_v54 = vld [vmem:[#allocation2 + $0x1c8] sm:$0xff]   ;;  %v1867_v59 = vld [vmem:[#allocation2 + $0x1d0] sm:$0xff]  }
  0x21   :  { %v334_v46 = vrot.slane %v312_v43, %v2040_v35  ;;  %v313_v48 = vcombine.high %v2048_v45, %v2048_v45  ;;  %v342_v49 = vcombine.high %v320_v44, %v320_v44  ;;  %v1864_v55 = vld [vmem:[#allocation2 + $0x108] sm:$0xff]   ;;  %v1868_v60 = vld [vmem:[#allocation2 + $0x110] sm:$0xff]   ;;  %v1870_v61 = vld [vmem:[#allocation2 + $0x158] sm:$0xff]  }
  0x22   :  { %1651 = vmatpush3.bf16.msra.mxu0 %v1839_v14  ;;  %v1865_v58 = vld [vmem:[#allocation2 + $0x188] sm:$0xff]   ;;  %v1869_v62 = vld [vmem:[#allocation2 + $0x190] sm:$0xff]   ;;  %v1871_v63 = vld [vmem:[#allocation2 + $0x1d8] sm:$0xff]  }
  0x23   :  { %1673 = vmatpush3.bf16.msra.mxu1 %v1840_v15  ;;  %1652 = vmatprep.subr.bf16.mxu0 %v1841_v16  ;;  %v344_v51 = vcombine.high %v334_v46, %v334_v46  ;;  %v341_v53 = vrot.slane %v313_v48, %v2040_v35  ;;  %v1872_v0 = vld [vmem:[#allocation2 + $0x118] sm:$0xff]   ;;  %v1874_v1 = vld [vmem:[#allocation2 + $0x160] sm:$0xff]   ;;  %v1878_v5 = vld [vmem:[#allocation2 + $0x168] sm:$0xff]  }
  0x24   :  { %1674 = vmatprep.subr.bf16.mxu1 %v1842_v17  ;;  %1211 = vmatprep.mubr.bf16.mxu0 %v334_v46  ;;  %v1873_v2 = vld [vmem:[#allocation2 + $0x198] sm:$0xff]   ;;  %v1875_v3 = vld [vmem:[#allocation2 + $0x1e0] sm:$0xff]   ;;  %v1879_v7 = vld [vmem:[#allocation2 + $0x1e8] sm:$0xff]   ;;  %v327_v17 = vrot.slane %v2048_v45, %v2040_v35 }
  0x25   :  { %1251 = vmatprep.mubr.bf16.mxu1 %v344_v51  ;;  %v345_v56 = vcombine.high %v341_v53, %v341_v53  ;;  %v1876_v4 = vld [vmem:[#allocation2 + $0x120] sm:$0xff]   ;;  %v1880_v8 = vld [vmem:[#allocation2 + $0x128] sm:$0xff]   ;;  %v1882_v9 = vld [vmem:[#allocation2 + $0x170] sm:$0xff]  }
  0x26   :  { %1653 = vmatpush3.bf16.msra.mxu0 %v1843_v18  ;;  %v1877_v6 = vld [vmem:[#allocation2 + $0x1a0] sm:$0xff]   ;;  %v1881_v10 = vld [vmem:[#allocation2 + $0x1a8] sm:$0xff]   ;;  %v1883_v11 = vld [vmem:[#allocation2 + $0x1f0] sm:$0xff]   ;;  %v343_v22 = vcombine.high %v327_v17, %v327_v17 }
  0x27   :  { %1675 = vmatpush3.bf16.msra.mxu1 %v1844_v19  ;;  %1654 = vmatprep.subr.bf16.mxu0 %v1845_v20  ;;  %v1884_v12 = vld [vmem:[#allocation2 + $0x130] sm:$0xff]   ;;  %v1886_v13 = vld [vmem:[#allocation2 + $0x178] sm:$0xff]   ;;  %v1890_v18 = vld [vmem:[#allocation2 + $0x240] sm:$0xff]  }
  0x28   :  { %1676 = vmatprep.subr.bf16.mxu1 %v1846_v21  ;;  %v1885_v14 = vld [vmem:[#allocation2 + $0x1b0] sm:$0xff]   ;;  %v1887_v15 = vld [vmem:[#allocation2 + $0x1f8] sm:$0xff]   ;;  %v1891_v20 = vld [vmem:[#allocation2 + $0x2c0] sm:$0xff]  }
  0x29   :  { %v1888_v16 = vld [vmem:[#allocation2 + $0x138] sm:$0xff]   ;;  %v1892_v21 = vld [vmem:[#allocation2 + $0x200] sm:$0xff]   ;;  %v1894_v23 = vld [vmem:[#allocation2 + $0x248] sm:$0xff]  }
  0x2a   :  { %1655 = vmatpush3.bf16.msra.mxu0 %v1847_v25  ;;  %v1889_v19 = vld [vmem:[#allocation2 + $0x1b8] sm:$0xff]   ;;  %v1893_v24 = vld [vmem:[#allocation2 + $0x280] sm:$0xff]   ;;  %v1895_v25 = vld [vmem:[#allocation2 + $0x2c8] sm:$0xff]  }
  0x2b   :  { %1677 = vmatpush3.bf16.msra.mxu1 %v1848_v26  ;;  %1656 = vmatprep.subr.bf16.mxu0 %v1849_v27  ;;  %v1896_v26 = vld [vmem:[#allocation2 + $0x208] sm:$0xff]   ;;  %v1898_v27 = vld [vmem:[#allocation2 + $0x250] sm:$0xff]   ;;  %v1907_v38 = vld [vmem:[#allocation2 + $0x2e0] sm:$0xff]  }
  0x2c   :  { %1678 = vmatprep.subr.bf16.mxu1 %v1850_v28  ;;  %v1897_v28 = vld [vmem:[#allocation2 + $0x288] sm:$0xff]   ;;  %v1899_v29 = vld [vmem:[#allocation2 + $0x2d0] sm:$0xff]   ;;  %v1908_v39 = vld [vmem:[#allocation2 + $0x220] sm:$0xff]  }
  0x2d   :  { %v1900_v30 = vld [vmem:[#allocation2 + $0x210] sm:$0xff]   ;;  %v1910_v40 = vld [vmem:[#allocation2 + $0x268] sm:$0xff]   ;;  %v1918_v48 = vld [vmem:[#allocation2 + $0x278] sm:$0xff]  }
  0x2e   :  { %1657 = vmatpush3.bf16.msra.mxu0 %v1851_v31  ;;  %v1902_v31 = vld [vmem:[#allocation2 + $0x258] sm:$0xff]   ;;  %v1912_v43 = vld [vmem:[#allocation2 + $0x228] sm:$0xff]   ;;  %v1915_v46 = vld [vmem:[#allocation2 + $0x2f0] sm:$0xff]  }
  0x2f   :  { %1679 = vmatpush3.bf16.msra.mxu1 %v1852_v32  ;;  %1658 = vmatprep.subr.bf16.mxu0 %v1853_v33  ;;  %v1901_v32 = vld [vmem:[#allocation2 + $0x290] sm:$0xff]   ;;  %v1903_v33 = vld [vmem:[#allocation2 + $0x2d8] sm:$0xff]   ;;  %v1913_v45 = vld [vmem:[#allocation2 + $0x2a8] sm:$0xff]  }
  0x30   :  { %1680 = vmatprep.subr.bf16.mxu1 %v1854_v34  ;;  %v1904_v34 = vld [vmem:[#allocation2 + $0x218] sm:$0xff]   ;;  %v31_v51 = vld [vmem:[%s2085_s0 + $0x8] sm:$0xff] }
  0x32   :  { %1659 = vmatpush3.bf16.msra.mxu0 %v1855_v36  ;;  %v1906_v36 = vld [vmem:[#allocation2 + $0x260] sm:$0xff]  }
  0x33   :  { %1681 = vmatpush3.bf16.msra.mxu1 %v1856_v37  ;;  %1688 = vmatprep.subr.bf16.mxu0 %v1858_v41  ;;  %v1905_v37 = vld [vmem:[#allocation2 + $0x298] sm:$0xff]   ;;  %v1909_v41 = vld [vmem:[#allocation2 + $0x2a0] sm:$0xff]  }
  0x34   :  { %1710 = vmatprep.subr.bf16.mxu1 %v1859_v42  ;;  %v1911_v42 = vld [vmem:[#allocation2 + $0x2e8] sm:$0xff]  }
  0x35   :  { %1212 = vmatmul.mubr.bf16.vlgmr.msra.gmra.mrb[0].mxu0 %v320_v44  ;;  %v1914_v44 = vld [vmem:[#allocation2 + $0x270] sm:$0xff]  }
  0x36   :  { %1689 = vmatpush3.bf16.msra.mxu0 %v1860_v47  ;;  %1252 = vmatmul.mubr.bf16.vlgmr.msra.gmra.mrb[0].mxu1 %v342_v49  ;;  %v1916_v47 = vld [vmem:[#allocation2 + $0x230] sm:$0xff]  }
  0x37   :  { %1690 = vmatprep.subr.bf16.mxu0 %v1862_v50  ;;  %1711 = vmatpush3.bf16.msra.mxu1 %v1861_v52  ;;  %v1917_v49 = vld [vmem:[#allocation2 + $0x2b0] sm:$0xff]   ;;  %v1919_v50 = vld [vmem:[#allocation2 + $0x2f8] sm:$0xff]  }
  0x38   :  { %1291 = vmatprep.mubr.bf16.mxu0 %v341_v53  ;;  %1712 = vmatprep.subr.bf16.mxu1 %v1863_v54  ;;  %v1920_v52 = vld [vmem:[#allocation2 + $0x238] sm:$0xff]   ;;  %v353_v53 = vrot.slane %v31_v51, %v2040_v35  ;;  %v346_v54 = vcombine.high %v31_v51, %v31_v51 }
  0x39   :  { %1331 = vmatprep.mubr.bf16.mxu1 %v345_v56  ;;  %v1921_v56 = vld [vmem:[#allocation2 + $0x2b8] sm:$0xff]  }
  0x3a   :  { %1691 = vmatpush3.bf16.msra.mxu0 %v1864_v55  ;;  %v1922_v55 = vld [vmem:[#allocation2 + $0x340] sm:$0xff]  }
  0x3b   :  { %1692 = vmatprep.subr.bf16.mxu0 %v1866_v57  ;;  %1713 = vmatpush3.bf16.msra.mxu1 %v1865_v58  ;;  %v361_v57 = vcombine.high %v353_v53, %v353_v53  ;;  %v369_v58 = vrot.slane %v353_v53, %v2040_v35 }
  0x3c   :  { %1714 = vmatprep.subr.bf16.mxu1 %v1867_v59  ;;  %v2062_v59 = vrot.slane %v346_v54, %v2040_v35 }
  0x3e   :  { %1693 = vmatpush3.bf16.msra.mxu0 %v1868_v60  ;;  %v1923_v60 = vld [vmem:[#allocation2 + $0x3c0] sm:$0xff]  }
  0x3f   :  { %1694 = vmatprep.subr.bf16.mxu0 %v1870_v61  ;;  %1715 = vmatpush3.bf16.msra.mxu1 %v1869_v62  ;;  %v383_v61 = vrot.slane %v361_v57, %v2040_v35  ;;  %v1924_v62 = vld [vmem:[#allocation2 + $0x300] sm:$0xff]  }
  0x40   :  { %1716 = vmatprep.subr.bf16.mxu1 %v1871_v63  ;;  %v362_v63 = vcombine.high %v2062_v59, %v2062_v59 }
  0x42   :  { %1695 = vmatpush3.bf16.msra.mxu0 %v1872_v0  ;;  %v391_v0 = vcombine.high %v369_v58, %v369_v58 }
  0x43   :  { %1696 = vmatprep.subr.bf16.mxu0 %v1874_v1  ;;  %1717 = vmatpush3.bf16.msra.mxu1 %v1873_v2  ;;  %v1926_v1 = vld [vmem:[#allocation2 + $0x348] sm:$0xff]   ;;  %v393_v2 = vcombine.high %v383_v61, %v383_v61 }
  0x44   :  { %1718 = vmatprep.subr.bf16.mxu1 %v1875_v3  ;;  %v1925_v3 = vld [vmem:[#allocation2 + $0x380] sm:$0xff]  }
  0x46   :  { %1697 = vmatpush3.bf16.msra.mxu0 %v1876_v4  ;;  %v390_v4 = vrot.slane %v362_v63, %v2040_v35 }
  0x47   :  { %1698 = vmatprep.subr.bf16.mxu0 %v1878_v5  ;;  %1719 = vmatpush3.bf16.msra.mxu1 %v1877_v6  ;;  %v1927_v5 = vld [vmem:[#allocation2 + $0x3c8] sm:$0xff]  }
  0x48   :  { %1720 = vmatprep.subr.bf16.mxu1 %v1879_v7  ;;  %v1928_v6 = vld [vmem:[#allocation2 + $0x308] sm:$0xff]   ;;  %v394_v7 = vcombine.high %v390_v4, %v390_v4 }
  0x4a   :  { %1699 = vmatpush3.bf16.msra.mxu0 %v1880_v8  ;;  %v1930_v8 = vld [vmem:[#allocation2 + $0x350] sm:$0xff]  }
  0x4b   :  { %1700 = vmatprep.subr.bf16.mxu0 %v1882_v9  ;;  %1721 = vmatpush3.bf16.msra.mxu1 %v1881_v10  ;;  %v1929_v9 = vld [vmem:[#allocation2 + $0x388] sm:$0xff]   ;;  %v1931_v10 = vld [vmem:[#allocation2 + $0x3d0] sm:$0xff]  }
  0x4c   :  { %1722 = vmatprep.subr.bf16.mxu1 %v1883_v11  ;;  %v1932_v11 = vld [vmem:[#allocation2 + $0x310] sm:$0xff]  }
  0x4e   :  { %1701 = vmatpush3.bf16.msra.mxu0 %v1884_v12  ;;  %v1934_v12 = vld [vmem:[#allocation2 + $0x358] sm:$0xff]  }
  0x4f   :  { %1702 = vmatprep.subr.bf16.mxu0 %v1886_v13  ;;  %1723 = vmatpush3.bf16.msra.mxu1 %v1885_v14  ;;  %v1933_v13 = vld [vmem:[#allocation2 + $0x390] sm:$0xff]   ;;  %v1935_v14 = vld [vmem:[#allocation2 + $0x3d8] sm:$0xff]  }
  0x50   :  { %1724 = vmatprep.subr.bf16.mxu1 %v1887_v15  ;;  %v1936_v15 = vld [vmem:[#allocation2 + $0x318] sm:$0xff]  }
  0x52   :  { %1703 = vmatpush3.bf16.msra.mxu0 %v1888_v16  ;;  %v1938_v16 = vld [vmem:[#allocation2 + $0x360] sm:$0xff]  }
  0x53   :  { %1732 = vmatprep.subr.bf16.mxu0 %v1890_v18  ;;  %1725 = vmatpush3.bf16.msra.mxu1 %v1889_v19  ;;  %v1939_v18 = vld [vmem:[#allocation2 + $0x3e0] sm:$0xff]  }
  0x54   :  { %1754 = vmatprep.subr.bf16.mxu1 %v1891_v20  ;;  %v1940_v19 = vld [vmem:[#allocation2 + $0x320] sm:$0xff]   ;;  %v1942_v20 = vld [vmem:[#allocation2 + $0x368] sm:$0xff]  }
  0x55   :  { %1292 = vmatmul.mubr.bf16.vlgmr.msra.gmra.mrb[4].mxu0 %v327_v17  ;;  %v1937_v17 = vld [vmem:[#allocation2 + $0x398] sm:$0xff]  }
  0x56   :  { %1733 = vmatpush3.bf16.msra.mxu0 %v1892_v21  ;;  %1332 = vmatmul.mubr.bf16.vlgmr.msra.gmra.mrb[4].mxu1 %v343_v22  ;;  %v1941_v21 = vld [vmem:[#allocation2 + $0x3a0] sm:$0xff]   ;;  %v1943_v22 = vld [vmem:[#allocation2 + $0x3e8] sm:$0xff]  }
  0x57   :  { %1734 = vmatprep.subr.bf16.mxu0 %v1894_v23  ;;  %1755 = vmatpush3.bf16.msra.mxu1 %v1893_v24  ;;  %v1944_v23 = vld [vmem:[#allocation2 + $0x328] sm:$0xff]   ;;  %v1946_v24 = vld [vmem:[#allocation2 + $0x370] sm:$0xff]  }
  0x58   :  { %1756 = vmatprep.subr.bf16.mxu1 %v1895_v25  ;;  %1371 = vmatprep.mubr.bf16.mxu0 %v383_v61  ;;  %v1945_v25 = vld [vmem:[#allocation2 + $0x3a8] sm:$0xff]  }
  0x59   :  { %1411 = vmatprep.mubr.bf16.mxu1 %v393_v2 }
  0x5a   :  { %1735 = vmatpush3.bf16.msra.mxu0 %v1896_v26  ;;  %v1947_v26 = vld [vmem:[#allocation2 + $0x3f0] sm:$0xff]  }
  0x5b   :  { %1736 = vmatprep.subr.bf16.mxu0 %v1898_v27  ;;  %1757 = vmatpush3.bf16.msra.mxu1 %v1897_v28  ;;  %v1948_v27 = vld [vmem:[#allocation2 + $0x330] sm:$0xff]   ;;  %v1950_v28 = vld [vmem:[#allocation2 + $0x378] sm:$0xff]  }
  0x5c   :  { %1758 = vmatprep.subr.bf16.mxu1 %v1899_v29  ;;  %v1949_v29 = vld [vmem:[#allocation2 + $0x3b0] sm:$0xff]  }
  0x5e   :  { %1737 = vmatpush3.bf16.msra.mxu0 %v1900_v30  ;;  %v1951_v30 = vld [vmem:[#allocation2 + $0x3f8] sm:$0xff]  }
  0x5f   :  { %1738 = vmatprep.subr.bf16.mxu0 %v1902_v31  ;;  %1759 = vmatpush3.bf16.msra.mxu1 %v1901_v32  ;;  %v1952_v31 = vld [vmem:[#allocation2 + $0x338] sm:$0xff]   ;;  %v376_v32 = vrot.slane %v2062_v59, %v2040_v35 }
  0x60   :  { %1760 = vmatprep.subr.bf16.mxu1 %v1903_v33  ;;  %v1953_v33 = vld [vmem:[#allocation2 + $0x3b8] sm:$0xff]  }
  0x62   :  { %1739 = vmatpush3.bf16.msra.mxu0 %v1904_v34  ;;  %v392_v34 = vcombine.high %v376_v32, %v376_v32 }
  0x63   :  { %1740 = vmatprep.subr.bf16.mxu0 %v1906_v36  ;;  %1761 = vmatpush3.bf16.msra.mxu1 %v1905_v37  ;;  %v1515_v37 = vld [vmem:[%s2087_s2] ss:$0 sm:$0xff]  ;;  %s2007_s2 = smov [#allocation5]  }
  0x64   :  { %1762 = vmatprep.subr.bf16.mxu1 %v1907_v38  ;;  %s1506_s30 = sshll.u32 %s2007_s2, 4  ;;  %s1507_s30 = int_to_ptr.vmem [resolvable:$true] %s1506_s30 }
  0x65   :  { %s1977_s4 = scalar_lea.vmem %s1507_s30, 32  ;;  %p1982_p9 = scmp.lt.s32.totalorder %s1507_s30, %s1507_s30 }
  0x66   :  { %1741 = vmatpush3.bf16.msra.mxu0 %v1908_v39  ;;  %p1978_p8 = scmp.ne.s32.totalorder %s1507_s30, %s1977_s4  ;;  %p1983_p10 = scmp.lt.s32.totalorder %s1977_s4, %s1977_s4 }
  0x67   :  { %1742 = vmatprep.subr.bf16.mxu0 %v1910_v40  ;;  %1763 = vmatpush3.bf16.msra.mxu1 %v1909_v41 }
  0x68   :  { %1764 = vmatprep.subr.bf16.mxu1 %v1911_v42  ;;  %p1984_p11 = por %p1983_p10, %p1982_p9 }
  0x6a   :  { %1743 = vmatpush3.bf16.msra.mxu0 %v1912_v43  ;;  %p1985_p12 = pnand %p1984_p11, %p1978_p8 }
  0x6b   :  { %1744 = vmatprep.subr.bf16.mxu0 %v1914_v44  ;;  %1765 = vmatpush3.bf16.msra.mxu1 %v1913_v45 }
  0x6c   :  { %1766 = vmatprep.subr.bf16.mxu1 %v1915_v46 }
  0x6e   :  { %1745 = vmatpush3.bf16.msra.mxu0 %v1916_v47 }
  0x6f   :  { %1746 = vmatprep.subr.bf16.mxu0 %v1918_v48  ;;  %1767 = vmatpush3.bf16.msra.mxu1 %v1917_v49 }
  0x70   :  { %1768 = vmatprep.subr.bf16.mxu1 %v1919_v50 }
  0x72   :  { %1747 = vmatpush3.bf16.msra.mxu0 %v1920_v52 }
  0x73   :  { %1776 = vmatprep.subr.bf16.mxu0 %v1922_v55  ;;  %1769 = vmatpush3.bf16.msra.mxu1 %v1921_v56 }
  0x74   :  { %1798 = vmatprep.subr.bf16.mxu1 %v1923_v60 }
  0x75   :  { %1372 = vmatmul.mubr.bf16.vlgmr.msra.gmra.mrb[8].mxu0 %v369_v58 }
  0x76   :  { %1777 = vmatpush3.bf16.msra.mxu0 %v1924_v62  ;;  %1412 = vmatmul.mubr.bf16.vlgmr.msra.gmra.mrb[8].mxu1 %v391_v0 }
  0x77   :  { %1778 = vmatprep.subr.bf16.mxu0 %v1926_v1  ;;  %1799 = vmatpush3.bf16.msra.mxu1 %v1925_v3 }
  0x78   :  { %1451 = vmatprep.mubr.bf16.mxu0 %v390_v4  ;;  %1800 = vmatprep.subr.bf16.mxu1 %v1927_v5 }
  0x79   :  { %1491 = vmatprep.mubr.bf16.mxu1 %v394_v7 }
  0x7a   :  { %1779 = vmatpush3.bf16.msra.mxu0 %v1928_v6 }
  0x7b   :  { %1780 = vmatprep.subr.bf16.mxu0 %v1930_v8  ;;  %1801 = vmatpush3.bf16.msra.mxu1 %v1929_v9 }
  0x7c   :  { %1802 = vmatprep.subr.bf16.mxu1 %v1931_v10 }
  0x7e   :  { %1781 = vmatpush3.bf16.msra.mxu0 %v1932_v11 }
  0x7f   :  { %1782 = vmatprep.subr.bf16.mxu0 %v1934_v12  ;;  %1803 = vmatpush3.bf16.msra.mxu1 %v1933_v13 }
  0x80   :  { %1804 = vmatprep.subr.bf16.mxu1 %v1935_v14 }
  0x82   :  { %1783 = vmatpush3.bf16.msra.mxu0 %v1936_v15 }
  0x83   :  { %1784 = vmatprep.subr.bf16.mxu0 %v1938_v16  ;;  %1805 = vmatpush3.bf16.msra.mxu1 %v1937_v17 }
  0x84   :  { %1806 = vmatprep.subr.bf16.mxu1 %v1939_v18 }
  0x86   :  { %1785 = vmatpush3.bf16.msra.mxu0 %v1940_v19 }
  0x87   :  { %1786 = vmatprep.subr.bf16.mxu0 %v1942_v20  ;;  %1807 = vmatpush3.bf16.msra.mxu1 %v1941_v21 }
  0x88   :  { %1808 = vmatprep.subr.bf16.mxu1 %v1943_v22 }
  0x8a   :  { %1787 = vmatpush3.bf16.msra.mxu0 %v1944_v23 }
  0x8b   :  { %1788 = vmatprep.subr.bf16.mxu0 %v1946_v24  ;;  %1809 = vmatpush3.bf16.msra.mxu1 %v1945_v25 }
  0x8c   :  { %1810 = vmatprep.subr.bf16.mxu1 %v1947_v26 }
  0x8e   :  { %1789 = vmatpush3.bf16.msra.mxu0 %v1948_v27 }
  0x8f   :  { %1790 = vmatprep.subr.bf16.mxu0 %v1950_v28  ;;  %1811 = vmatpush3.bf16.msra.mxu1 %v1949_v29 }
  0x90   :  { %1812 = vmatprep.subr.bf16.mxu1 %v1951_v30 }
  0x92   :  { %1791 = vmatpush3.bf16.msra.mxu0 %v1952_v31 }
  0x93   :  { %1813 = vmatpush3.bf16.msra.mxu1 %v1953_v33 }
  0x95   :  { %1452 = vmatmul.mubr.bf16.vlgmr.msra.gmra.mrb[12].mxu0 %v376_v32 }
  0x96   :  { %1492 = vmatmul.mubr.bf16.vlgmr.msra.gmra.mrb[12].mxu1 %v392_v34 }
 0x108   :  { %v1660_v36 = vpop.f32.mrb[0].mxu0 }
 0x109   :  { %v1661_v38 = vpop.f32.mrb[1].mxu0  ;;  %v1682_v39 = vpop.f32.mrb[0].mxu1 }
 0x10a   :  { %v1662_v40 = vadd.f32 %v1661_v38, %v1660_v36  ;;  %v1663_v41 = vpop.f32.mrb[2].mxu0  ;;  %v1683_v42 = vpop.f32.mrb[1].mxu1 }
 0x10b   :  { %v1664_v43 = vpop.f32.mrb[3].mxu0  ;;  %v1684_v44 = vadd.f32 %v1683_v42, %v1682_v39  ;;  %v1685_v45 = vpop.f32.mrb[2].mxu1 }
 0x10c   :  { %v1214_v35 = vadd.f32 %v1662_v40, %v1515_v37  ;;  %v1686_v46 = vpop.f32.mrb[3].mxu1 }
 0x10e   :  { %v1254_v47 = vadd.f32 %v1684_v44, %v1214_v35 }
 0x128   :  { %v1704_v48 = vpop.f32.mrb[4].mxu0 }
 0x129   :  { %v1705_v49 = vpop.f32.mrb[5].mxu0  ;;  %v1726_v50 = vpop.f32.mrb[4].mxu1 }
 0x12a   :  { %v1706_v51 = vadd.f32 %v1705_v49, %v1704_v48  ;;  %v1707_v52 = vpop.f32.mrb[6].mxu0  ;;  %v1727_v53 = vpop.f32.mrb[5].mxu1 }
 0x12b   :  { %v1708_v54 = vpop.f32.mrb[7].mxu0  ;;  %v1728_v56 = vadd.f32 %v1727_v53, %v1726_v50  ;;  %v1729_v57 = vpop.f32.mrb[6].mxu1 }
 0x12c   :  { %v1294_v55 = vadd.f32 %v1706_v51, %v1254_v47  ;;  %v1730_v58 = vpop.f32.mrb[7].mxu1 }
 0x12e   :  { %v1334_v59 = vadd.f32 %v1728_v56, %v1294_v55 }
 0x148   :  { %v1748_v60 = vpop.f32.mrb[8].mxu0 }
 0x149   :  { %v1749_v61 = vpop.f32.mrb[9].mxu0  ;;  %v1770_v62 = vpop.f32.mrb[8].mxu1 }
 0x14a   :  { %v1750_v63 = vadd.f32 %v1749_v61, %v1748_v60  ;;  %v1751_v0 = vpop.f32.mrb[10].mxu0  ;;  %v1771_v1 = vpop.f32.mrb[9].mxu1 }
 0x14b   :  { %v1752_v2 = vpop.f32.mrb[11].mxu0  ;;  %v1772_v4 = vadd.f32 %v1771_v1, %v1770_v62  ;;  %v1773_v5 = vpop.f32.mrb[10].mxu1 }
 0x14c   :  { %v1374_v3 = vadd.f32 %v1750_v63, %v1334_v59  ;;  %v1774_v6 = vpop.f32.mrb[11].mxu1 }
 0x14e   :  { %v1414_v7 = vadd.f32 %v1772_v4, %v1374_v3 }
 0x168   :  { %v1792_v8 = vpop.f32.mrb[12].mxu0 }
 0x169   :  { %v1793_v9 = vpop.f32.mrb[13].mxu0  ;;  %v1814_v10 = vpop.f32.mrb[12].mxu1 }
 0x16a   :  { %v1794_v11 = vadd.f32 %v1793_v9, %v1792_v8  ;;  %v1795_v12 = vpop.f32.mrb[14].mxu0  ;;  %v1815_v13 = vpop.f32.mrb[13].mxu1 }
 0x16b   :  { %v1796_v14 = vpop.f32.mrb[15].mxu0  ;;  %v1816_v16 = vadd.f32 %v1815_v13, %v1814_v10  ;;  %v1817_v17 = vpop.f32.mrb[14].mxu1 }
 0x16c   :  { %v1454_v15 = vadd.f32 %v1794_v11, %v1414_v7  ;;  %v1818_v18 = vpop.f32.mrb[15].mxu1 }
 0x16e   :  { %v1494_v19 = vadd.f32 %v1816_v16, %v1454_v15 }
 0x170   :  { %1499 = vst [vmem:[#allocation5] sm:$0x3] %v1494_v19 }
 0x171   :  { %1988 = shalt.err (!%p1985_p12)
}
 0x172   :  { %s1989_s7 = scalar_lea.hbm %s2088_s3, 32 }
 0x173   :  { %p1990_p13 = scmp.ne.s32.totalorder %s2088_s3, %s1989_s7  ;;  %p1993_p0 = scmp.lt.u32.totalorder %s1989_s7, %s2088_s3 }
 0x175   :  { %p1995_p1 = pnand %p1993_p0, %p1990_p13 }
 0x177   :  { %1998 = shalt.err (!%p1995_p1)
}
 0x178   :  { %1509 = dma.vmem_to_hbm [thread:$0]  %s1507_s30, 32, %s2088_s3, [#allocation4]  }
 0x179   :  { %2001 = dma.done.wait [#allocation4], 32  }
 0x17a   :  { %2002 = vsyncadd [#allocation4], 4294967264 }
 0x17b   :  { %1513 = vsyncpa [#allocation3], 1 }
 0x17c   :  { %1514 = vsyncpa [#allocation4], 1 }

</bundles_post_ra>
